<compile_context>
chip_gen: v6e
topology: v6e:2x2x1
jax: 0.10.0
libtpu: 0.0.40
codegen_flags: <defaults>
</compile_context>

<pallas_src>
import jax
import jax.numpy as jnp
import numpy as np
from jax.experimental import pallas as pl
from jax.experimental.pallas import tpu as pltpu


# ---------------------------------------------------------------------------
# Fused kernel: one grid step = one image; everything stays in VMEM.
# ---------------------------------------------------------------------------
def _ssl_fused_kernel(x_ref, w1_ref, b1_ref, w2_ref, b2_ref, wc_ref, bc_ref,
                      o_ref, xp1_ref, xp2_ref, pb1_ref, pb2_ref):
    _, H1, W1, C0 = x_ref.shape
    C1 = w1_ref.shape[2]
    C2 = w2_ref.shape[2]
    H2, W2 = H1 // 2, W1 // 2          # spatial after pool1
    H3, W3 = H2 // 2, W2 // 2          # spatial after pool2
    PAD_OFF = 8                        # aligned sublane offset of the image
                                       # inside the zero-border scratch

    def conv3x3_relu(xpad_ref, x_val, w_ref, b_ref, h, w, cin, cout):
        """'same' 3x3 conv + bias + ReLU; in-kernel im2col as 9 shifted matmuls."""
        xpad_ref[...] = jnp.zeros_like(xpad_ref)
        # image placed at (row 1, col PAD_OFF) -> zero border all around
        xpad_ref[pl.ds(1, h), pl.ds(PAD_OFF, w), :] = x_val
        acc = jnp.zeros((h * w, cout), jnp.float32)
        for ki in range(3):
            for kj in range(3):
                patch = xpad_ref[pl.ds(ki, h), pl.ds(PAD_OFF - 1 + kj, w), :]
                patch = patch.reshape(h * w, cin).astype(jnp.bfloat16)
                acc = acc + jnp.dot(patch, w_ref[ki * 3 + kj],
                                    preferred_element_type=jnp.float32)
        # f32 epilogue (bias + ReLU) on the accumulator.
        return jnp.maximum(acc + b_ref[...], 0.0)           # (h*w, cout) f32

    def maxpool2x2(pbuf_ref, h_flat, h, w, c):
        """2x2/2 max-pool of a row-major (h*w, c) activation -> (h/2*w/2, c)."""
        # pool along H: pair adjacent row-blocks (pure major-dim ops).
        t = h_flat.reshape(h // 2, 2, w, c)
        hp = jnp.maximum(t[:, 0], t[:, 1])                   # (h/2, w, c)
        pbuf_ref[...] = hp.reshape((h // 2) * w, c)
        # pool along W: adjacent rows of the flat buffer via strided VMEM reads.
        half = (h // 2) * w // 2
        ev = pbuf_ref[pl.ds(0, half, stride=2), :]
        od = pbuf_ref[pl.ds(1, half, stride=2), :]
        return jnp.maximum(ev, od)                           # (h/2*w/2, c) f32

    # conv1 -> ReLU -> pool1
    a1 = conv3x3_relu(xp1_ref, x_ref[0], w1_ref, b1_ref, H1, W1, C0, C1)
    p1 = maxpool2x2(pb1_ref, a1, H1, W1, C1)                 # (H2*W2, C1)

    # conv2 -> ReLU -> pool2
    a2 = conv3x3_relu(xp2_ref, p1.reshape(H2, W2, C1), w2_ref, b2_ref,
                      H2, W2, C1, C2)
    p2 = maxpool2x2(pb2_ref, a2, H2, W2, C2)                 # (H3*W3, C2)

    # classifier head: scores = flatten(p2) @ Wc + bc, computed as a sum of
    # per-spatial-row (1, C2) @ (C2, NCLS) matmuls so no lane-merging reshape
    # is needed (weights were pre-laid-out as (H3*W3, C2, NCLS)).
    scores = bc_ref[...]                                     # (1, NCLS) f32
    for r in range(H3 * W3):
        v = p2[r:r + 1, :].astype(jnp.bfloat16)              # (1, C2)
        scores = scores + jnp.dot(v, wc_ref[r],
                                  preferred_element_type=jnp.float32)
    o_ref[0] = scores


# ---------------------------------------------------------------------------
# Wrapper
# ---------------------------------------------------------------------------
@jax.jit
def ssl_train_forward(kparams, x_nchw, y):
    """Equivalent of SSL_Train.forward(x, y) -> classifier scores (B, num_class)."""
    del y  # SSL_Linear takes y for API parity; the score math does not use it.
    x = jnp.transpose(x_nchw, (0, 2, 3, 1)).astype(jnp.float32)   # NCHW -> NHWC
    B, H, W, C0 = x.shape
    C1 = kparams["w1"].shape[2]
    C2 = kparams["w2"].shape[2]
    NCLS = kparams["wc"].shape[2]
    H2, W2 = H // 2, W // 2
    H3, W3 = H2 // 2, W2 // 2

    out = pl.pallas_call(
        _ssl_fused_kernel,
        out_shape=jax.ShapeDtypeStruct((B, 1, NCLS), jnp.float32),
        grid=(B,),
        in_specs=[
            pl.BlockSpec((1, H, W, C0), lambda b: (b, 0, 0, 0)),
            pl.BlockSpec((9, C0, C1), lambda b: (0, 0, 0)),
            pl.BlockSpec((1, C1), lambda b: (0, 0)),
            pl.BlockSpec((9, C1, C2), lambda b: (0, 0, 0)),
            pl.BlockSpec((1, C2), lambda b: (0, 0)),
            pl.BlockSpec((H3 * W3, C2, NCLS), lambda b: (0, 0, 0)),
            pl.BlockSpec((1, NCLS), lambda b: (0, 0)),
        ],
        out_specs=pl.BlockSpec((1, 1, NCLS), lambda b: (b, 0, 0)),
        scratch_shapes=[
            pltpu.VMEM((H + 2, W + 16, C0), jnp.float32),    # padded conv1 input
            pltpu.VMEM((H2 + 2, W2 + 16, C1), jnp.float32),  # padded conv2 input
            pltpu.VMEM((H2 * W, C1), jnp.float32),           # pool1 buffer
            pltpu.VMEM((H3 * W2, C2), jnp.float32),          # pool2 buffer
        ],
        compiler_params=pltpu.CompilerParams(
            dimension_semantics=("parallel",)),
    )(x, kparams["w1"], kparams["b1"], kparams["w2"], kparams["b2"],
      kparams["wc"], kparams["bc"])
    return out.reshape(B, NCLS)


# ---------------------------------------------------------------------------
# Parameters (synthetic backbone) + one-time hoisted layout prep
# ---------------------------------------------------------------------------
def init_params(num_class=5, in_ch=4, c1=8, c2=16, spatial=16, seed=0):
    """Synthetic PyTorch-layout parameters for the Conv-2 backbone + linear head."""
    k1, k2, k3, k4, k5, k6 = jax.random.split(jax.random.PRNGKey(seed), 6)
    h3 = spatial // 4
    feat_dim = h3 * h3 * c2  # flattened in (h, w, c) order
    return {
        "conv1_w": 0.1 * jax.random.normal(k1, (c1, in_ch, 3, 3), jnp.float32),
        "conv1_b": 0.1 * jax.random.normal(k2, (c1,), jnp.float32),
        "conv2_w": 0.1 * jax.random.normal(k3, (c2, c1, 3, 3), jnp.float32),
        "conv2_b": 0.1 * jax.random.normal(k4, (c2,), jnp.float32),
        "cls_w": 0.1 * jax.random.normal(k5, (num_class, feat_dim), jnp.float32),
        "cls_b": 0.1 * jax.random.normal(k6, (num_class,), jnp.float32),
    }


def prepare_params(params):
    """One-time (hoisted) weight layout prep for the fused kernel.

    conv weights (Cout, Cin, 3, 3) -> (9, Cin, Cout) bf16 (kernel-tap major),
    classifier  (NCLS, feat)       -> (n_spatial, C2, NCLS) bf16,
    biases                         -> (1, C) f32.
    # TODO(synk): model_func()/backbone.SSL_Linear are not provided; synthetic
    # Conv-2 backbone + plain linear head. feat_dim is flattened in NHWC
    # (h, w, c) order; a real PyTorch (NCHW-flatten) checkpoint would need an
    # extra permutation here.
    """
    c1, in_ch = params["conv1_w"].shape[:2]
    c2 = params["conv2_w"].shape[0]
    ncls, feat = params["cls_w"].shape
    n_sp = feat // c2
    w1 = jnp.transpose(params["conv1_w"], (2, 3, 1, 0)).reshape(9, in_ch, c1)
    w2 = jnp.transpose(params["conv2_w"], (2, 3, 1, 0)).reshape(9, c1, c2)
    wc = jnp.transpose(params["cls_w"].reshape(ncls, n_sp, c2), (1, 2, 0))
    return {
        "w1": w1.astype(jnp.bfloat16),
        "b1": params["conv1_b"].reshape(1, c1).astype(jnp.float32),
        "w2": w2.astype(jnp.bfloat16),
        "b2": params["conv2_b"].reshape(1, c2).astype(jnp.float32),
        "wc": wc.astype(jnp.bfloat16),
        "bc": params["cls_b"].reshape(1, ncls).astype(jnp.float32),
    }


# ---------------------------------------------------------------------------
# Pure-JAX reference (mirrors the kernel's bf16-operand / f32-accum numerics)
# ---------------------------------------------------------------------------
def reference_forward(kparams, x_nchw):
    x = jnp.transpose(x_nchw, (0, 2, 3, 1)).astype(jnp.float32)

    def conv3x3_relu(x, w9, b):
        B, H, W, C = x.shape
        cout = w9.shape[-1]
        xp = jnp.pad(x, ((0, 0), (1, 1), (1, 1), (0, 0)))
        acc = jnp.zeros((B, H, W, cout), jnp.float32)
        for ki in range(3):
            for kj in range(3):
                patch = xp[:, ki:ki + H, kj:kj + W, :].astype(jnp.bfloat16)
                acc = acc + jnp.dot(
                    patch.reshape(-1, C), w9[ki * 3 + kj],
                    preferred_element_type=jnp.float32).reshape(B, H, W, cout)
        return jnp.maximum(acc + b.reshape(1, 1, 1, -1), 0.0)

    def pool(x):
        B, H, W, C = x.shape
        return jnp.max(x.reshape(B, H // 2, 2, W // 2, 2, C), axis=(2, 4))

    h = pool(conv3x3_relu(x, kparams["w1"], kparams["b1"]))
    h = pool(conv3x3_relu(h, kparams["w2"], kparams["b2"]))
    feats = h.reshape(h.shape[0], -1).astype(jnp.bfloat16)       # (B, n_sp*C2)
    wc = kparams["wc"].reshape(-1, kparams["wc"].shape[-1])      # (feat, NCLS)
    return jnp.dot(feats, wc, preferred_element_type=jnp.float32) + kparams["bc"]


if __name__ == "__main__":
    num_class = 5
    B, C_in, HW = 2, 4, 16
    kx, ky = jax.random.split(jax.random.PRNGKey(0))
    x = jax.random.normal(kx, (B, C_in, HW, HW), jnp.float32)    # NCHW like PyTorch
    y = jax.random.randint(ky, (B,), 0, num_class)

    params = init_params(num_class=num_class, in_ch=C_in, spatial=HW)
    kparams = prepare_params(params)     # hoisted, one-time weight layout prep

    scores = ssl_train_forward(kparams, x, y)
    scores = jax.block_until_ready(scores)
    assert scores.shape == (B, num_class), scores.shape

    ref = reference_forward(kparams, x)
    np.testing.assert_allclose(np.asarray(scores), np.asarray(ref),
                               atol=1e-2, rtol=1e-2)
    print("KERNEL_OK")
</pallas_src>

<mosaic_0001>
module attributes {stable_mosaic.version = 11 : i64} {
  func.func @_ssl_fused_kernel(%arg0: i32, %arg1: memref<1x16x16x4xf32, #tpu.memory_space<vmem>>, %arg2: memref<9x4x8xbf16, #tpu.memory_space<vmem>>, %arg3: memref<1x8xf32, #tpu.memory_space<vmem>>, %arg4: memref<9x8x16xbf16, #tpu.memory_space<vmem>>, %arg5: memref<1x16xf32, #tpu.memory_space<vmem>>, %arg6: memref<16x16x5xbf16, #tpu.memory_space<vmem>>, %arg7: memref<1x5xf32, #tpu.memory_space<vmem>>, %arg8: memref<1x1x5xf32, #tpu.memory_space<vmem>>, %arg9: memref<18x32x4xf32, #tpu.memory_space<vmem>>, %arg10: memref<10x24x8xf32, #tpu.memory_space<vmem>>, %arg11: memref<128x8xf32, #tpu.memory_space<vmem>>, %arg12: memref<32x16xf32, #tpu.memory_space<vmem>>) attributes {dimension_semantics = [#tpu.dimension_semantics<parallel>], iteration_bounds = array<i64: 2>, scalar_prefetch = 0 : i64, scratch_operands = 4 : i64, tpu.core_type = #tpu.core_type<tc>, window_params = [{transform_indices = @transform_0, window_bounds = array<i64: 1, 16, 16, 4>}, {pipeline_mode = #tpu.pipeline_mode<synchronous>, transform_indices = @transform_1, window_bounds = array<i64: 9, 4, 8>}, {pipeline_mode = #tpu.pipeline_mode<synchronous>, transform_indices = @transform_2, window_bounds = array<i64: 1, 8>}, {pipeline_mode = #tpu.pipeline_mode<synchronous>, transform_indices = @transform_3, window_bounds = array<i64: 9, 8, 16>}, {pipeline_mode = #tpu.pipeline_mode<synchronous>, transform_indices = @transform_4, window_bounds = array<i64: 1, 16>}, {pipeline_mode = #tpu.pipeline_mode<synchronous>, transform_indices = @transform_5, window_bounds = array<i64: 16, 16, 5>}, {pipeline_mode = #tpu.pipeline_mode<synchronous>, transform_indices = @transform_6, window_bounds = array<i64: 1, 5>}, {transform_indices = @transform_7, window_bounds = array<i64: 1, 1, 5>}]} {
    %c0 = arith.constant 0 : index
    %c0_0 = arith.constant 0 : index
    %c0_1 = arith.constant 0 : index
    %c0_2 = arith.constant 0 : index
    %0 = vector.load %arg1[%c0, %c0_0, %c0_1, %c0_2] : memref<1x16x16x4xf32, #tpu.memory_space<vmem>>, vector<1x16x16x4xf32>
    %1 = vector.shape_cast %0 : vector<1x16x16x4xf32> to vector<16x16x4xf32>
    %cst = arith.constant 0.000000e+00 : f32
    %2 = vector.broadcast %cst : f32 to vector<18x32x4xf32>
    %c0_3 = arith.constant 0 : index
    %c0_4 = arith.constant 0 : index
    %c0_5 = arith.constant 0 : index
    %3 = vector.load %arg9[%c0_3, %c0_4, %c0_5] : memref<18x32x4xf32, #tpu.memory_space<vmem>>, vector<18x32x4xf32>
    tpu.vector_store %arg9[%c0_3, %c0_4, %c0_5], %2 {strides = array<i32>} : memref<18x32x4xf32, #tpu.memory_space<vmem>>, vector<18x32x4xf32>,
    %c1 = arith.constant 1 : index
    %c8 = arith.constant 8 : index
    %c0_6 = arith.constant 0 : index
    %4 = vector.load %arg9[%c1, %c8, %c0_6] : memref<18x32x4xf32, #tpu.memory_space<vmem>>, vector<16x16x4xf32>
    tpu.vector_store %arg9[%c1, %c8, %c0_6], %1 {strides = array<i32>} : memref<18x32x4xf32, #tpu.memory_space<vmem>>, vector<16x16x4xf32>,
    %cst_7 = arith.constant 0.000000e+00 : f32
    %5 = vector.broadcast %cst_7 : f32 to vector<256x8xf32>
    %c0_8 = arith.constant 0 : index
    %c7 = arith.constant 7 : index
    %c0_9 = arith.constant 0 : index
    %6 = vector.load %arg9[%c0_8, %c7, %c0_9] : memref<18x32x4xf32, #tpu.memory_space<vmem>>, vector<16x16x4xf32>
    %7 = vector.shape_cast %6 : vector<16x16x4xf32> to vector<256x4xf32>
    %8 = arith.truncf %7 : vector<256x4xf32> to vector<256x4xbf16>
    %c0_10 = arith.constant 0 : index
    %c0_11 = arith.constant 0 : index
    %c0_12 = arith.constant 0 : index
    %9 = vector.load %arg2[%c0_10, %c0_11, %c0_12] : memref<9x4x8xbf16, #tpu.memory_space<vmem>>, vector<1x4x8xbf16>
    %10 = vector.shape_cast %9 : vector<1x4x8xbf16> to vector<4x8xbf16>
    %cst_13 = arith.constant dense<0.000000e+00> : vector<256x8xf32>
    %11 = tpu.matmul %8, %10, %cst_13 {dimension_numbers = #tpu.dot_dimension_numbers<[1], [0], [0], [1], [0, 0, 1, 1], [], []>} : vector<256x4xbf16>, vector<4x8xbf16>, vector<256x8xf32> -> vector<256x8xf32>
    %12 = arith.addf %5, %11 : vector<256x8xf32>
    %c0_14 = arith.constant 0 : index
    %c8_15 = arith.constant 8 : index
    %c0_16 = arith.constant 0 : index
    %13 = vector.load %arg9[%c0_14, %c8_15, %c0_16] : memref<18x32x4xf32, #tpu.memory_space<vmem>>, vector<16x16x4xf32>
    %14 = vector.shape_cast %13 : vector<16x16x4xf32> to vector<256x4xf32>
    %15 = arith.truncf %14 : vector<256x4xf32> to vector<256x4xbf16>
    %c1_17 = arith.constant 1 : index
    %c0_18 = arith.constant 0 : index
    %c0_19 = arith.constant 0 : index
    %16 = vector.load %arg2[%c1_17, %c0_18, %c0_19] : memref<9x4x8xbf16, #tpu.memory_space<vmem>>, vector<1x4x8xbf16>
    %17 = vector.shape_cast %16 : vector<1x4x8xbf16> to vector<4x8xbf16>
    %cst_20 = arith.constant dense<0.000000e+00> : vector<256x8xf32>
    %18 = tpu.matmul %15, %17, %cst_20 {dimension_numbers = #tpu.dot_dimension_numbers<[1], [0], [0], [1], [0, 0, 1, 1], [], []>} : vector<256x4xbf16>, vector<4x8xbf16>, vector<256x8xf32> -> vector<256x8xf32>
    %19 = arith.addf %12, %18 : vector<256x8xf32>
    %c0_21 = arith.constant 0 : index
    %c9 = arith.constant 9 : index
    %c0_22 = arith.constant 0 : index
    %20 = vector.load %arg9[%c0_21, %c9, %c0_22] : memref<18x32x4xf32, #tpu.memory_space<vmem>>, vector<16x16x4xf32>
    %21 = vector.shape_cast %20 : vector<16x16x4xf32> to vector<256x4xf32>
    %22 = arith.truncf %21 : vector<256x4xf32> to vector<256x4xbf16>
    %c2 = arith.constant 2 : index
    %c0_23 = arith.constant 0 : index
    %c0_24 = arith.constant 0 : index
    %23 = vector.load %arg2[%c2, %c0_23, %c0_24] : memref<9x4x8xbf16, #tpu.memory_space<vmem>>, vector<1x4x8xbf16>
    %24 = vector.shape_cast %23 : vector<1x4x8xbf16> to vector<4x8xbf16>
    %cst_25 = arith.constant dense<0.000000e+00> : vector<256x8xf32>
    %25 = tpu.matmul %22, %24, %cst_25 {dimension_numbers = #tpu.dot_dimension_numbers<[1], [0], [0], [1], [0, 0, 1, 1], [], []>} : vector<256x4xbf16>, vector<4x8xbf16>, vector<256x8xf32> -> vector<256x8xf32>
    %26 = arith.addf %19, %25 : vector<256x8xf32>
    %c1_26 = arith.constant 1 : index
    %c7_27 = arith.constant 7 : index
    %c0_28 = arith.constant 0 : index
    %27 = vector.load %arg9[%c1_26, %c7_27, %c0_28] : memref<18x32x4xf32, #tpu.memory_space<vmem>>, vector<16x16x4xf32>
    %28 = vector.shape_cast %27 : vector<16x16x4xf32> to vector<256x4xf32>
    %29 = arith.truncf %28 : vector<256x4xf32> to vector<256x4xbf16>
    %c3 = arith.constant 3 : index
    %c0_29 = arith.constant 0 : index
    %c0_30 = arith.constant 0 : index
    %30 = vector.load %arg2[%c3, %c0_29, %c0_30] : memref<9x4x8xbf16, #tpu.memory_space<vmem>>, vector<1x4x8xbf16>
    %31 = vector.shape_cast %30 : vector<1x4x8xbf16> to vector<4x8xbf16>
    %cst_31 = arith.constant dense<0.000000e+00> : vector<256x8xf32>
    %32 = tpu.matmul %29, %31, %cst_31 {dimension_numbers = #tpu.dot_dimension_numbers<[1], [0], [0], [1], [0, 0, 1, 1], [], []>} : vector<256x4xbf16>, vector<4x8xbf16>, vector<256x8xf32> -> vector<256x8xf32>
    %33 = arith.addf %26, %32 : vector<256x8xf32>
    %c1_32 = arith.constant 1 : index
    %c8_33 = arith.constant 8 : index
    %c0_34 = arith.constant 0 : index
    %34 = vector.load %arg9[%c1_32, %c8_33, %c0_34] : memref<18x32x4xf32, #tpu.memory_space<vmem>>, vector<16x16x4xf32>
    %35 = vector.shape_cast %34 : vector<16x16x4xf32> to vector<256x4xf32>
    %36 = arith.truncf %35 : vector<256x4xf32> to vector<256x4xbf16>
    %c4 = arith.constant 4 : index
    %c0_35 = arith.constant 0 : index
    %c0_36 = arith.constant 0 : index
    %37 = vector.load %arg2[%c4, %c0_35, %c0_36] : memref<9x4x8xbf16, #tpu.memory_space<vmem>>, vector<1x4x8xbf16>
    %38 = vector.shape_cast %37 : vector<1x4x8xbf16> to vector<4x8xbf16>
    %cst_37 = arith.constant dense<0.000000e+00> : vector<256x8xf32>
    %39 = tpu.matmul %36, %38, %cst_37 {dimension_numbers = #tpu.dot_dimension_numbers<[1], [0], [0], [1], [0, 0, 1, 1], [], []>} : vector<256x4xbf16>, vector<4x8xbf16>, vector<256x8xf32> -> vector<256x8xf32>
    %40 = arith.addf %33, %39 : vector<256x8xf32>
    %c1_38 = arith.constant 1 : index
    %c9_39 = arith.constant 9 : index
    %c0_40 = arith.constant 0 : index
    %41 = vector.load %arg9[%c1_38, %c9_39, %c0_40] : memref<18x32x4xf32, #tpu.memory_space<vmem>>, vector<16x16x4xf32>
    %42 = vector.shape_cast %41 : vector<16x16x4xf32> to vector<256x4xf32>
    %43 = arith.truncf %42 : vector<256x4xf32> to vector<256x4xbf16>
    %c5 = arith.constant 5 : index
    %c0_41 = arith.constant 0 : index
    %c0_42 = arith.constant 0 : index
    %44 = vector.load %arg2[%c5, %c0_41, %c0_42] : memref<9x4x8xbf16, #tpu.memory_space<vmem>>, vector<1x4x8xbf16>
    %45 = vector.shape_cast %44 : vector<1x4x8xbf16> to vector<4x8xbf16>
    %cst_43 = arith.constant dense<0.000000e+00> : vector<256x8xf32>
    %46 = tpu.matmul %43, %45, %cst_43 {dimension_numbers = #tpu.dot_dimension_numbers<[1], [0], [0], [1], [0, 0, 1, 1], [], []>} : vector<256x4xbf16>, vector<4x8xbf16>, vector<256x8xf32> -> vector<256x8xf32>
    %47 = arith.addf %40, %46 : vector<256x8xf32>
    %c2_44 = arith.constant 2 : index
    %c7_45 = arith.constant 7 : index
    %c0_46 = arith.constant 0 : index
    %48 = vector.load %arg9[%c2_44, %c7_45, %c0_46] : memref<18x32x4xf32, #tpu.memory_space<vmem>>, vector<16x16x4xf32>
    %49 = vector.shape_cast %48 : vector<16x16x4xf32> to vector<256x4xf32>
    %50 = arith.truncf %49 : vector<256x4xf32> to vector<256x4xbf16>
    %c6 = arith.constant 6 : index
    %c0_47 = arith.constant 0 : index
    %c0_48 = arith.constant 0 : index
    %51 = vector.load %arg2[%c6, %c0_47, %c0_48] : memref<9x4x8xbf16, #tpu.memory_space<vmem>>, vector<1x4x8xbf16>
    %52 = vector.shape_cast %51 : vector<1x4x8xbf16> to vector<4x8xbf16>
    %cst_49 = arith.constant dense<0.000000e+00> : vector<256x8xf32>
    %53 = tpu.matmul %50, %52, %cst_49 {dimension_numbers = #tpu.dot_dimension_numbers<[1], [0], [0], [1], [0, 0, 1, 1], [], []>} : vector<256x4xbf16>, vector<4x8xbf16>, vector<256x8xf32> -> vector<256x8xf32>
    %54 = arith.addf %47, %53 : vector<256x8xf32>
    %c2_50 = arith.constant 2 : index
    %c8_51 = arith.constant 8 : index
    %c0_52 = arith.constant 0 : index
    %55 = vector.load %arg9[%c2_50, %c8_51, %c0_52] : memref<18x32x4xf32, #tpu.memory_space<vmem>>, vector<16x16x4xf32>
    %56 = vector.shape_cast %55 : vector<16x16x4xf32> to vector<256x4xf32>
    %57 = arith.truncf %56 : vector<256x4xf32> to vector<256x4xbf16>
    %c7_53 = arith.constant 7 : index
    %c0_54 = arith.constant 0 : index
    %c0_55 = arith.constant 0 : index
    %58 = vector.load %arg2[%c7_53, %c0_54, %c0_55] : memref<9x4x8xbf16, #tpu.memory_space<vmem>>, vector<1x4x8xbf16>
    %59 = vector.shape_cast %58 : vector<1x4x8xbf16> to vector<4x8xbf16>
    %cst_56 = arith.constant dense<0.000000e+00> : vector<256x8xf32>
    %60 = tpu.matmul %57, %59, %cst_56 {dimension_numbers = #tpu.dot_dimension_numbers<[1], [0], [0], [1], [0, 0, 1, 1], [], []>} : vector<256x4xbf16>, vector<4x8xbf16>, vector<256x8xf32> -> vector<256x8xf32>
    %61 = arith.addf %54, %60 : vector<256x8xf32>
    %c2_57 = arith.constant 2 : index
    %c9_58 = arith.constant 9 : index
    %c0_59 = arith.constant 0 : index
    %62 = vector.load %arg9[%c2_57, %c9_58, %c0_59] : memref<18x32x4xf32, #tpu.memory_space<vmem>>, vector<16x16x4xf32>
    %63 = vector.shape_cast %62 : vector<16x16x4xf32> to vector<256x4xf32>
    %64 = arith.truncf %63 : vector<256x4xf32> to vector<256x4xbf16>
    %c8_60 = arith.constant 8 : index
    %c0_61 = arith.constant 0 : index
    %c0_62 = arith.constant 0 : index
    %65 = vector.load %arg2[%c8_60, %c0_61, %c0_62] : memref<9x4x8xbf16, #tpu.memory_space<vmem>>, vector<1x4x8xbf16>
    %66 = vector.shape_cast %65 : vector<1x4x8xbf16> to vector<4x8xbf16>
    %cst_63 = arith.constant dense<0.000000e+00> : vector<256x8xf32>
    %67 = tpu.matmul %64, %66, %cst_63 {dimension_numbers = #tpu.dot_dimension_numbers<[1], [0], [0], [1], [0, 0, 1, 1], [], []>} : vector<256x4xbf16>, vector<4x8xbf16>, vector<256x8xf32> -> vector<256x8xf32>
    %68 = arith.addf %61, %67 : vector<256x8xf32>
    %c0_64 = arith.constant 0 : index
    %c0_65 = arith.constant 0 : index
    %69 = vector.load %arg3[%c0_64, %c0_65] : memref<1x8xf32, #tpu.memory_space<vmem>>, vector<1x8xf32>
    %70 = vector.broadcast %69 : vector<1x8xf32> to vector<256x8xf32>
    %71 = arith.addf %68, %70 : vector<256x8xf32>
    %cst_66 = arith.constant 0.000000e+00 : f32
    %72 = vector.broadcast %cst_66 : f32 to vector<256x8xf32>
    %73 = arith.maximumf %71, %72 : vector<256x8xf32>
    %74 = vector.shape_cast %73 : vector<256x8xf32> to vector<8x2x16x8xf32>
    %75 = vector.extract_strided_slice %74 {offsets = [0, 0, 0, 0], sizes = [8, 1, 16, 8], strides = [1, 1, 1, 1]} : vector<8x2x16x8xf32> to vector<8x1x16x8xf32>
    %76 = vector.shape_cast %75 : vector<8x1x16x8xf32> to vector<8x16x8xf32>
    %77 = vector.extract_strided_slice %74 {offsets = [0, 1, 0, 0], sizes = [8, 1, 16, 8], strides = [1, 1, 1, 1]} : vector<8x2x16x8xf32> to vector<8x1x16x8xf32>
    %78 = vector.shape_cast %77 : vector<8x1x16x8xf32> to vector<8x16x8xf32>
    %79 = arith.maximumf %76, %78 : vector<8x16x8xf32>
    %80 = vector.shape_cast %79 : vector<8x16x8xf32> to vector<128x8xf32>
    %c0_67 = arith.constant 0 : index
    %c0_68 = arith.constant 0 : index
    %81 = vector.load %arg11[%c0_67, %c0_68] : memref<128x8xf32, #tpu.memory_space<vmem>>, vector<128x8xf32>
    tpu.vector_store %arg11[%c0_67, %c0_68], %80 {strides = array<i32>} : memref<128x8xf32, #tpu.memory_space<vmem>>, vector<128x8xf32>,
    %c0_69 = arith.constant 0 : index
    %c0_70 = arith.constant 0 : index
    %82 = tpu.strided_load %arg11[%c0_69, %c0_70] {strides = array<i32: 2, 1>} : memref<128x8xf32, #tpu.memory_space<vmem>>, vector<64x8xf32>
    %c1_71 = arith.constant 1 : index
    %c0_72 = arith.constant 0 : index
    %83 = tpu.strided_load %arg11[%c1_71, %c0_72] {strides = array<i32: 2, 1>} : memref<128x8xf32, #tpu.memory_space<vmem>>, vector<64x8xf32>
    %84 = arith.maximumf %82, %83 : vector<64x8xf32>
    %85 = vector.shape_cast %84 : vector<64x8xf32> to vector<8x8x8xf32>
    %cst_73 = arith.constant 0.000000e+00 : f32
    %86 = vector.broadcast %cst_73 : f32 to vector<10x24x8xf32>
    %c0_74 = arith.constant 0 : index
    %c0_75 = arith.constant 0 : index
    %c0_76 = arith.constant 0 : index
    %87 = vector.load %arg10[%c0_74, %c0_75, %c0_76] : memref<10x24x8xf32, #tpu.memory_space<vmem>>, vector<10x24x8xf32>
    tpu.vector_store %arg10[%c0_74, %c0_75, %c0_76], %86 {strides = array<i32>} : memref<10x24x8xf32, #tpu.memory_space<vmem>>, vector<10x24x8xf32>,
    %c1_77 = arith.constant 1 : index
    %c8_78 = arith.constant 8 : index
    %c0_79 = arith.constant 0 : index
    %88 = vector.load %arg10[%c1_77, %c8_78, %c0_79] : memref<10x24x8xf32, #tpu.memory_space<vmem>>, vector<8x8x8xf32>
    tpu.vector_store %arg10[%c1_77, %c8_78, %c0_79], %85 {strides = array<i32>} : memref<10x24x8xf32, #tpu.memory_space<vmem>>, vector<8x8x8xf32>,
    %cst_80 = arith.constant 0.000000e+00 : f32
    %89 = vector.broadcast %cst_80 : f32 to vector<64x16xf32>
    %c0_81 = arith.constant 0 : index
    %c7_82 = arith.constant 7 : index
    %c0_83 = arith.constant 0 : index
    %90 = vector.load %arg10[%c0_81, %c7_82, %c0_83] : memref<10x24x8xf32, #tpu.memory_space<vmem>>, vector<8x8x8xf32>
    %91 = vector.shape_cast %90 : vector<8x8x8xf32> to vector<64x8xf32>
    %92 = arith.truncf %91 : vector<64x8xf32> to vector<64x8xbf16>
    %c0_84 = arith.constant 0 : index
    %c0_85 = arith.constant 0 : index
    %c0_86 = arith.constant 0 : index
    %93 = vector.load %arg4[%c0_84, %c0_85, %c0_86] : memref<9x8x16xbf16, #tpu.memory_space<vmem>>, vector<1x8x16xbf16>
    %94 = vector.shape_cast %93 : vector<1x8x16xbf16> to vector<8x16xbf16>
    %cst_87 = arith.constant dense<0.000000e+00> : vector<64x16xf32>
    %95 = tpu.matmul %92, %94, %cst_87 {dimension_numbers = #tpu.dot_dimension_numbers<[1], [0], [0], [1], [0, 0, 1, 1], [], []>} : vector<64x8xbf16>, vector<8x16xbf16>, vector<64x16xf32> -> vector<64x16xf32>
    %96 = arith.addf %89, %95 : vector<64x16xf32>
    %c0_88 = arith.constant 0 : index
    %c8_89 = arith.constant 8 : index
    %c0_90 = arith.constant 0 : index
    %97 = vector.load %arg10[%c0_88, %c8_89, %c0_90] : memref<10x24x8xf32, #tpu.memory_space<vmem>>, vector<8x8x8xf32>
    %98 = vector.shape_cast %97 : vector<8x8x8xf32> to vector<64x8xf32>
    %99 = arith.truncf %98 : vector<64x8xf32> to vector<64x8xbf16>
    %c1_91 = arith.constant 1 : index
    %c0_92 = arith.constant 0 : index
    %c0_93 = arith.constant 0 : index
    %100 = vector.load %arg4[%c1_91, %c0_92, %c0_93] : memref<9x8x16xbf16, #tpu.memory_space<vmem>>, vector<1x8x16xbf16>
    %101 = vector.shape_cast %100 : vector<1x8x16xbf16> to vector<8x16xbf16>
    %cst_94 = arith.constant dense<0.000000e+00> : vector<64x16xf32>
    %102 = tpu.matmul %99, %101, %cst_94 {dimension_numbers = #tpu.dot_dimension_numbers<[1], [0], [0], [1], [0, 0, 1, 1], [], []>} : vector<64x8xbf16>, vector<8x16xbf16>, vector<64x16xf32> -> vector<64x16xf32>
    %103 = arith.addf %96, %102 : vector<64x16xf32>
    %c0_95 = arith.constant 0 : index
    %c9_96 = arith.constant 9 : index
    %c0_97 = arith.constant 0 : index
    %104 = vector.load %arg10[%c0_95, %c9_96, %c0_97] : memref<10x24x8xf32, #tpu.memory_space<vmem>>, vector<8x8x8xf32>
    %105 = vector.shape_cast %104 : vector<8x8x8xf32> to vector<64x8xf32>
    %106 = arith.truncf %105 : vector<64x8xf32> to vector<64x8xbf16>
    %c2_98 = arith.constant 2 : index
    %c0_99 = arith.constant 0 : index
    %c0_100 = arith.constant 0 : index
    %107 = vector.load %arg4[%c2_98, %c0_99, %c0_100] : memref<9x8x16xbf16, #tpu.memory_space<vmem>>, vector<1x8x16xbf16>
    %108 = vector.shape_cast %107 : vector<1x8x16xbf16> to vector<8x16xbf16>
    %cst_101 = arith.constant dense<0.000000e+00> : vector<64x16xf32>
    %109 = tpu.matmul %106, %108, %cst_101 {dimension_numbers = #tpu.dot_dimension_numbers<[1], [0], [0], [1], [0, 0, 1, 1], [], []>} : vector<64x8xbf16>, vector<8x16xbf16>, vector<64x16xf32> -> vector<64x16xf32>
    %110 = arith.addf %103, %109 : vector<64x16xf32>
    %c1_102 = arith.constant 1 : index
    %c7_103 = arith.constant 7 : index
    %c0_104 = arith.constant 0 : index
    %111 = vector.load %arg10[%c1_102, %c7_103, %c0_104] : memref<10x24x8xf32, #tpu.memory_space<vmem>>, vector<8x8x8xf32>
    %112 = vector.shape_cast %111 : vector<8x8x8xf32> to vector<64x8xf32>
    %113 = arith.truncf %112 : vector<64x8xf32> to vector<64x8xbf16>
    %c3_105 = arith.constant 3 : index
    %c0_106 = arith.constant 0 : index
    %c0_107 = arith.constant 0 : index
    %114 = vector.load %arg4[%c3_105, %c0_106, %c0_107] : memref<9x8x16xbf16, #tpu.memory_space<vmem>>, vector<1x8x16xbf16>
    %115 = vector.shape_cast %114 : vector<1x8x16xbf16> to vector<8x16xbf16>
    %cst_108 = arith.constant dense<0.000000e+00> : vector<64x16xf32>
    %116 = tpu.matmul %113, %115, %cst_108 {dimension_numbers = #tpu.dot_dimension_numbers<[1], [0], [0], [1], [0, 0, 1, 1], [], []>} : vector<64x8xbf16>, vector<8x16xbf16>, vector<64x16xf32> -> vector<64x16xf32>
    %117 = arith.addf %110, %116 : vector<64x16xf32>
    %c1_109 = arith.constant 1 : index
    %c8_110 = arith.constant 8 : index
    %c0_111 = arith.constant 0 : index
    %118 = vector.load %arg10[%c1_109, %c8_110, %c0_111] : memref<10x24x8xf32, #tpu.memory_space<vmem>>, vector<8x8x8xf32>
    %119 = vector.shape_cast %118 : vector<8x8x8xf32> to vector<64x8xf32>
    %120 = arith.truncf %119 : vector<64x8xf32> to vector<64x8xbf16>
    %c4_112 = arith.constant 4 : index
    %c0_113 = arith.constant 0 : index
    %c0_114 = arith.constant 0 : index
    %121 = vector.load %arg4[%c4_112, %c0_113, %c0_114] : memref<9x8x16xbf16, #tpu.memory_space<vmem>>, vector<1x8x16xbf16>
    %122 = vector.shape_cast %121 : vector<1x8x16xbf16> to vector<8x16xbf16>
    %cst_115 = arith.constant dense<0.000000e+00> : vector<64x16xf32>
    %123 = tpu.matmul %120, %122, %cst_115 {dimension_numbers = #tpu.dot_dimension_numbers<[1], [0], [0], [1], [0, 0, 1, 1], [], []>} : vector<64x8xbf16>, vector<8x16xbf16>, vector<64x16xf32> -> vector<64x16xf32>
    %124 = arith.addf %117, %123 : vector<64x16xf32>
    %c1_116 = arith.constant 1 : index
    %c9_117 = arith.constant 9 : index
    %c0_118 = arith.constant 0 : index
    %125 = vector.load %arg10[%c1_116, %c9_117, %c0_118] : memref<10x24x8xf32, #tpu.memory_space<vmem>>, vector<8x8x8xf32>
    %126 = vector.shape_cast %125 : vector<8x8x8xf32> to vector<64x8xf32>
    %127 = arith.truncf %126 : vector<64x8xf32> to vector<64x8xbf16>
    %c5_119 = arith.constant 5 : index
    %c0_120 = arith.constant 0 : index
    %c0_121 = arith.constant 0 : index
    %128 = vector.load %arg4[%c5_119, %c0_120, %c0_121] : memref<9x8x16xbf16, #tpu.memory_space<vmem>>, vector<1x8x16xbf16>
    %129 = vector.shape_cast %128 : vector<1x8x16xbf16> to vector<8x16xbf16>
    %cst_122 = arith.constant dense<0.000000e+00> : vector<64x16xf32>
    %130 = tpu.matmul %127, %129, %cst_122 {dimension_numbers = #tpu.dot_dimension_numbers<[1], [0], [0], [1], [0, 0, 1, 1], [], []>} : vector<64x8xbf16>, vector<8x16xbf16>, vector<64x16xf32> -> vector<64x16xf32>
    %131 = arith.addf %124, %130 : vector<64x16xf32>
    %c2_123 = arith.constant 2 : index
    %c7_124 = arith.constant 7 : index
    %c0_125 = arith.constant 0 : index
    %132 = vector.load %arg10[%c2_123, %c7_124, %c0_125] : memref<10x24x8xf32, #tpu.memory_space<vmem>>, vector<8x8x8xf32>
    %133 = vector.shape_cast %132 : vector<8x8x8xf32> to vector<64x8xf32>
    %134 = arith.truncf %133 : vector<64x8xf32> to vector<64x8xbf16>
    %c6_126 = arith.constant 6 : index
    %c0_127 = arith.constant 0 : index
    %c0_128 = arith.constant 0 : index
    %135 = vector.load %arg4[%c6_126, %c0_127, %c0_128] : memref<9x8x16xbf16, #tpu.memory_space<vmem>>, vector<1x8x16xbf16>
    %136 = vector.shape_cast %135 : vector<1x8x16xbf16> to vector<8x16xbf16>
    %cst_129 = arith.constant dense<0.000000e+00> : vector<64x16xf32>
    %137 = tpu.matmul %134, %136, %cst_129 {dimension_numbers = #tpu.dot_dimension_numbers<[1], [0], [0], [1], [0, 0, 1, 1], [], []>} : vector<64x8xbf16>, vector<8x16xbf16>, vector<64x16xf32> -> vector<64x16xf32>
    %138 = arith.addf %131, %137 : vector<64x16xf32>
    %c2_130 = arith.constant 2 : index
    %c8_131 = arith.constant 8 : index
    %c0_132 = arith.constant 0 : index
    %139 = vector.load %arg10[%c2_130, %c8_131, %c0_132] : memref<10x24x8xf32, #tpu.memory_space<vmem>>, vector<8x8x8xf32>
    %140 = vector.shape_cast %139 : vector<8x8x8xf32> to vector<64x8xf32>
    %141 = arith.truncf %140 : vector<64x8xf32> to vector<64x8xbf16>
    %c7_133 = arith.constant 7 : index
    %c0_134 = arith.constant 0 : index
    %c0_135 = arith.constant 0 : index
    %142 = vector.load %arg4[%c7_133, %c0_134, %c0_135] : memref<9x8x16xbf16, #tpu.memory_space<vmem>>, vector<1x8x16xbf16>
    %143 = vector.shape_cast %142 : vector<1x8x16xbf16> to vector<8x16xbf16>
    %cst_136 = arith.constant dense<0.000000e+00> : vector<64x16xf32>
    %144 = tpu.matmul %141, %143, %cst_136 {dimension_numbers = #tpu.dot_dimension_numbers<[1], [0], [0], [1], [0, 0, 1, 1], [], []>} : vector<64x8xbf16>, vector<8x16xbf16>, vector<64x16xf32> -> vector<64x16xf32>
    %145 = arith.addf %138, %144 : vector<64x16xf32>
    %c2_137 = arith.constant 2 : index
    %c9_138 = arith.constant 9 : index
    %c0_139 = arith.constant 0 : index
    %146 = vector.load %arg10[%c2_137, %c9_138, %c0_139] : memref<10x24x8xf32, #tpu.memory_space<vmem>>, vector<8x8x8xf32>
    %147 = vector.shape_cast %146 : vector<8x8x8xf32> to vector<64x8xf32>
    %148 = arith.truncf %147 : vector<64x8xf32> to vector<64x8xbf16>
    %c8_140 = arith.constant 8 : index
    %c0_141 = arith.constant 0 : index
    %c0_142 = arith.constant 0 : index
    %149 = vector.load %arg4[%c8_140, %c0_141, %c0_142] : memref<9x8x16xbf16, #tpu.memory_space<vmem>>, vector<1x8x16xbf16>
    %150 = vector.shape_cast %149 : vector<1x8x16xbf16> to vector<8x16xbf16>
    %cst_143 = arith.constant dense<0.000000e+00> : vector<64x16xf32>
    %151 = tpu.matmul %148, %150, %cst_143 {dimension_numbers = #tpu.dot_dimension_numbers<[1], [0], [0], [1], [0, 0, 1, 1], [], []>} : vector<64x8xbf16>, vector<8x16xbf16>, vector<64x16xf32> -> vector<64x16xf32>
    %152 = arith.addf %145, %151 : vector<64x16xf32>
    %c0_144 = arith.constant 0 : index
    %c0_145 = arith.constant 0 : index
    %153 = vector.load %arg5[%c0_144, %c0_145] : memref<1x16xf32, #tpu.memory_space<vmem>>, vector<1x16xf32>
    %154 = vector.broadcast %153 : vector<1x16xf32> to vector<64x16xf32>
    %155 = arith.addf %152, %154 : vector<64x16xf32>
    %cst_146 = arith.constant 0.000000e+00 : f32
    %156 = vector.broadcast %cst_146 : f32 to vector<64x16xf32>
    %157 = arith.maximumf %155, %156 : vector<64x16xf32>
    %158 = vector.shape_cast %157 : vector<64x16xf32> to vector<4x2x8x16xf32>
    %159 = vector.extract_strided_slice %158 {offsets = [0, 0, 0, 0], sizes = [4, 1, 8, 16], strides = [1, 1, 1, 1]} : vector<4x2x8x16xf32> to vector<4x1x8x16xf32>
    %160 = vector.shape_cast %159 : vector<4x1x8x16xf32> to vector<4x8x16xf32>
    %161 = vector.extract_strided_slice %158 {offsets = [0, 1, 0, 0], sizes = [4, 1, 8, 16], strides = [1, 1, 1, 1]} : vector<4x2x8x16xf32> to vector<4x1x8x16xf32>
    %162 = vector.shape_cast %161 : vector<4x1x8x16xf32> to vector<4x8x16xf32>
    %163 = arith.maximumf %160, %162 : vector<4x8x16xf32>
    %164 = vector.shape_cast %163 : vector<4x8x16xf32> to vector<32x16xf32>
    %c0_147 = arith.constant 0 : index
    %c0_148 = arith.constant 0 : index
    %165 = vector.load %arg12[%c0_147, %c0_148] : memref<32x16xf32, #tpu.memory_space<vmem>>, vector<32x16xf32>
    tpu.vector_store %arg12[%c0_147, %c0_148], %164 {strides = array<i32>} : memref<32x16xf32, #tpu.memory_space<vmem>>, vector<32x16xf32>,
    %c0_149 = arith.constant 0 : index
    %c0_150 = arith.constant 0 : index
    %166 = tpu.strided_load %arg12[%c0_149, %c0_150] {strides = array<i32: 2, 1>} : memref<32x16xf32, #tpu.memory_space<vmem>>, vector<16x16xf32>
    %c1_151 = arith.constant 1 : index
    %c0_152 = arith.constant 0 : index
    %167 = tpu.strided_load %arg12[%c1_151, %c0_152] {strides = array<i32: 2, 1>} : memref<32x16xf32, #tpu.memory_space<vmem>>, vector<16x16xf32>
    %168 = arith.maximumf %166, %167 : vector<16x16xf32>
    %c0_153 = arith.constant 0 : index
    %c0_154 = arith.constant 0 : index
    %169 = vector.load %arg7[%c0_153, %c0_154] : memref<1x5xf32, #tpu.memory_space<vmem>>, vector<1x5xf32>
    %170 = vector.extract_strided_slice %168 {offsets = [0, 0], sizes = [1, 16], strides = [1, 1]} : vector<16x16xf32> to vector<1x16xf32>
    %171 = arith.truncf %170 : vector<1x16xf32> to vector<1x16xbf16>
    %c0_155 = arith.constant 0 : index
    %c0_156 = arith.constant 0 : index
    %c0_157 = arith.constant 0 : index
    %172 = vector.load %arg6[%c0_155, %c0_156, %c0_157] : memref<16x16x5xbf16, #tpu.memory_space<vmem>>, vector<1x16x5xbf16>
    %173 = vector.shape_cast %172 : vector<1x16x5xbf16> to vector<16x5xbf16>
    %cst_158 = arith.constant dense<0.000000e+00> : vector<1x5xf32>
    %174 = tpu.matmul %171, %173, %cst_158 {dimension_numbers = #tpu.dot_dimension_numbers<[1], [0], [0], [1], [0, 0, 1, 1], [], []>} : vector<1x16xbf16>, vector<16x5xbf16>, vector<1x5xf32> -> vector<1x5xf32>
    %175 = arith.addf %169, %174 : vector<1x5xf32>
    %176 = vector.extract_strided_slice %168 {offsets = [1, 0], sizes = [1, 16], strides = [1, 1]} : vector<16x16xf32> to vector<1x16xf32>
    %177 = arith.truncf %176 : vector<1x16xf32> to vector<1x16xbf16>
    %c1_159 = arith.constant 1 : index
    %c0_160 = arith.constant 0 : index
    %c0_161 = arith.constant 0 : index
    %178 = vector.load %arg6[%c1_159, %c0_160, %c0_161] : memref<16x16x5xbf16, #tpu.memory_space<vmem>>, vector<1x16x5xbf16>
    %179 = vector.shape_cast %178 : vector<1x16x5xbf16> to vector<16x5xbf16>
    %cst_162 = arith.constant dense<0.000000e+00> : vector<1x5xf32>
    %180 = tpu.matmul %177, %179, %cst_162 {dimension_numbers = #tpu.dot_dimension_numbers<[1], [0], [0], [1], [0, 0, 1, 1], [], []>} : vector<1x16xbf16>, vector<16x5xbf16>, vector<1x5xf32> -> vector<1x5xf32>
    %181 = arith.addf %175, %180 : vector<1x5xf32>
    %182 = vector.extract_strided_slice %168 {offsets = [2, 0], sizes = [1, 16], strides = [1, 1]} : vector<16x16xf32> to vector<1x16xf32>
    %183 = arith.truncf %182 : vector<1x16xf32> to vector<1x16xbf16>
    %c2_163 = arith.constant 2 : index
    %c0_164 = arith.constant 0 : index
    %c0_165 = arith.constant 0 : index
    %184 = vector.load %arg6[%c2_163, %c0_164, %c0_165] : memref<16x16x5xbf16, #tpu.memory_space<vmem>>, vector<1x16x5xbf16>
    %185 = vector.shape_cast %184 : vector<1x16x5xbf16> to vector<16x5xbf16>
    %cst_166 = arith.constant dense<0.000000e+00> : vector<1x5xf32>
    %186 = tpu.matmul %183, %185, %cst_166 {dimension_numbers = #tpu.dot_dimension_numbers<[1], [0], [0], [1], [0, 0, 1, 1], [], []>} : vector<1x16xbf16>, vector<16x5xbf16>, vector<1x5xf32> -> vector<1x5xf32>
    %187 = arith.addf %181, %186 : vector<1x5xf32>
    %188 = vector.extract_strided_slice %168 {offsets = [3, 0], sizes = [1, 16], strides = [1, 1]} : vector<16x16xf32> to vector<1x16xf32>
    %189 = arith.truncf %188 : vector<1x16xf32> to vector<1x16xbf16>
    %c3_167 = arith.constant 3 : index
    %c0_168 = arith.constant 0 : index
    %c0_169 = arith.constant 0 : index
    %190 = vector.load %arg6[%c3_167, %c0_168, %c0_169] : memref<16x16x5xbf16, #tpu.memory_space<vmem>>, vector<1x16x5xbf16>
    %191 = vector.shape_cast %190 : vector<1x16x5xbf16> to vector<16x5xbf16>
    %cst_170 = arith.constant dense<0.000000e+00> : vector<1x5xf32>
    %192 = tpu.matmul %189, %191, %cst_170 {dimension_numbers = #tpu.dot_dimension_numbers<[1], [0], [0], [1], [0, 0, 1, 1], [], []>} : vector<1x16xbf16>, vector<16x5xbf16>, vector<1x5xf32> -> vector<1x5xf32>
    %193 = arith.addf %187, %192 : vector<1x5xf32>
    %194 = vector.extract_strided_slice %168 {offsets = [4, 0], sizes = [1, 16], strides = [1, 1]} : vector<16x16xf32> to vector<1x16xf32>
    %195 = arith.truncf %194 : vector<1x16xf32> to vector<1x16xbf16>
    %c4_171 = arith.constant 4 : index
    %c0_172 = arith.constant 0 : index
    %c0_173 = arith.constant 0 : index
    %196 = vector.load %arg6[%c4_171, %c0_172, %c0_173] : memref<16x16x5xbf16, #tpu.memory_space<vmem>>, vector<1x16x5xbf16>
    %197 = vector.shape_cast %196 : vector<1x16x5xbf16> to vector<16x5xbf16>
    %cst_174 = arith.constant dense<0.000000e+00> : vector<1x5xf32>
    %198 = tpu.matmul %195, %197, %cst_174 {dimension_numbers = #tpu.dot_dimension_numbers<[1], [0], [0], [1], [0, 0, 1, 1], [], []>} : vector<1x16xbf16>, vector<16x5xbf16>, vector<1x5xf32> -> vector<1x5xf32>
    %199 = arith.addf %193, %198 : vector<1x5xf32>
    %200 = vector.extract_strided_slice %168 {offsets = [5, 0], sizes = [1, 16], strides = [1, 1]} : vector<16x16xf32> to vector<1x16xf32>
    %201 = arith.truncf %200 : vector<1x16xf32> to vector<1x16xbf16>
    %c5_175 = arith.constant 5 : index
    %c0_176 = arith.constant 0 : index
    %c0_177 = arith.constant 0 : index
    %202 = vector.load %arg6[%c5_175, %c0_176, %c0_177] : memref<16x16x5xbf16, #tpu.memory_space<vmem>>, vector<1x16x5xbf16>
    %203 = vector.shape_cast %202 : vector<1x16x5xbf16> to vector<16x5xbf16>
    %cst_178 = arith.constant dense<0.000000e+00> : vector<1x5xf32>
    %204 = tpu.matmul %201, %203, %cst_178 {dimension_numbers = #tpu.dot_dimension_numbers<[1], [0], [0], [1], [0, 0, 1, 1], [], []>} : vector<1x16xbf16>, vector<16x5xbf16>, vector<1x5xf32> -> vector<1x5xf32>
    %205 = arith.addf %199, %204 : vector<1x5xf32>
    %206 = vector.extract_strided_slice %168 {offsets = [6, 0], sizes = [1, 16], strides = [1, 1]} : vector<16x16xf32> to vector<1x16xf32>
    %207 = arith.truncf %206 : vector<1x16xf32> to vector<1x16xbf16>
    %c6_179 = arith.constant 6 : index
    %c0_180 = arith.constant 0 : index
    %c0_181 = arith.constant 0 : index
    %208 = vector.load %arg6[%c6_179, %c0_180, %c0_181] : memref<16x16x5xbf16, #tpu.memory_space<vmem>>, vector<1x16x5xbf16>
    %209 = vector.shape_cast %208 : vector<1x16x5xbf16> to vector<16x5xbf16>
    %cst_182 = arith.constant dense<0.000000e+00> : vector<1x5xf32>
    %210 = tpu.matmul %207, %209, %cst_182 {dimension_numbers = #tpu.dot_dimension_numbers<[1], [0], [0], [1], [0, 0, 1, 1], [], []>} : vector<1x16xbf16>, vector<16x5xbf16>, vector<1x5xf32> -> vector<1x5xf32>
    %211 = arith.addf %205, %210 : vector<1x5xf32>
    %212 = vector.extract_strided_slice %168 {offsets = [7, 0], sizes = [1, 16], strides = [1, 1]} : vector<16x16xf32> to vector<1x16xf32>
    %213 = arith.truncf %212 : vector<1x16xf32> to vector<1x16xbf16>
    %c7_183 = arith.constant 7 : index
    %c0_184 = arith.constant 0 : index
    %c0_185 = arith.constant 0 : index
    %214 = vector.load %arg6[%c7_183, %c0_184, %c0_185] : memref<16x16x5xbf16, #tpu.memory_space<vmem>>, vector<1x16x5xbf16>
    %215 = vector.shape_cast %214 : vector<1x16x5xbf16> to vector<16x5xbf16>
    %cst_186 = arith.constant dense<0.000000e+00> : vector<1x5xf32>
    %216 = tpu.matmul %213, %215, %cst_186 {dimension_numbers = #tpu.dot_dimension_numbers<[1], [0], [0], [1], [0, 0, 1, 1], [], []>} : vector<1x16xbf16>, vector<16x5xbf16>, vector<1x5xf32> -> vector<1x5xf32>
    %217 = arith.addf %211, %216 : vector<1x5xf32>
    %218 = vector.extract_strided_slice %168 {offsets = [8, 0], sizes = [1, 16], strides = [1, 1]} : vector<16x16xf32> to vector<1x16xf32>
    %219 = arith.truncf %218 : vector<1x16xf32> to vector<1x16xbf16>
    %c8_187 = arith.constant 8 : index
    %c0_188 = arith.constant 0 : index
    %c0_189 = arith.constant 0 : index
    %220 = vector.load %arg6[%c8_187, %c0_188, %c0_189] : memref<16x16x5xbf16, #tpu.memory_space<vmem>>, vector<1x16x5xbf16>
    %221 = vector.shape_cast %220 : vector<1x16x5xbf16> to vector<16x5xbf16>
    %cst_190 = arith.constant dense<0.000000e+00> : vector<1x5xf32>
    %222 = tpu.matmul %219, %221, %cst_190 {dimension_numbers = #tpu.dot_dimension_numbers<[1], [0], [0], [1], [0, 0, 1, 1], [], []>} : vector<1x16xbf16>, vector<16x5xbf16>, vector<1x5xf32> -> vector<1x5xf32>
    %223 = arith.addf %217, %222 : vector<1x5xf32>
    %224 = vector.extract_strided_slice %168 {offsets = [9, 0], sizes = [1, 16], strides = [1, 1]} : vector<16x16xf32> to vector<1x16xf32>
    %225 = arith.truncf %224 : vector<1x16xf32> to vector<1x16xbf16>
    %c9_191 = arith.constant 9 : index
    %c0_192 = arith.constant 0 : index
    %c0_193 = arith.constant 0 : index
    %226 = vector.load %arg6[%c9_191, %c0_192, %c0_193] : memref<16x16x5xbf16, #tpu.memory_space<vmem>>, vector<1x16x5xbf16>
    %227 = vector.shape_cast %226 : vector<1x16x5xbf16> to vector<16x5xbf16>
    %cst_194 = arith.constant dense<0.000000e+00> : vector<1x5xf32>
    %228 = tpu.matmul %225, %227, %cst_194 {dimension_numbers = #tpu.dot_dimension_numbers<[1], [0], [0], [1], [0, 0, 1, 1], [], []>} : vector<1x16xbf16>, vector<16x5xbf16>, vector<1x5xf32> -> vector<1x5xf32>
    %229 = arith.addf %223, %228 : vector<1x5xf32>
    %230 = vector.extract_strided_slice %168 {offsets = [10, 0], sizes = [1, 16], strides = [1, 1]} : vector<16x16xf32> to vector<1x16xf32>
    %231 = arith.truncf %230 : vector<1x16xf32> to vector<1x16xbf16>
    %c10 = arith.constant 10 : index
    %c0_195 = arith.constant 0 : index
    %c0_196 = arith.constant 0 : index
    %232 = vector.load %arg6[%c10, %c0_195, %c0_196] : memref<16x16x5xbf16, #tpu.memory_space<vmem>>, vector<1x16x5xbf16>
    %233 = vector.shape_cast %232 : vector<1x16x5xbf16> to vector<16x5xbf16>
    %cst_197 = arith.constant dense<0.000000e+00> : vector<1x5xf32>
    %234 = tpu.matmul %231, %233, %cst_197 {dimension_numbers = #tpu.dot_dimension_numbers<[1], [0], [0], [1], [0, 0, 1, 1], [], []>} : vector<1x16xbf16>, vector<16x5xbf16>, vector<1x5xf32> -> vector<1x5xf32>
    %235 = arith.addf %229, %234 : vector<1x5xf32>
    %236 = vector.extract_strided_slice %168 {offsets = [11, 0], sizes = [1, 16], strides = [1, 1]} : vector<16x16xf32> to vector<1x16xf32>
    %237 = arith.truncf %236 : vector<1x16xf32> to vector<1x16xbf16>
    %c11 = arith.constant 11 : index
    %c0_198 = arith.constant 0 : index
    %c0_199 = arith.constant 0 : index
    %238 = vector.load %arg6[%c11, %c0_198, %c0_199] : memref<16x16x5xbf16, #tpu.memory_space<vmem>>, vector<1x16x5xbf16>
    %239 = vector.shape_cast %238 : vector<1x16x5xbf16> to vector<16x5xbf16>
    %cst_200 = arith.constant dense<0.000000e+00> : vector<1x5xf32>
    %240 = tpu.matmul %237, %239, %cst_200 {dimension_numbers = #tpu.dot_dimension_numbers<[1], [0], [0], [1], [0, 0, 1, 1], [], []>} : vector<1x16xbf16>, vector<16x5xbf16>, vector<1x5xf32> -> vector<1x5xf32>
    %241 = arith.addf %235, %240 : vector<1x5xf32>
    %242 = vector.extract_strided_slice %168 {offsets = [12, 0], sizes = [1, 16], strides = [1, 1]} : vector<16x16xf32> to vector<1x16xf32>
    %243 = arith.truncf %242 : vector<1x16xf32> to vector<1x16xbf16>
    %c12 = arith.constant 12 : index
    %c0_201 = arith.constant 0 : index
    %c0_202 = arith.constant 0 : index
    %244 = vector.load %arg6[%c12, %c0_201, %c0_202] : memref<16x16x5xbf16, #tpu.memory_space<vmem>>, vector<1x16x5xbf16>
    %245 = vector.shape_cast %244 : vector<1x16x5xbf16> to vector<16x5xbf16>
    %cst_203 = arith.constant dense<0.000000e+00> : vector<1x5xf32>
    %246 = tpu.matmul %243, %245, %cst_203 {dimension_numbers = #tpu.dot_dimension_numbers<[1], [0], [0], [1], [0, 0, 1, 1], [], []>} : vector<1x16xbf16>, vector<16x5xbf16>, vector<1x5xf32> -> vector<1x5xf32>
    %247 = arith.addf %241, %246 : vector<1x5xf32>
    %248 = vector.extract_strided_slice %168 {offsets = [13, 0], sizes = [1, 16], strides = [1, 1]} : vector<16x16xf32> to vector<1x16xf32>
    %249 = arith.truncf %248 : vector<1x16xf32> to vector<1x16xbf16>
    %c13 = arith.constant 13 : index
    %c0_204 = arith.constant 0 : index
    %c0_205 = arith.constant 0 : index
    %250 = vector.load %arg6[%c13, %c0_204, %c0_205] : memref<16x16x5xbf16, #tpu.memory_space<vmem>>, vector<1x16x5xbf16>
    %251 = vector.shape_cast %250 : vector<1x16x5xbf16> to vector<16x5xbf16>
    %cst_206 = arith.constant dense<0.000000e+00> : vector<1x5xf32>
    %252 = tpu.matmul %249, %251, %cst_206 {dimension_numbers = #tpu.dot_dimension_numbers<[1], [0], [0], [1], [0, 0, 1, 1], [], []>} : vector<1x16xbf16>, vector<16x5xbf16>, vector<1x5xf32> -> vector<1x5xf32>
    %253 = arith.addf %247, %252 : vector<1x5xf32>
    %254 = vector.extract_strided_slice %168 {offsets = [14, 0], sizes = [1, 16], strides = [1, 1]} : vector<16x16xf32> to vector<1x16xf32>
    %255 = arith.truncf %254 : vector<1x16xf32> to vector<1x16xbf16>
    %c14 = arith.constant 14 : index
    %c0_207 = arith.constant 0 : index
    %c0_208 = arith.constant 0 : index
    %256 = vector.load %arg6[%c14, %c0_207, %c0_208] : memref<16x16x5xbf16, #tpu.memory_space<vmem>>, vector<1x16x5xbf16>
    %257 = vector.shape_cast %256 : vector<1x16x5xbf16> to vector<16x5xbf16>
    %cst_209 = arith.constant dense<0.000000e+00> : vector<1x5xf32>
    %258 = tpu.matmul %255, %257, %cst_209 {dimension_numbers = #tpu.dot_dimension_numbers<[1], [0], [0], [1], [0, 0, 1, 1], [], []>} : vector<1x16xbf16>, vector<16x5xbf16>, vector<1x5xf32> -> vector<1x5xf32>
    %259 = arith.addf %253, %258 : vector<1x5xf32>
    %260 = vector.extract_strided_slice %168 {offsets = [15, 0], sizes = [1, 16], strides = [1, 1]} : vector<16x16xf32> to vector<1x16xf32>
    %261 = arith.truncf %260 : vector<1x16xf32> to vector<1x16xbf16>
    %c15 = arith.constant 15 : index
    %c0_210 = arith.constant 0 : index
    %c0_211 = arith.constant 0 : index
    %262 = vector.load %arg6[%c15, %c0_210, %c0_211] : memref<16x16x5xbf16, #tpu.memory_space<vmem>>, vector<1x16x5xbf16>
    %263 = vector.shape_cast %262 : vector<1x16x5xbf16> to vector<16x5xbf16>
    %cst_212 = arith.constant dense<0.000000e+00> : vector<1x5xf32>
    %264 = tpu.matmul %261, %263, %cst_212 {dimension_numbers = #tpu.dot_dimension_numbers<[1], [0], [0], [1], [0, 0, 1, 1], [], []>} : vector<1x16xbf16>, vector<16x5xbf16>, vector<1x5xf32> -> vector<1x5xf32>
    %265 = arith.addf %259, %264 : vector<1x5xf32>
    %c0_213 = arith.constant 0 : index
    %c0_214 = arith.constant 0 : index
    %c0_215 = arith.constant 0 : index
    %266 = vector.load %arg8[%c0_213, %c0_214, %c0_215] : memref<1x1x5xf32, #tpu.memory_space<vmem>>, vector<1x1x5xf32>
    %267 = vector.shape_cast %266 : vector<1x1x5xf32> to vector<1x5xf32>
    %268 = vector.shape_cast %265 : vector<1x5xf32> to vector<1x1x5xf32>
    tpu.vector_store %arg8[%c0_213, %c0_214, %c0_215], %268 {strides = array<i32>} : memref<1x1x5xf32, #tpu.memory_space<vmem>>, vector<1x1x5xf32>,
    return
  }
  func.func @transform_0(%arg0: i32) -> (i32, i32, i32, i32) {
    %c0_i32 = arith.constant 0 : i32
    %c0_i32_0 = arith.constant 0 : i32
    %c0_i32_1 = arith.constant 0 : i32
    %c0_i32_2 = arith.constant 0 : i32
    return %arg0, %c0_i32, %c0_i32_0, %c0_i32_1 : i32, i32, i32, i32
  }
  func.func @transform_1(%arg0: i32) -> (i32, i32, i32) {
    %c0_i32 = arith.constant 0 : i32
    %c0_i32_0 = arith.constant 0 : i32
    %c0_i32_1 = arith.constant 0 : i32
    %c0_i32_2 = arith.constant 0 : i32
    return %c0_i32, %c0_i32_0, %c0_i32_1 : i32, i32, i32
  }
  func.func @transform_2(%arg0: i32) -> (i32, i32) {
    %c0_i32 = arith.constant 0 : i32
    %c0_i32_0 = arith.constant 0 : i32
    %c0_i32_1 = arith.constant 0 : i32
    return %c0_i32, %c0_i32_0 : i32, i32
  }
  func.func @transform_3(%arg0: i32) -> (i32, i32, i32) {
    %c0_i32 = arith.constant 0 : i32
    %c0_i32_0 = arith.constant 0 : i32
    %c0_i32_1 = arith.constant 0 : i32
    %c0_i32_2 = arith.constant 0 : i32
    return %c0_i32, %c0_i32_0, %c0_i32_1 : i32, i32, i32
  }
  func.func @transform_4(%arg0: i32) -> (i32, i32) {
    %c0_i32 = arith.constant 0 : i32
    %c0_i32_0 = arith.constant 0 : i32
    %c0_i32_1 = arith.constant 0 : i32
    return %c0_i32, %c0_i32_0 : i32, i32
  }
  func.func @transform_5(%arg0: i32) -> (i32, i32, i32) {
    %c0_i32 = arith.constant 0 : i32
    %c0_i32_0 = arith.constant 0 : i32
    %c0_i32_1 = arith.constant 0 : i32
    %c0_i32_2 = arith.constant 0 : i32
    return %c0_i32, %c0_i32_0, %c0_i32_1 : i32, i32, i32
  }
  func.func @transform_6(%arg0: i32) -> (i32, i32) {
    %c0_i32 = arith.constant 0 : i32
    %c0_i32_0 = arith.constant 0 : i32
    %c0_i32_1 = arith.constant 0 : i32
    return %c0_i32, %c0_i32_0 : i32, i32
  }
  func.func @transform_7(%arg0: i32) -> (i32, i32, i32) {
    %c0_i32 = arith.constant 0 : i32
    %c0_i32_0 = arith.constant 0 : i32
    %c0_i32_1 = arith.constant 0 : i32
    return %arg0, %c0_i32, %c0_i32_0 : i32, i32, i32
  }
}

</mosaic_0001>

<bundles_post_ra>
// kernel: ssl_train_forward.1
= control target key start
LH: loop header
LB: loop body
LE: loop exit
PB: predicated region body
PF: predicated region fallthrough
CT: control target
= control target key end

     0   :  { %12 = vsyncpa [#allocation7], 0  ;;  %s7958_s0 = inlined_call_operand.vmem [shape: f32[2,16,16,4], index: 0, kind: input, shape index: {}]   ;;  %s7959_s1 = inlined_call_operand.vmem [shape: bf16[9,4,8], index: 1, kind: input, shape index: {}]   ;;  %s7960_s2 = inlined_call_operand.vmem [shape: f32[1,8], index: 2, kind: input, shape index: {}]   ;;  %s7961_s3 = inlined_call_operand.vmem [shape: bf16[9,8,16], index: 3, kind: input, shape index: {}]   ;;  %s7962_s4 = inlined_call_operand.vmem [shape: f32[1,16], index: 4, kind: input, shape index: {}]   ;;  %s7963_s5 = inlined_call_operand.vmem [shape: bf16[16,16,5], index: 5, kind: input, shape index: {}]   ;;  %s7964_s6 = inlined_call_operand.vmem [shape: f32[1,5], index: 6, kind: input, shape index: {}]   ;;  %s7965_s7 = inlined_call_operand.hbm [shape: f32[2,1,5], index: 7, kind: output, shape index: {}]  }
   0x1   :  { %14 = vsyncpa [#allocation7 + $0x1], 0  ;;  %s6234_s24 = smov 0   ;;  %s6236_s25 = smov 0  }
   0x2   :  { %s6238_s26 = smov 0   ;;  %s6240_s27 = smov 0  }
   0x3 LB: > { %s6255_s28 = sadd.s32 4294967295, %s6189_s27   ;;  %s5062_s29 = sadd.s32 4294967294, %s6189_s27   ;;  %s6189_s27 = sphi %s6240_s27, %s8148_s27   ;;  %s6185_s26 = sphi %s6238_s26, %s8147_s26   ;;  %s6181_s25 = sphi %s6236_s25, %s8146_s25   ;;  %s6177_s24 = sphi %s6234_s24, %s8145_s24  }
   0x4   : > { %s6259_s30 = sadd.s32 1, %s6189_s27   ;;  %s179_s8 = sadd.s32 1, %s6185_s26 }
   0x5   : > { %s176_s9 = ssub.s32 %s6189_s27, %s6259_s30  ;;  %p189_p0 = scmp.ne.s32.totalorder %s6185_s26, %s6181_s25 }
   0x6   : > { %p177_p1 = scmp.eq.s32.totalorder %s176_s9, 0  ;;  %p190_p2 = scmp.eq.s32.totalorder %s6255_s28, 1 }
   0x7   : > { %p195_p3 = scmp.ne.s32.totalorder %s6181_s25, %s6177_s24  ;;  %p196_p4 = scmp.eq.s32.totalorder %s5062_s29, 1 }
   0x8   : > { %s6270_s10 = scalar_select %p177_p1, %s6185_s26, %s179_s8  }
   0x9   : > { %p6272_p5 = por %p190_p2, %p189_p0  ;;  %p6276_p6 = por %p196_p4, %p195_p3 }
   0xa   : > { %p5065_p7 = scmp.ge.s32.totalorder %s6189_s27, 1  ;;  %p240_p8 = scmp.lt.s32.totalorder %s6189_s27, 3 }
   0xc   : > { %p241_p9 = pnand %p5065_p7, %p240_p8 }
   0xe   : > { %244 = sbr.rel (%p241_p9) target bundleno = 1164 (0x48c), region = 48 }
  0x13   : > { %v5068_v0 = vld [vmem:[%s7959_s1 + $0x2] sm:$0x3]  ;;  %vm562_vm0 = vcmask 1041408   ;;  %v463_v1 = vld [vmem:[%s7959_s1] sm:$0x3]  ;;  %vm309_vm1 = vcmask 31744  }
  0x14   : > { %6054 = vmatprep.subr.msk.bf16.mxu0 %vm562_vm0, %v5068_v0  ;;  %v564_v2 = vsel %vm562_vm0, %v5068_v0, 0  ;;  %6055 = vmatprep.subr.msk.bf16.mxu1 %vm562_vm0, %v463_v1  ;;  %v776_v3 = vsel %vm562_vm0, %v463_v1, 0  ;;  %v6295_v4 = vld [vmem:[%s7959_s1 + $0x4] sm:$0x3]  ;;  %p271_p10 = scmp.lt.s32.totalorder %s6255_s28, 1  ;;  %v7966_v5 = vmov 0.0  }
  0x15   : > { %5563 = vmatpush3.bf16.msra.mxu0 %v564_v2  ;;  %5597 = vmatpush3.bf16.msra.mxu1 %v776_v3  ;;  %311 = vst.msk [vmem:[#allocation2 + $0x8] sm:$0xff] %vm309_vm1, %v7966_v5  ;;  %312 = vst.msk [vmem:[#allocation2 + $0x10] sm:$0xff] %vm309_vm1, %v7966_v5  ;;  %v6445_v6 = vld [vmem:[%s7959_s1 + $0x6] sm:$0x3]  ;;  %v1038_v38 = vsel %vm562_vm0, %v6295_v4, 0  ;;  %vm3085_vm2 = vcmask 64512  }
  0x16   : > { %310 = vst.msk [vmem:[#allocation2] sm:$0xff] %vm309_vm1, %v7966_v5  ;;  %313 = vst.msk [vmem:[#allocation2 + $0x18] sm:$0xff] %vm309_vm1, %v7966_v5  ;;  %6056 = vmatprep.subr.msk.bf16.mxu0 %vm562_vm0, %v6295_v4  ;;  %s272_s21 = scalar_select %p271_p10, %s6255_s28, 1  ;;  %6057 = vmatprep.subr.msk.bf16.mxu1 %vm562_vm0, %v6445_v6  ;;  %v1332_v46 = vsel %vm562_vm0, %v6445_v6, 0  ;;  %v6518_v47 = vld [vmem:[%s7959_s1 + $0x8] sm:$0x3] }
  0x17   : > { %314 = vst.msk [vmem:[#allocation2 + $0x20] sm:$0xff] %vm309_vm1, %v7966_v5  ;;  %315 = vst.msk [vmem:[#allocation2 + $0x28] sm:$0xff] %vm309_vm1, %v7966_v5  ;;  %vm3219_vm3 = vcmask 1043456   ;;  %vm6192_vm4 = vmmov 0   ;;  %vm4110_vm5 = vcmask 130048   ;;  %s5328_s23 = sshll.u32 %s6255_s28, 4 }
  0x18   : > { %316 = vst.msk [vmem:[#allocation2 + $0x30] sm:$0xff] %vm309_vm1, %v7966_v5  ;;  %317 = vst.msk [vmem:[#allocation2 + $0x38] sm:$0xff] %vm309_vm1, %v7966_v5  ;;  %s5331_s22 = sshll.u32 %s272_s21, 8  ;;  %vm4992_vm6 = vcmask 32768   ;;  %s7917_s14 = scalar_lea.hbm %s7965_s7, %s5328_s23 }
  0x19   : > { %318 = vst.msk [vmem:[#allocation2 + $0x40] sm:$0xff] %vm309_vm1, %v7966_v5  ;;  %319 = vst.msk [vmem:[#allocation2 + $0x48] sm:$0xff] %vm309_vm1, %v7966_v5  ;;  %s6457_s8 = scalar_lea.vmem %s7958_s0, %s5331_s22  ;;  %s269_s22 = sand.u32 1, %s6181_s25  }
  0x1a   : > { %320 = vst.msk [vmem:[#allocation2 + $0x50] sm:$0xff] %vm309_vm1, %v7966_v5  ;;  %321 = vst.msk [vmem:[#allocation2 + $0x58] sm:$0xff] %vm309_vm1, %v7966_v5  ;;  %v277_v7 = vld [vmem:[%s6457_s8] sm:$0xff]  ;;  %v278_v8 = vld [vmem:[%s6457_s8 + $0x8] sm:$0xff]  ;;  %s270_s29 = scalar_lea.vmem [#allocation6], %s269_s22  ;;  %s4995_s28 = scalar_lea.sflag [#allocation7], %s269_s22 }
  0x1b   : > { %322 = vst.msk [vmem:[#allocation2 + $0x60] sm:$0xff] %vm309_vm1, %v7966_v5  ;;  %323 = vst.msk [vmem:[#allocation2 + $0x68] sm:$0xff] %vm309_vm1, %v7966_v5  ;;  %v279_v9 = vld [vmem:[%s6457_s8 + $0x10] sm:$0xff]  ;;  %v280_v10 = vld [vmem:[%s6457_s8 + $0x18] sm:$0xff]  ;;  %s6193_s16 = smov [#allocation6]  }
  0x1c   : > { %324 = vst.msk [vmem:[#allocation2 + $0x70] sm:$0xff] %vm309_vm1, %v7966_v5  ;;  %325 = vst.msk [vmem:[#allocation2 + $0x78] sm:$0xff] %vm309_vm1, %v7966_v5  ;;  %v281_v11 = vld [vmem:[%s6457_s8 + $0x20] sm:$0xff]  ;;  %v282_v12 = vld [vmem:[%s6457_s8 + $0x28] sm:$0xff]  ;;  %s6133_s17 = sshll.u32 %s6193_s16, 4  ;;  %s6134_s17 = int_to_ptr.vmem [resolvable:$false] %s6133_s17 }
  0x1d   : > { %326 = vst.msk [vmem:[#allocation2 + $0x80] sm:$0xff] %vm309_vm1, %v7966_v5  ;;  %327 = vst.msk [vmem:[#allocation2 + $0x88] sm:$0xff] %vm309_vm1, %v7966_v5  ;;  %v464_v13 = vld [vmem:[#allocation2 + $0x8] sm:$0xff]  ;;  %v465_v14 = vld [vmem:[#allocation2 + $0x10] sm:$0xff]  ;;  %s6135_s18 = scalar_lea.vmem %s6134_s17, 32 }
  0x1e   : > { %328 = vst.msk [vmem:[#allocation2 + $0x90] sm:$0xff] %vm309_vm1, %v7966_v5  ;;  %329 = vst.msk [vmem:[#allocation2 + $0x98] sm:$0xff] %vm309_vm1, %v7966_v5  ;;  %v415_v15 = vld [vmem:[#allocation2 + $0x7] sm:$0xff]  ;;  %v496_v16 = vpack.c.bf16 %v465_v14, %v464_v13  ;;  %v416_v17 = vld [vmem:[#allocation2 + $0xf] sm:$0xff] }
  0x1f   : > { %330 = vst.msk [vmem:[#allocation2 + $0xa0] sm:$0xff] %vm309_vm1, %v7966_v5  ;;  %331 = vst.msk [vmem:[#allocation2 + $0xa8] sm:$0xff] %vm309_vm1, %v7966_v5  ;;  %v283_v18 = vld [vmem:[%s6457_s8 + $0x30] sm:$0xff]  ;;  %v284_v19 = vld [vmem:[%s6457_s8 + $0x38] sm:$0xff]  ;;  %v447_v20 = vpack.c.bf16 %v416_v17, %v415_v15 }
  0x20   : > { %332 = vst.msk [vmem:[#allocation2 + $0xb0] sm:$0xff] %vm309_vm1, %v7966_v5  ;;  %333 = vst.msk [vmem:[#allocation2 + $0xb8] sm:$0xff] %vm309_vm1, %v7966_v5  ;;  %v285_v21 = vld [vmem:[%s6457_s8 + $0x40] sm:$0xff]  ;;  %v286_v22 = vld [vmem:[%s6457_s8 + $0x48] sm:$0xff]  ;;  %5564 = vmatprep.mubr.msk.bf16.mxu0 %vm309_vm1, %v496_v16 }
  0x21   : > { %334 = vst.msk [vmem:[#allocation2 + $0xc0] sm:$0xff] %vm309_vm1, %v7966_v5  ;;  %335 = vst.msk [vmem:[#allocation2 + $0xc8] sm:$0xff] %vm309_vm1, %v7966_v5  ;;  %v287_v23 = vld [vmem:[%s6457_s8 + $0x50] sm:$0xff]  ;;  %v288_v24 = vld [vmem:[%s6457_s8 + $0x58] sm:$0xff]  ;;  %5598 = vmatprep.mubr.msk.bf16.mxu1 %vm309_vm1, %v447_v20 }
  0x22   : > { %336 = vst.msk [vmem:[#allocation2 + $0xd0] sm:$0xff] %vm309_vm1, %v7966_v5  ;;  %337 = vst.msk [vmem:[#allocation2 + $0xd8] sm:$0xff] %vm309_vm1, %v7966_v5  ;;  %v289_v25 = vld [vmem:[%s6457_s8 + $0x60] sm:$0xff]  ;;  %v290_v26 = vld [vmem:[%s6457_s8 + $0x68] sm:$0xff] }
  0x23   : > { %338 = vst.msk [vmem:[#allocation2 + $0xe0] sm:$0xff] %vm309_vm1, %v7966_v5  ;;  %339 = vst.msk [vmem:[#allocation2 + $0xe8] sm:$0xff] %vm309_vm1, %v7966_v5  ;;  %v291_v27 = vld [vmem:[%s6457_s8 + $0x70] sm:$0xff]  ;;  %v292_v28 = vld [vmem:[%s6457_s8 + $0x78] sm:$0xff] }
  0x24   : > { %340 = vst.msk [vmem:[#allocation2 + $0xf0] sm:$0xff] %vm309_vm1, %v7966_v5  ;;  %341 = vst.msk [vmem:[#allocation2 + $0xf8] sm:$0xff] %vm309_vm1, %v7966_v5  ;;  %v293_v29 = vld [vmem:[%s6457_s8 + $0x80] sm:$0xff]  ;;  %v294_v30 = vld [vmem:[%s6457_s8 + $0x88] sm:$0xff] }
  0x25   : > { %342 = vst.msk [vmem:[#allocation2 + $0x100] sm:$0xff] %vm309_vm1, %v7966_v5  ;;  %343 = vst.msk [vmem:[#allocation2 + $0x108] sm:$0xff] %vm309_vm1, %v7966_v5  ;;  %v295_v31 = vld [vmem:[%s6457_s8 + $0x90] sm:$0xff]  ;;  %v296_v32 = vld [vmem:[%s6457_s8 + $0x98] sm:$0xff] }
  0x26   : > { %344 = vst.msk [vmem:[#allocation2 + $0x110] sm:$0xff] %vm309_vm1, %v7966_v5  ;;  %345 = vst.msk [vmem:[#allocation2 + $0x118] sm:$0xff] %vm309_vm1, %v7966_v5  ;;  %v297_v4 = vld [vmem:[%s6457_s8 + $0xa0] sm:$0xff]  ;;  %v298_v6 = vld [vmem:[%s6457_s8 + $0xa8] sm:$0xff] }
  0x27   : > { %346 = vst.msk [vmem:[#allocation2 + $0x120] sm:$0xff] %vm309_vm1, %v7966_v5  ;;  %347 = vst.msk [vmem:[#allocation2 + $0x128] sm:$0xff] %vm309_vm1, %v7966_v5  ;;  %v304_v13 = vld [vmem:[%s6457_s8 + $0xd8] sm:$0xff]  ;;  %v305_v16 = vld [vmem:[%s6457_s8 + $0xe0] sm:$0xff] }
  0x28   : > { %348 = vst.msk [vmem:[#allocation2 + $0x130] sm:$0xff] %vm309_vm1, %v7966_v5  ;;  %349 = vst.msk [vmem:[#allocation2 + $0x138] sm:$0xff] %vm309_vm1, %v7966_v5  ;;  %v306_v17 = vld [vmem:[%s6457_s8 + $0xe8] sm:$0xff] }
  0x29   : > { %350 = vst.msk [vmem:[#allocation2 + $0x140] sm:$0xff] %vm309_vm1, %v7966_v5  ;;  %351 = vst.msk [vmem:[#allocation2 + $0x148] sm:$0xff] %vm309_vm1, %v7966_v5 }
  0x2a   : > { %352 = vst.msk [vmem:[#allocation2 + $0x150] sm:$0xff] %vm309_vm1, %v7966_v5  ;;  %353 = vst.msk [vmem:[#allocation2 + $0x158] sm:$0xff] %vm309_vm1, %v7966_v5 }
  0x2b   : > { %354 = vst.msk [vmem:[#allocation2 + $0x160] sm:$0xff] %vm309_vm1, %v7966_v5  ;;  %355 = vst.msk [vmem:[#allocation2 + $0x168] sm:$0xff] %vm309_vm1, %v7966_v5 }
  0x2c   : > { %356 = vst.msk [vmem:[#allocation2 + $0x170] sm:$0xff] %vm309_vm1, %v7966_v5  ;;  %357 = vst.msk [vmem:[#allocation2 + $0x178] sm:$0xff] %vm309_vm1, %v7966_v5 }
  0x2d   : > { %358 = vst.msk [vmem:[#allocation2 + $0x180] sm:$0xff] %vm309_vm1, %v7966_v5  ;;  %359 = vst.msk [vmem:[#allocation2 + $0x188] sm:$0xff] %vm309_vm1, %v7966_v5 }
  0x2e   : > { %360 = vst.msk [vmem:[#allocation2 + $0x190] sm:$0xff] %vm309_vm1, %v7966_v5  ;;  %361 = vst.msk [vmem:[#allocation2 + $0x198] sm:$0xff] %vm309_vm1, %v7966_v5 }
  0x2f   : > { %362 = vst.msk [vmem:[#allocation2 + $0x1a0] sm:$0xff] %vm309_vm1, %v7966_v5  ;;  %363 = vst.msk [vmem:[#allocation2 + $0x1a8] sm:$0xff] %vm309_vm1, %v7966_v5 }
  0x30   : > { %364 = vst.msk [vmem:[#allocation2 + $0x1b0] sm:$0xff] %vm309_vm1, %v7966_v5  ;;  %365 = vst.msk [vmem:[#allocation2 + $0x1b8] sm:$0xff] %vm309_vm1, %v7966_v5 }
  0x31   : > { %366 = vst.msk [vmem:[#allocation2 + $0x1c0] sm:$0xff] %vm309_vm1, %v7966_v5  ;;  %367 = vst.msk [vmem:[#allocation2 + $0x1c8] sm:$0xff] %vm309_vm1, %v7966_v5 }
  0x32   : > { %368 = vst.msk [vmem:[#allocation2 + $0x1d0] sm:$0xff] %vm309_vm1, %v7966_v5  ;;  %369 = vst.msk [vmem:[#allocation2 + $0x1d8] sm:$0xff] %vm309_vm1, %v7966_v5 }
  0x33   : > { %370 = vst.msk [vmem:[#allocation2 + $0x1e0] sm:$0xff] %vm309_vm1, %v7966_v5  ;;  %371 = vst.msk [vmem:[#allocation2 + $0x1e8] sm:$0xff] %vm309_vm1, %v7966_v5 }
  0x34   : > { %372 = vst.msk [vmem:[#allocation2 + $0x1f0] sm:$0xff] %vm309_vm1, %v7966_v5  ;;  %373 = vst.msk [vmem:[#allocation2 + $0x1f8] sm:$0xff] %vm309_vm1, %v7966_v5 }
  0x35   : > { %374 = vst.msk [vmem:[#allocation2 + $0x200] sm:$0xff] %vm309_vm1, %v7966_v5  ;;  %375 = vst.msk [vmem:[#allocation2 + $0x208] sm:$0xff] %vm309_vm1, %v7966_v5 }
  0x36   : > { %376 = vst.msk [vmem:[#allocation2 + $0x210] sm:$0xff] %vm309_vm1, %v7966_v5  ;;  %377 = vst.msk [vmem:[#allocation2 + $0x218] sm:$0xff] %vm309_vm1, %v7966_v5 }
  0x37   : > { %378 = vst.msk [vmem:[#allocation2 + $0x220] sm:$0xff] %vm309_vm1, %v7966_v5  ;;  %379 = vst.msk [vmem:[#allocation2 + $0x228] sm:$0xff] %vm309_vm1, %v7966_v5 }
  0x38   : > { %380 = vst.msk [vmem:[#allocation2 + $0x230] sm:$0xff] %vm309_vm1, %v7966_v5  ;;  %381 = vst.msk [vmem:[#allocation2 + $0x238] sm:$0xff] %vm309_vm1, %v7966_v5 }
  0x39   : > { %383 = vst.msk [vmem:[#allocation2 + $0x28] sm:$0xff] %vm309_vm1, %v277_v7  ;;  %384 = vst.msk [vmem:[#allocation2 + $0x30] sm:$0xff] %vm309_vm1, %v278_v8  ;;  %v299_v7 = vld [vmem:[%s6457_s8 + $0xb0] sm:$0xff]  ;;  %v300_v8 = vld [vmem:[%s6457_s8 + $0xb8] sm:$0xff] }
  0x3a   : > { %385 = vst.msk [vmem:[#allocation2 + $0x48] sm:$0xff] %vm309_vm1, %v279_v9  ;;  %386 = vst.msk [vmem:[#allocation2 + $0x50] sm:$0xff] %vm309_vm1, %v280_v10  ;;  %v301_v9 = vld [vmem:[%s6457_s8 + $0xc0] sm:$0xff] }
  0x3b   : > { %387 = vst.msk [vmem:[#allocation2 + $0x68] sm:$0xff] %vm309_vm1, %v281_v11  ;;  %388 = vst.msk [vmem:[#allocation2 + $0x70] sm:$0xff] %vm309_vm1, %v282_v12  ;;  %v302_v11 = vld [vmem:[%s6457_s8 + $0xc8] sm:$0xff]  ;;  %v303_v12 = vld [vmem:[%s6457_s8 + $0xd0] sm:$0xff] }
  0x3c   : > { %389 = vst.msk [vmem:[#allocation2 + $0x88] sm:$0xff] %vm309_vm1, %v283_v18  ;;  %390 = vst.msk [vmem:[#allocation2 + $0x90] sm:$0xff] %vm309_vm1, %v284_v19 }
  0x3d   : > { %391 = vst.msk [vmem:[#allocation2 + $0xa8] sm:$0xff] %vm309_vm1, %v285_v21  ;;  %392 = vst.msk [vmem:[#allocation2 + $0xb0] sm:$0xff] %vm309_vm1, %v286_v22 }
  0x3e   : > { %393 = vst.msk [vmem:[#allocation2 + $0xc8] sm:$0xff] %vm309_vm1, %v287_v23  ;;  %394 = vst.msk [vmem:[#allocation2 + $0xd0] sm:$0xff] %vm309_vm1, %v288_v24 }
  0x3f   : > { %395 = vst.msk [vmem:[#allocation2 + $0xe8] sm:$0xff] %vm309_vm1, %v289_v25  ;;  %396 = vst.msk [vmem:[#allocation2 + $0xf0] sm:$0xff] %vm309_vm1, %v290_v26 }
  0x40   : > { %397 = vst.msk [vmem:[#allocation2 + $0x108] sm:$0xff] %vm309_vm1, %v291_v27  ;;  %398 = vst.msk [vmem:[#allocation2 + $0x110] sm:$0xff] %vm309_vm1, %v292_v28  ;;  %v466_v33 = vld [vmem:[#allocation2 + $0x28] sm:$0xff]  ;;  %v467_v34 = vld [vmem:[#allocation2 + $0x30] sm:$0xff] }
  0x41   : > { %399 = vst.msk [vmem:[#allocation2 + $0x128] sm:$0xff] %vm309_vm1, %v293_v29  ;;  %v417_v35 = vld [vmem:[#allocation2 + $0x27] sm:$0xff]  ;;  %400 = vst.msk [vmem:[#allocation2 + $0x130] sm:$0xff] %vm309_vm1, %v294_v30  ;;  %v6501_v36 = vpack.c.bf16 %v467_v34, %v466_v33  ;;  %v418_v37 = vld [vmem:[#allocation2 + $0x2f] sm:$0xff] }
  0x42   : > { %401 = vst.msk [vmem:[#allocation2 + $0x148] sm:$0xff] %vm309_vm1, %v295_v31  ;;  %402 = vst.msk [vmem:[#allocation2 + $0x150] sm:$0xff] %vm309_vm1, %v296_v32  ;;  %v468_v39 = vld [vmem:[#allocation2 + $0x48] sm:$0xff]  ;;  %v469_v40 = vld [vmem:[#allocation2 + $0x50] sm:$0xff]  ;;  %v6505_v41 = vpack.c.bf16 %v418_v37, %v417_v35 }
  0x43   : > { %v6507_v42 = vpack.c.bf16 %v469_v40, %v468_v39  ;;  %v419_v43 = vld [vmem:[#allocation2 + $0x47] sm:$0xff]  ;;  %v420_v44 = vld [vmem:[#allocation2 + $0x4f] sm:$0xff]  ;;  %5565 = vmatmul.mubr.msk.bf16.vlgmr.msra.gmra.mxu0 %vm309_vm1, %v6501_v36  ;;  %403 = vst.msk [vmem:[#allocation2 + $0x168] sm:$0xff] %vm309_vm1, %v297_v4  ;;  %404 = vst.msk [vmem:[#allocation2 + $0x170] sm:$0xff] %vm309_vm1, %v298_v6 }
  0x44   : > { %v6511_v45 = vpack.c.bf16 %v420_v44, %v419_v43  ;;  %5599 = vmatmul.mubr.msk.bf16.vlgmr.msra.gmra.mxu1 %vm309_vm1, %v6505_v41  ;;  %5631 = vmatpush3.bf16.msra.mxu0 %v1038_v38  ;;  %v470_v48 = vld [vmem:[#allocation2 + $0x68] sm:$0xff]  ;;  %v471_v49 = vld [vmem:[#allocation2 + $0x70] sm:$0xff]  ;;  %405 = vst.msk [vmem:[#allocation2 + $0x188] sm:$0xff] %vm309_vm1, %v299_v7  ;;  %406 = vst.msk [vmem:[#allocation2 + $0x190] sm:$0xff] %vm309_vm1, %v300_v8 }
  0x45   : > { %v421_v50 = vld [vmem:[#allocation2 + $0x67] sm:$0xff]  ;;  %5568 = vmatprep.mubr.msk.bf16.mxu0 %vm309_vm1, %v6507_v42  ;;  %v422_v51 = vld [vmem:[#allocation2 + $0x6f] sm:$0xff]  ;;  %5665 = vmatpush3.bf16.msra.mxu1 %v1332_v46  ;;  %v6528_v56 = vpack.c.bf16 %v471_v49, %v470_v48  ;;  %407 = vst.msk [vmem:[#allocation2 + $0x1a8] sm:$0xff] %vm309_vm1, %v301_v9  ;;  %408 = vst.msk [vmem:[#allocation2 + $0x1b0] sm:$0xff] %vm309_vm1, %v302_v11 }
  0x46   : > { %5602 = vmatprep.mubr.msk.bf16.mxu1 %vm309_vm1, %v6511_v45  ;;  %v472_v52 = vld [vmem:[#allocation2 + $0x88] sm:$0xff]  ;;  %v473_v53 = vld [vmem:[#allocation2 + $0x90] sm:$0xff]  ;;  %6058 = vmatprep.subr.msk.bf16.mxu0 %vm562_vm0, %v6518_v47  ;;  %v6530_v57 = vpack.c.bf16 %v422_v51, %v421_v50  ;;  %409 = vst.msk [vmem:[#allocation2 + $0x1c8] sm:$0xff] %vm309_vm1, %v303_v12  ;;  %410 = vst.msk [vmem:[#allocation2 + $0x1d0] sm:$0xff] %vm309_vm1, %v304_v13 }
  0x47   : > { %v423_v54 = vld [vmem:[#allocation2 + $0x87] sm:$0xff]  ;;  %v424_v55 = vld [vmem:[#allocation2 + $0x8f] sm:$0xff]  ;;  %v6532_v58 = vpack.c.bf16 %v473_v53, %v472_v52  ;;  %411 = vst.msk [vmem:[#allocation2 + $0x1e8] sm:$0xff] %vm309_vm1, %v305_v16  ;;  %412 = vst.msk [vmem:[#allocation2 + $0x1f0] sm:$0xff] %vm309_vm1, %v306_v17 }
  0x48   : > { %v6534_v59 = vpack.c.bf16 %v424_v55, %v423_v54  ;;  %v474_v60 = vld [vmem:[#allocation2 + $0xa8] sm:$0xff]  ;;  %v475_v61 = vld [vmem:[#allocation2 + $0xb0] sm:$0xff]  ;;  %v308_v51 = vld [vmem:[%s6457_s8 + $0xf8] sm:$0xff]  ;;  %3141 = vst.msk [vmem:[#allocation3] sm:$0xff] %vm3085_vm2, %v7966_v5 }
  0x49   : > { %v425_v62 = vld [vmem:[#allocation2 + $0xa7] sm:$0xff]  ;;  %v426_v63 = vld [vmem:[#allocation2 + $0xaf] sm:$0xff]  ;;  %v6551_v10 = vpack.c.bf16 %v475_v61, %v474_v60  ;;  %414 = vst.msk [vmem:[#allocation2 + $0x210] sm:$0xff] %vm309_vm1, %v308_v51 }
  0x4a   : > { %v476_v0 = vld [vmem:[#allocation2 + $0xc8] sm:$0xff]  ;;  %v477_v1 = vld [vmem:[#allocation2 + $0xd0] sm:$0xff]  ;;  %v6559_v14 = vpack.c.bf16 %v426_v63, %v425_v62  ;;  %3142 = vst.msk [vmem:[#allocation3 + $0x8] sm:$0xff] %vm3085_vm2, %v7966_v5  ;;  %3143 = vst.msk [vmem:[#allocation3 + $0x10] sm:$0xff] %vm3085_vm2, %v7966_v5 }
  0x4b   : > { %5569 = vmatmul.mubr.msk.bf16.gmra.mxu0 %vm309_vm1, %v6528_v56  ;;  %v427_v2 = vld [vmem:[#allocation2 + $0xc7] sm:$0xff]  ;;  %v428_v3 = vld [vmem:[#allocation2 + $0xcf] sm:$0xff]  ;;  %v6561_v15 = vpack.c.bf16 %v477_v1, %v476_v0  ;;  %3144 = vst.msk [vmem:[#allocation3 + $0x18] sm:$0xff] %vm3085_vm2, %v7966_v5  ;;  %3145 = vst.msk [vmem:[#allocation3 + $0x20] sm:$0xff] %vm3085_vm2, %v7966_v5 }
  0x4c   : > { %5603 = vmatmul.mubr.msk.bf16.gmra.mxu1 %vm309_vm1, %v6530_v57  ;;  %5572 = vmatprep.mubr.msk.bf16.mxu0 %vm309_vm1, %v6532_v58  ;;  %v6568_v18 = vpack.c.bf16 %v428_v3, %v427_v2  ;;  %v478_v19 = vld [vmem:[#allocation2 + $0xe8] sm:$0xff]  ;;  %v479_v20 = vld [vmem:[#allocation2 + $0xf0] sm:$0xff]  ;;  %3146 = vst.msk [vmem:[#allocation3 + $0x28] sm:$0xff] %vm3085_vm2, %v7966_v5  ;;  %3147 = vst.msk [vmem:[#allocation3 + $0x30] sm:$0xff] %vm3085_vm2, %v7966_v5 }
  0x4d   : > { %5606 = vmatprep.mubr.msk.bf16.mxu1 %vm309_vm1, %v6534_v59  ;;  %v429_v21 = vld [vmem:[#allocation2 + $0xe7] sm:$0xff]  ;;  %v430_v22 = vld [vmem:[#allocation2 + $0xef] sm:$0xff]  ;;  %v6580_v27 = vpack.c.bf16 %v479_v20, %v478_v19  ;;  %3148 = vst.msk [vmem:[#allocation3 + $0x38] sm:$0xff] %vm3085_vm2, %v7966_v5  ;;  %3149 = vst.msk [vmem:[#allocation3 + $0x40] sm:$0xff] %vm3085_vm2, %v7966_v5 }
  0x4e   : > { %v480_v23 = vld [vmem:[#allocation2 + $0x108] sm:$0xff]  ;;  %v481_v24 = vld [vmem:[#allocation2 + $0x110] sm:$0xff]  ;;  %v6582_v28 = vpack.c.bf16 %v430_v22, %v429_v21  ;;  %3150 = vst.msk [vmem:[#allocation3 + $0x48] sm:$0xff] %vm3085_vm2, %v7966_v5  ;;  %3151 = vst.msk [vmem:[#allocation3 + $0x50] sm:$0xff] %vm3085_vm2, %v7966_v5 }
  0x4f   : > { %v431_v25 = vld [vmem:[#allocation2 + $0x107] sm:$0xff]  ;;  %v432_v26 = vld [vmem:[#allocation2 + $0x10f] sm:$0xff]  ;;  %v6584_v29 = vpack.c.bf16 %v481_v24, %v480_v23  ;;  %3152 = vst.msk [vmem:[#allocation3 + $0x58] sm:$0xff] %vm3085_vm2, %v7966_v5  ;;  %3153 = vst.msk [vmem:[#allocation3 + $0x60] sm:$0xff] %vm3085_vm2, %v7966_v5 }
  0x50   : > { %v6586_v30 = vpack.c.bf16 %v432_v26, %v431_v25  ;;  %v482_v31 = vld [vmem:[#allocation2 + $0x128] sm:$0xff]  ;;  %v483_v32 = vld [vmem:[#allocation2 + $0x130] sm:$0xff]  ;;  %3154 = vst.msk [vmem:[#allocation3 + $0x68] sm:$0xff] %vm3085_vm2, %v7966_v5  ;;  %3155 = vst.msk [vmem:[#allocation3 + $0x70] sm:$0xff] %vm3085_vm2, %v7966_v5 }
  0x51   : > { %v433_v33 = vld [vmem:[#allocation2 + $0x127] sm:$0xff]  ;;  %v434_v34 = vld [vmem:[#allocation2 + $0x12f] sm:$0xff]  ;;  %v6596_v40 = vpack.c.bf16 %v483_v32, %v482_v31  ;;  %3156 = vst.msk [vmem:[#allocation3 + $0x78] sm:$0xff] %vm3085_vm2, %v7966_v5  ;;  %3157 = vst.msk [vmem:[#allocation3 + $0x80] sm:$0xff] %vm3085_vm2, %v7966_v5 }
  0x52   : > { %v484_v35 = vld [vmem:[#allocation2 + $0x148] sm:$0xff]  ;;  %v485_v37 = vld [vmem:[#allocation2 + $0x150] sm:$0xff]  ;;  %v6598_v43 = vpack.c.bf16 %v434_v34, %v433_v33  ;;  %3158 = vst.msk [vmem:[#allocation3 + $0x88] sm:$0xff] %vm3085_vm2, %v7966_v5  ;;  %3159 = vst.msk [vmem:[#allocation3 + $0x90] sm:$0xff] %vm3085_vm2, %v7966_v5 }
  0x53   : > { %5573 = vmatmul.mubr.msk.bf16.gmra.mxu0 %vm309_vm1, %v6551_v10  ;;  %v435_v38 = vld [vmem:[#allocation2 + $0x147] sm:$0xff]  ;;  %v436_v39 = vld [vmem:[#allocation2 + $0x14f] sm:$0xff]  ;;  %v6600_v44 = vpack.c.bf16 %v485_v37, %v484_v35  ;;  %3160 = vst.msk [vmem:[#allocation3 + $0x98] sm:$0xff] %vm3085_vm2, %v7966_v5  ;;  %3161 = vst.msk [vmem:[#allocation3 + $0xa0] sm:$0xff] %vm3085_vm2, %v7966_v5 }
  0x54   : > { %5607 = vmatmul.mubr.msk.bf16.gmra.mxu1 %vm309_vm1, %v6559_v14  ;;  %5576 = vmatprep.mubr.msk.bf16.mxu0 %vm309_vm1, %v6561_v15  ;;  %v6602_v46 = vpack.c.bf16 %v436_v39, %v435_v38  ;;  %v486_v48 = vld [vmem:[#allocation2 + $0x168] sm:$0xff]  ;;  %v487_v49 = vld [vmem:[#allocation2 + $0x170] sm:$0xff]  ;;  %v1626_v39 = vsel %vm562_vm0, %v6518_v47, 0  ;;  %3162 = vst.msk [vmem:[#allocation3 + $0xa8] sm:$0xff] %vm3085_vm2, %v7966_v5  ;;  %3163 = vst.msk [vmem:[#allocation3 + $0xb0] sm:$0xff] %vm3085_vm2, %v7966_v5 }
  0x55   : > { %5610 = vmatprep.mubr.msk.bf16.mxu1 %vm309_vm1, %v6568_v18  ;;  %v307_v50 = vld [vmem:[%s6457_s8 + $0xf0] sm:$0xff]  ;;  %v5152_v52 = vld [vmem:[%s7959_s1 + $0xa] sm:$0x3]  ;;  %v6620_v63 = vpack.c.bf16 %v487_v49, %v486_v48  ;;  %v6682_v47 = vld [vmem:[%s7959_s1 + $0xe] sm:$0x3]  ;;  %3164 = vst.msk [vmem:[#allocation3 + $0xb8] sm:$0xff] %vm3085_vm2, %v7966_v5 }
  0x56   : > { %v437_v53 = vld [vmem:[#allocation2 + $0x167] sm:$0xff]  ;;  %v438_v54 = vld [vmem:[#allocation2 + $0x16f] sm:$0xff]  ;;  %413 = vst.msk [vmem:[#allocation2 + $0x208] sm:$0xff] %vm309_vm1, %v307_v50  ;;  %6059 = vmatprep.subr.msk.bf16.mxu1 %vm562_vm0, %v5152_v52  ;;  %v1920_v49 = vsel %vm562_vm0, %v5152_v52, 0  ;;  %s5007_s8 = sshll.u32 %s270_s29, 4  ;;  %s7919_s8 = int_to_ptr.vmem [resolvable:$true] %s5007_s8 }
  0x57   : > { %v488_v55 = vld [vmem:[#allocation2 + $0x188] sm:$0xff]  ;;  %v489_v60 = vld [vmem:[#allocation2 + $0x190] sm:$0xff]  ;;  %v6622_v0 = vpack.c.bf16 %v438_v54, %v437_v53  ;;  %3165 = vst.msk [vmem:[#allocation3 + $0xc0] sm:$0xff] %vm3085_vm2, %v7966_v5  ;;  %3166 = vst.msk [vmem:[#allocation3 + $0xc8] sm:$0xff] %vm3085_vm2, %v7966_v5  ;;  %s6129_s15 = scalar_lea.vmem %s7919_s8, 16  ;;  %p6136_p0 = scmp.lt.s32.totalorder %s7919_s8, %s6134_s17 }
  0x58   : > { %v439_v61 = vld [vmem:[#allocation2 + $0x187] sm:$0xff]  ;;  %v440_v62 = vld [vmem:[#allocation2 + $0x18f] sm:$0xff]  ;;  %v6624_v1 = vpack.c.bf16 %v489_v60, %v488_v55  ;;  %3167 = vst.msk [vmem:[#allocation3 + $0xd0] sm:$0xff] %vm3085_vm2, %v7966_v5  ;;  %3168 = vst.msk [vmem:[#allocation3 + $0xd8] sm:$0xff] %vm3085_vm2, %v7966_v5  ;;  %p6130_p11 = scmp.ne.s32.totalorder %s7919_s8, %s6129_s15  ;;  %p6137_p1 = scmp.lt.s32.totalorder %s6135_s18, %s6129_s15 }
  0x59   : > { %v6626_v2 = vpack.c.bf16 %v440_v62, %v439_v61  ;;  %v490_v3 = vld [vmem:[#allocation2 + $0x1a8] sm:$0xff]  ;;  %v491_v4 = vld [vmem:[#allocation2 + $0x1b0] sm:$0xff]  ;;  %3169 = vst.msk [vmem:[#allocation3 + $0xe0] sm:$0xff] %vm3085_vm2, %v7966_v5  ;;  %3170 = vst.msk [vmem:[#allocation3 + $0xe8] sm:$0xff] %vm3085_vm2, %v7966_v5 }
  0x5a   : > { %v441_v6 = vld [vmem:[#allocation2 + $0x1a7] sm:$0xff]  ;;  %v442_v7 = vld [vmem:[#allocation2 + $0x1af] sm:$0xff]  ;;  %v6636_v13 = vpack.c.bf16 %v491_v4, %v490_v3  ;;  %p6131_p12 = pnand %p6130_p11, %p6272_p5  ;;  %p6138_p2 = por %p6137_p1, %p6136_p0 }
  0x5b   : > { %5577 = vmatmul.mubr.msk.bf16.gmra.mxu0 %vm309_vm1, %v6580_v27  ;;  %v492_v8 = vld [vmem:[#allocation2 + $0x1c8] sm:$0xff]  ;;  %v493_v9 = vld [vmem:[#allocation2 + $0x1d0] sm:$0xff]  ;;  %v6638_v16 = vpack.c.bf16 %v442_v7, %v441_v6 }
  0x5c   : > { %5611 = vmatmul.mubr.msk.bf16.gmra.mxu1 %vm309_vm1, %v6582_v28  ;;  %5580 = vmatprep.mubr.msk.bf16.mxu0 %vm309_vm1, %v6584_v29  ;;  %v443_v11 = vld [vmem:[#allocation2 + $0x1c7] sm:$0xff]  ;;  %v444_v12 = vld [vmem:[#allocation2 + $0x1cf] sm:$0xff]  ;;  %v6640_v17 = vpack.c.bf16 %v493_v9, %v492_v8  ;;  %p6132_p13 = pneg %p6131_p12 }
  0x5d   : > { %5614 = vmatprep.mubr.msk.bf16.mxu1 %vm309_vm1, %v6586_v30  ;;  %v6642_v19 = vpack.c.bf16 %v444_v12, %v443_v11  ;;  %v494_v20 = vld [vmem:[#allocation2 + $0x1e8] sm:$0xff]  ;;  %v495_v21 = vld [vmem:[#allocation2 + $0x1f0] sm:$0xff] }
  0x5e   : > { %v939_v22 = vld [vmem:[#allocation2 + $0x9] sm:$0xff]  ;;  %v940_v25 = vld [vmem:[#allocation2 + $0x11] sm:$0xff]  ;;  %v6652_v26 = vpack.c.bf16 %v495_v21, %v494_v20  ;;  %p6139_p3 = pnand %p6138_p2, %p6132_p13 }
  0x5f   : > { %v445_v23 = vld [vmem:[#allocation2 + $0x1e7] sm:$0xff]  ;;  %v446_v24 = vld [vmem:[#allocation2 + $0x1ef] sm:$0xff]  ;;  %v971_v32 = vpack.c.bf16 %v940_v25, %v939_v22 }
  0x60   : > { %v6654_v31 = vpack.c.bf16 %v446_v24, %v445_v23  ;;  %v941_v33 = vld [vmem:[#allocation2 + $0x29] sm:$0xff]  ;;  %v942_v34 = vld [vmem:[#allocation2 + $0x31] sm:$0xff] }
  0x61   : > { %v943_v35 = vld [vmem:[#allocation2 + $0x49] sm:$0xff]  ;;  %v944_v37 = vld [vmem:[#allocation2 + $0x51] sm:$0xff]  ;;  %v6663_v38 = vpack.c.bf16 %v942_v34, %v941_v33 }
  0x62   : > { %v6667_v48 = vpack.c.bf16 %v944_v37, %v943_v35  ;;  %v6675_v50 = vld [vmem:[%s7959_s1 + $0xc] sm:$0x3]  ;;  %v946_v51 = vld [vmem:[#allocation2 + $0x71] sm:$0xff] }
  0x63   : > { %5581 = vmatmul.mubr.msk.bf16.gmra.mxu0 %vm309_vm1, %v6596_v40  ;;  %v947_v52 = vld [vmem:[#allocation2 + $0x89] sm:$0xff]  ;;  %v948_v53 = vld [vmem:[#allocation2 + $0x91] sm:$0xff] }
  0x64   : > { %5615 = vmatmul.mubr.msk.bf16.gmra.mxu1 %vm309_vm1, %v6598_v43  ;;  %5584 = vmatprep.mubr.msk.bf16.mxu0 %vm309_vm1, %v6600_v44  ;;  %v6694_v55 = vpack.c.bf16 %v948_v53, %v947_v52  ;;  %v949_v60 = vld [vmem:[#allocation2 + $0xa9] sm:$0xff]  ;;  %v950_v61 = vld [vmem:[#allocation2 + $0xb1] sm:$0xff] }
  0x65   : > { %5618 = vmatprep.mubr.msk.bf16.mxu1 %vm309_vm1, %v6602_v46  ;;  %v951_v62 = vld [vmem:[#allocation2 + $0xc9] sm:$0xff]  ;;  %v952_v3 = vld [vmem:[#allocation2 + $0xd1] sm:$0xff]  ;;  %v6704_v4 = vpack.c.bf16 %v950_v61, %v949_v60 }
  0x66   : > { %v6706_v6 = vpack.c.bf16 %v952_v3, %v951_v62  ;;  %v953_v7 = vld [vmem:[#allocation2 + $0xe9] sm:$0xff]  ;;  %v954_v8 = vld [vmem:[#allocation2 + $0xf1] sm:$0xff] }
  0x67   : > { %v955_v9 = vld [vmem:[#allocation2 + $0x109] sm:$0xff]  ;;  %v956_v11 = vld [vmem:[#allocation2 + $0x111] sm:$0xff]  ;;  %v6716_v12 = vpack.c.bf16 %v954_v8, %v953_v7 }
  0x68   : > { %v6718_v20 = vpack.c.bf16 %v956_v11, %v955_v9  ;;  %v957_v21 = vld [vmem:[#allocation2 + $0x129] sm:$0xff]  ;;  %v958_v22 = vld [vmem:[#allocation2 + $0x131] sm:$0xff] }
  0x69   : > { %v959_v23 = vld [vmem:[#allocation2 + $0x149] sm:$0xff]  ;;  %v960_v24 = vld [vmem:[#allocation2 + $0x151] sm:$0xff]  ;;  %v6728_v25 = vpack.c.bf16 %v958_v22, %v957_v21  ;;  %v2215_v21 = vsel %vm562_vm0, %v6675_v50, 0  ;;  %v2509_v22 = vsel %vm562_vm0, %v6682_v47, 0 }
  0x6a   : > { %v961_v33 = vld [vmem:[#allocation2 + $0x169] sm:$0xff]  ;;  %v962_v34 = vld [vmem:[#allocation2 + $0x171] sm:$0xff] }
  0x6b   : > { %5585 = vmatmul.mubr.msk.bf16.gmra.mxu0 %vm309_vm1, %v6620_v63  ;;  %v963_v35 = vld [vmem:[#allocation2 + $0x189] sm:$0xff]  ;;  %v964_v37 = vld [vmem:[#allocation2 + $0x191] sm:$0xff] }
  0x6c   : > { %5619 = vmatmul.mubr.msk.bf16.gmra.mxu1 %vm309_vm1, %v6622_v0  ;;  %5588 = vmatprep.mubr.msk.bf16.mxu0 %vm309_vm1, %v6624_v1  ;;  %v967_v52 = vld [vmem:[#allocation2 + $0x1c9] sm:$0xff]  ;;  %v968_v53 = vld [vmem:[#allocation2 + $0x1d1] sm:$0xff] }
  0x6d   : > { %5622 = vmatprep.mubr.msk.bf16.mxu1 %vm309_vm1, %v6626_v2  ;;  %v985_v61 = vpack.c.bf16 %v968_v53, %v967_v52  ;;  %v969_v62 = vld [vmem:[#allocation2 + $0x1e9] sm:$0xff]  ;;  %v970_v3 = vld [vmem:[#allocation2 + $0x1f1] sm:$0xff] }
  0x6e   : > { %v1263_v7 = vld [vmem:[#allocation2 + $0x207] sm:$0xff]  ;;  %v1264_v8 = vld [vmem:[#allocation2 + $0x20f] sm:$0xff]  ;;  %v986_v9 = vpack.c.bf16 %v970_v3, %v969_v62 }
  0x6f   : > { %v6749_v11 = vpack.c.bf16 %v1264_v8, %v1263_v7 }
  0x73   : > { %5589 = vmatmul.mubr.msk.bf16.gmra.mxu0 %vm309_vm1, %v6636_v13 }
  0x74   : > { %5623 = vmatmul.mubr.msk.bf16.gmra.mxu1 %vm309_vm1, %v6638_v16  ;;  %5592 = vmatprep.mubr.msk.bf16.mxu0 %vm309_vm1, %v6640_v17 }
  0x75   : > { %5626 = vmatprep.mubr.msk.bf16.mxu1 %vm309_vm1, %v6642_v19 }
  0x7b   : > { %5593 = vmatmul.mubr.msk.bf16.gmra.mxu0 %vm309_vm1, %v6652_v26 }
  0x7c   : > { %5627 = vmatmul.mubr.msk.bf16.gmra.mxu1 %vm309_vm1, %v6654_v31  ;;  %5632 = vmatprep.mubr.msk.bf16.mxu0 %vm309_vm1, %v971_v32  ;;  %v981_v32 = vpack.c.bf16 %v960_v24, %v959_v23  ;;  %v5203_v23 = vld [vmem:[%s7959_s1 + $0x10] sm:$0x3] }
  0x7d   : > { %5666 = vmatprep.mubr.msk.bf16.mxu1 %vm309_vm1, %v6505_v41  ;;  %v945_v41 = vld [vmem:[#allocation2 + $0x69] sm:$0xff] }
  0x7e   : > { %v6690_v54 = vpack.c.bf16 %v946_v51, %v945_v41  ;;  %v965_v41 = vld [vmem:[#allocation2 + $0x1a9] sm:$0xff]  ;;  %v966_v51 = vld [vmem:[#allocation2 + $0x1b1] sm:$0xff] }
  0x7f   : > { %v984_v60 = vpack.c.bf16 %v966_v51, %v965_v41 }
  0x83   : > { %5633 = vmatmul.mubr.msk.bf16.vlgmr.msra.gmra.mxu0 %vm309_vm1, %v6663_v38 }
  0x84   : > { %5699 = vmatpush3.bf16.msra.mxu0 %v1626_v39  ;;  %5667 = vmatmul.mubr.msk.bf16.vlgmr.msra.gmra.mxu1 %vm309_vm1, %v6511_v45  ;;  %v982_v39 = vpack.c.bf16 %v962_v34, %v961_v33  ;;  %v2803_v33 = vsel %vm562_vm0, %v5203_v23, 0 }
  0x85   : > { %5636 = vmatprep.mubr.msk.bf16.mxu0 %vm309_vm1, %v6667_v48  ;;  %5670 = vmatprep.mubr.msk.bf16.mxu1 %vm309_vm1, %v6530_v57 }
  0x86   : > { %5733 = vmatpush3.bf16.msra.mxu1 %v1920_v49  ;;  %6060 = vmatprep.subr.msk.bf16.mxu0 %vm562_vm0, %v6675_v50  ;;  %v983_v49 = vpack.c.bf16 %v964_v37, %v963_v35  ;;  %v1851_v50 = vld [vmem:[#allocation2 + $0x209] sm:$0xff] }
  0x87   : > { %6061 = vmatprep.subr.msk.bf16.mxu1 %vm562_vm0, %v6682_v47  ;;  %v1852_v47 = vld [vmem:[#allocation2 + $0x211] sm:$0xff] }
  0x8b   : > { %5637 = vmatmul.mubr.msk.bf16.gmra.mxu0 %vm309_vm1, %v6690_v54 }
  0x8c   : > { %5671 = vmatmul.mubr.msk.bf16.gmra.mxu1 %vm309_vm1, %v6534_v59  ;;  %5640 = vmatprep.mubr.msk.bf16.mxu0 %vm309_vm1, %v6694_v55 }
  0x8d   : > { %5674 = vmatprep.mubr.msk.bf16.mxu1 %vm309_vm1, %v6559_v14 }
  0x93   : > { %5641 = vmatmul.mubr.msk.bf16.gmra.mxu0 %vm309_vm1, %v6704_v4 }
  0x94   : > { %5675 = vmatmul.mubr.msk.bf16.gmra.mxu1 %vm309_vm1, %v6568_v18  ;;  %5644 = vmatprep.mubr.msk.bf16.mxu0 %vm309_vm1, %v6706_v6 }
  0x95   : > { %5678 = vmatprep.mubr.msk.bf16.mxu1 %vm309_vm1, %v6582_v28 }
  0x9b   : > { %5645 = vmatmul.mubr.msk.bf16.gmra.mxu0 %vm309_vm1, %v6716_v12 }
  0x9c   : > { %5679 = vmatmul.mubr.msk.bf16.gmra.mxu1 %vm309_vm1, %v6586_v30  ;;  %5648 = vmatprep.mubr.msk.bf16.mxu0 %vm309_vm1, %v6718_v20 }
  0x9d   : > { %5682 = vmatprep.mubr.msk.bf16.mxu1 %vm309_vm1, %v6598_v43 }
  0xa3   : > { %5649 = vmatmul.mubr.msk.bf16.gmra.mxu0 %vm309_vm1, %v6728_v25 }
  0xa4   : > { %5683 = vmatmul.mubr.msk.bf16.gmra.mxu1 %vm309_vm1, %v6602_v46  ;;  %5652 = vmatprep.mubr.msk.bf16.mxu0 %vm309_vm1, %v981_v32 }
  0xa5   : > { %5686 = vmatprep.mubr.msk.bf16.mxu1 %vm309_vm1, %v6622_v0 }
  0xab   : > { %5653 = vmatmul.mubr.msk.bf16.gmra.mxu0 %vm309_vm1, %v982_v39 }
  0xac   : > { %5687 = vmatmul.mubr.msk.bf16.gmra.mxu1 %vm309_vm1, %v6626_v2  ;;  %5656 = vmatprep.mubr.msk.bf16.mxu0 %vm309_vm1, %v983_v49 }
  0xad   : > { %5690 = vmatprep.mubr.msk.bf16.mxu1 %vm309_vm1, %v6638_v16 }
  0xb3   : > { %5657 = vmatmul.mubr.msk.bf16.gmra.mxu0 %vm309_vm1, %v984_v60 }
  0xb4   : > { %5691 = vmatmul.mubr.msk.bf16.gmra.mxu1 %vm309_vm1, %v6642_v19  ;;  %5660 = vmatprep.mubr.msk.bf16.mxu0 %vm309_vm1, %v985_v61 }
  0xb5   : > { %5694 = vmatprep.mubr.msk.bf16.mxu1 %vm309_vm1, %v6654_v31 }
  0xbb   : > { %5661 = vmatmul.mubr.msk.bf16.gmra.mxu0 %vm309_vm1, %v986_v9 }
  0xbc   : > { %5695 = vmatmul.mubr.msk.bf16.gmra.mxu1 %vm309_vm1, %v6749_v11  ;;  %5700 = vmatprep.mubr.msk.bf16.mxu0 %vm309_vm1, %v6501_v36  ;;  %v1557_v36 = vld [vmem:[#allocation2 + $0x208] sm:$0xff] }
  0xbd   : > { %5734 = vmatprep.mubr.msk.bf16.mxu1 %vm309_vm1, %v6663_v38  ;;  %v1558_v38 = vld [vmem:[#allocation2 + $0x210] sm:$0xff] }
  0xbe   : > { %v6816_v24 = vpack.c.bf16 %v1558_v38, %v1557_v36 }
  0xc3   : > { %5701 = vmatmul.mubr.msk.bf16.vlgmr.msra.gmra.mxu0 %vm309_vm1, %v6507_v42 }
  0xc4   : > { %5767 = vmatpush3.bf16.msra.mxu0 %v2215_v21  ;;  %5735 = vmatmul.mubr.msk.bf16.vlgmr.msra.gmra.mxu1 %vm309_vm1, %v6667_v48 }
  0xc5   : > { %5704 = vmatprep.mubr.msk.bf16.mxu0 %vm309_vm1, %v6528_v56  ;;  %5738 = vmatprep.mubr.msk.bf16.mxu1 %vm309_vm1, %v6690_v54 }
  0xc6   : > { %5801 = vmatpush3.bf16.msra.mxu1 %v2509_v22  ;;  %6062 = vmatprep.subr.msk.bf16.mxu0 %vm562_vm0, %v5203_v23 }
  0xcb   : > { %5705 = vmatmul.mubr.msk.bf16.gmra.mxu0 %vm309_vm1, %v6532_v58 }
  0xcc   : > { %5739 = vmatmul.mubr.msk.bf16.gmra.mxu1 %vm309_vm1, %v6694_v55  ;;  %5708 = vmatprep.mubr.msk.bf16.mxu0 %vm309_vm1, %v6551_v10 }
  0xcd   : > { %5742 = vmatprep.mubr.msk.bf16.mxu1 %vm309_vm1, %v6704_v4 }
  0xd3   : > { %5709 = vmatmul.mubr.msk.bf16.gmra.mxu0 %vm309_vm1, %v6561_v15 }
  0xd4   : > { %5743 = vmatmul.mubr.msk.bf16.gmra.mxu1 %vm309_vm1, %v6706_v6  ;;  %5712 = vmatprep.mubr.msk.bf16.mxu0 %vm309_vm1, %v6580_v27 }
  0xd5   : > { %5746 = vmatprep.mubr.msk.bf16.mxu1 %vm309_vm1, %v6716_v12 }
  0xdb   : > { %5713 = vmatmul.mubr.msk.bf16.gmra.mxu0 %vm309_vm1, %v6584_v29 }
  0xdc   : > { %5747 = vmatmul.mubr.msk.bf16.gmra.mxu1 %vm309_vm1, %v6718_v20  ;;  %5716 = vmatprep.mubr.msk.bf16.mxu0 %vm309_vm1, %v6596_v40 }
  0xdd   : > { %5750 = vmatprep.mubr.msk.bf16.mxu1 %vm309_vm1, %v6728_v25 }
  0xe3   : > { %5717 = vmatmul.mubr.msk.bf16.gmra.mxu0 %vm309_vm1, %v6600_v44 }
  0xe4   : > { %5751 = vmatmul.mubr.msk.bf16.gmra.mxu1 %vm309_vm1, %v981_v32  ;;  %5720 = vmatprep.mubr.msk.bf16.mxu0 %vm309_vm1, %v6620_v63  ;;  %v6818_v32 = vpack.c.bf16 %v1852_v47, %v1851_v50 }
  0xe5   : > { %5754 = vmatprep.mubr.msk.bf16.mxu1 %vm309_vm1, %v982_v39 }
  0xeb   : > { %5721 = vmatmul.mubr.msk.bf16.gmra.mxu0 %vm309_vm1, %v6624_v1 }
  0xec   : > { %5755 = vmatmul.mubr.msk.bf16.gmra.mxu1 %vm309_vm1, %v983_v49  ;;  %5724 = vmatprep.mubr.msk.bf16.mxu0 %vm309_vm1, %v6636_v13 }
  0xed   : > { %5758 = vmatprep.mubr.msk.bf16.mxu1 %vm309_vm1, %v984_v60 }
  0xf3   : > { %5725 = vmatmul.mubr.msk.bf16.gmra.mxu0 %vm309_vm1, %v6640_v17 }
  0xf4   : > { %5759 = vmatmul.mubr.msk.bf16.gmra.mxu1 %vm309_vm1, %v985_v61  ;;  %5728 = vmatprep.mubr.msk.bf16.mxu0 %vm309_vm1, %v6652_v26 }
  0xf5   : > { %5762 = vmatprep.mubr.msk.bf16.mxu1 %vm309_vm1, %v986_v9 }
  0xfb   : > { %5729 = vmatmul.mubr.msk.bf16.gmra.mxu0 %vm309_vm1, %v6816_v24 }
  0xfc   : > { %5763 = vmatmul.mubr.msk.bf16.gmra.mxu1 %vm309_vm1, %v6818_v32  ;;  %5768 = vmatprep.mubr.msk.bf16.mxu0 %vm309_vm1, %v6511_v45 }
  0xfd   : > { %5802 = vmatprep.mubr.msk.bf16.mxu1 %vm309_vm1, %v6507_v42 }
 0x103   : > { %v5566_v34 = vpop.f32.mrf.mxu0  ;;  %5769 = vmatmul.mubr.msk.bf16.vlgmr.msra.gmra.mxu0 %vm309_vm1, %v6530_v57 }
 0x104   : > { %v5600_v35 = vpop.f32.mrf.mxu1  ;;  %5835 = vmatpush3.bf16.msra.mxu0 %v2803_v33  ;;  %5803 = vmatmul.mubr.msk.bf16.vlgmr.msra.gmra.mxu1 %vm309_vm1, %v6528_v56 }
 0x105   : > { %v6833_v37 = vadd.f32 %v5600_v35, %v5566_v34  ;;  %v600_v39 = vpop.f32.mrf.mxu0  ;;  %5772 = vmatprep.mubr.msk.bf16.mxu0 %vm309_vm1, %v6534_v59  ;;  %5806 = vmatprep.mubr.msk.bf16.mxu1 %vm309_vm1, %v6532_v58 }
 0x106   : > { %v812_v42 = vpop.f32.mrf.mxu1 }
 0x107   : > { %v6839_v45 = vadd.f32 %v812_v42, %v600_v39  ;;  %v5567_v49 = vpop.f32.mrf.mxu0 }
 0x108   : > { %v5601_v41 = vpop.f32.mrf.mxu1 }
 0x109   : > { %v6841_v57 = vadd.f32 %v5601_v41, %v5567_v49  ;;  %v603_v51 = vpop.f32.mrf.mxu0 }
 0x10a   : > { %v815_v52 = vpop.f32.mrf.mxu1 }
 0x10b   : > { %v6843_v53 = vadd.f32 %v815_v52, %v603_v51  ;;  %v5570_v56 = vpop.f32.mrf.mxu0  ;;  %5773 = vmatmul.mubr.msk.bf16.gmra.mxu0 %vm309_vm1, %v6559_v14 }
 0x10c   : > { %v5604_v60 = vpop.f32.mrf.mxu1  ;;  %5807 = vmatmul.mubr.msk.bf16.gmra.mxu1 %vm309_vm1, %v6551_v10  ;;  %5776 = vmatprep.mubr.msk.bf16.mxu0 %vm309_vm1, %v6568_v18 }
 0x10d   : > { %v6851_v58 = vadd.f32 %v5604_v60, %v5570_v56  ;;  %v616_v59 = vpop.f32.mrf.mxu0  ;;  %5810 = vmatprep.mubr.msk.bf16.mxu1 %vm309_vm1, %v6561_v15 }
 0x10e   : > { %v828_v61 = vpop.f32.mrf.mxu1 }
 0x10f   : > { %v6855_v62 = vadd.f32 %v828_v61, %v616_v59  ;;  %v5571_v3 = vpop.f32.mrf.mxu0 }
 0x110   : > { %v5605_v7 = vpop.f32.mrf.mxu1 }
 0x111   : > { %v6857_v8 = vadd.f32 %v5605_v7, %v5571_v3  ;;  %v619_v14 = vpop.f32.mrf.mxu0 }
 0x112   : > { %v831_v9 = vpop.f32.mrf.mxu1 }
 0x113   : > { %v6859_v21 = vadd.f32 %v831_v9, %v619_v14  ;;  %v5574_v10 = vpop.f32.mrf.mxu0  ;;  %5777 = vmatmul.mubr.msk.bf16.gmra.mxu0 %vm309_vm1, %v6582_v28 }
 0x114   : > { %v5608_v18 = vpop.f32.mrf.mxu1  ;;  %5811 = vmatmul.mubr.msk.bf16.gmra.mxu1 %vm309_vm1, %v6580_v27  ;;  %5780 = vmatprep.mubr.msk.bf16.mxu0 %vm309_vm1, %v6586_v30 }
 0x115   : > { %v6867_v15 = vadd.f32 %v5608_v18, %v5574_v10  ;;  %v632_v22 = vpop.f32.mrf.mxu0  ;;  %5814 = vmatprep.mubr.msk.bf16.mxu1 %vm309_vm1, %v6584_v29 }
 0x116   : > { %v844_v23 = vpop.f32.mrf.mxu1 }
 0x117   : > { %v6871_v36 = vadd.f32 %v844_v23, %v632_v22  ;;  %v5575_v38 = vpop.f32.mrf.mxu0 }
 0x118   : > { %v5609_v50 = vpop.f32.mrf.mxu1 }
 0x119   : > { %v6873_v47 = vadd.f32 %v5609_v50, %v5575_v38  ;;  %v635_v28 = vpop.f32.mrf.mxu0 }
 0x11a   : > { %v847_v33 = vpop.f32.mrf.mxu1 }
 0x11b   : > { %v6875_v34 = vadd.f32 %v847_v33, %v635_v28  ;;  %v5578_v27 = vpop.f32.mrf.mxu0  ;;  %5781 = vmatmul.mubr.msk.bf16.gmra.mxu0 %vm309_vm1, %v6598_v43  ;;  %v2147_v33 = vld [vmem:[#allocation2 + $0x22f] sm:$0xff] }
 0x11c   : > { %v5612_v30 = vpop.f32.mrf.mxu1  ;;  %5815 = vmatmul.mubr.msk.bf16.gmra.mxu1 %vm309_vm1, %v6596_v40  ;;  %5784 = vmatprep.mubr.msk.bf16.mxu0 %vm309_vm1, %v6602_v46 }
 0x11d   : > { %v6883_v29 = vadd.f32 %v5612_v30, %v5578_v27  ;;  %v648_v35 = vpop.f32.mrf.mxu0  ;;  %5818 = vmatprep.mubr.msk.bf16.mxu1 %vm309_vm1, %v6600_v44 }
 0x11e   : > { %v860_v39 = vpop.f32.mrf.mxu1 }
 0x11f   : > { %v6887_v42 = vadd.f32 %v860_v39, %v648_v35  ;;  %v5579_v49 = vpop.f32.mrf.mxu0  ;;  %v2440_v35 = vld [vmem:[#allocation2 + $0x228] sm:$0xff]  ;;  %v2441_v39 = vld [vmem:[#allocation2 + $0x230] sm:$0xff] }
 0x120   : > { %v5613_v41 = vpop.f32.mrf.mxu1 }
 0x121   : > { %v6889_v51 = vadd.f32 %v5613_v41, %v5579_v49  ;;  %v651_v43 = vpop.f32.mrf.mxu0 }
 0x122   : > { %v863_v52 = vpop.f32.mrf.mxu1 }
 0x123   : > { %v6891_v56 = vadd.f32 %v863_v52, %v651_v43  ;;  %v5582_v40 = vpop.f32.mrf.mxu0  ;;  %5785 = vmatmul.mubr.msk.bf16.gmra.mxu0 %vm309_vm1, %v6622_v0 }
 0x124   : > { %v5616_v46 = vpop.f32.mrf.mxu1  ;;  %5819 = vmatmul.mubr.msk.bf16.gmra.mxu1 %vm309_vm1, %v6620_v63  ;;  %5788 = vmatprep.mubr.msk.bf16.mxu0 %vm309_vm1, %v6626_v2 }
 0x125   : > { %v6899_v44 = vadd.f32 %v5616_v46, %v5582_v40  ;;  %v664_v60 = vpop.f32.mrf.mxu0  ;;  %5822 = vmatprep.mubr.msk.bf16.mxu1 %vm309_vm1, %v6624_v1 }
 0x126   : > { %v876_v59 = vpop.f32.mrf.mxu1 }
 0x127   : > { %v6903_v61 = vadd.f32 %v876_v59, %v664_v60  ;;  %v5583_v3 = vpop.f32.mrf.mxu0 }
 0x128   : > { %v5617_v7 = vpop.f32.mrf.mxu1 }
 0x129   : > { %v6905_v14 = vadd.f32 %v5617_v7, %v5583_v3  ;;  %v6907_v0 = vpop.f32.mrf.mxu0 }
 0x12a   : > { %v6909_v9 = vpop.f32.mrf.mxu1 }
 0x12b   : > { %v5586_v63 = vpop.f32.mrf.mxu0  ;;  %5789 = vmatmul.mubr.msk.bf16.gmra.mxu0 %vm309_vm1, %v6638_v16 }
 0x12c   : > { %v5620_v2 = vpop.f32.mrf.mxu1  ;;  %5823 = vmatmul.mubr.msk.bf16.gmra.mxu1 %vm309_vm1, %v6636_v13  ;;  %5792 = vmatprep.mubr.msk.bf16.mxu0 %vm309_vm1, %v6642_v19 }
 0x12d   : > { %v6917_v1 = vadd.f32 %v5620_v2, %v5586_v63  ;;  %v680_v10 = vpop.f32.mrf.mxu0  ;;  %5826 = vmatprep.mubr.msk.bf16.mxu1 %vm309_vm1, %v6640_v17  ;;  %v2146_v17 = vld [vmem:[#allocation2 + $0x227] sm:$0xff] }
 0x12e   : > { %v892_v18 = vpop.f32.mrf.mxu1  ;;  %v2163_v43 = vpack.c.bf16 %v2147_v33, %v2146_v17 }
 0x12f   : > { %v6921_v22 = vadd.f32 %v892_v18, %v680_v10  ;;  %v5587_v23 = vpop.f32.mrf.mxu0 }
 0x130   : > { %v5621_v38 = vpop.f32.mrf.mxu1 }
 0x131   : > { %v6923_v50 = vadd.f32 %v5621_v38, %v5587_v23  ;;  %v6925_v16 = vpop.f32.mrf.mxu0 }
 0x132   : > { %7973 = vst [vmem:[#allocation9_spill] sm:$0xff] %v6925_v16  ;;  %v6927_v28 = vpop.f32.mrf.mxu1  ;;  %v7362_v16 = vld [vmem:[%s7961_s3 + $0x18] sm:$0xf] }
 0x133   : > { %7974 = vst [vmem:[#allocation10_spill] sm:$0xff] %v6927_v28  ;;  %v5590_v13 = vpop.f32.mrf.mxu0  ;;  %5793 = vmatmul.mubr.msk.bf16.gmra.mxu0 %vm309_vm1, %v6654_v31  ;;  %8033 = vst [vmem:[#allocation69_spill] sm:$0xff] %v7362_v16 }
 0x134   : > { %v5624_v19 = vpop.f32.mrf.mxu1  ;;  %5827 = vmatmul.mubr.msk.bf16.gmra.mxu1 %vm309_vm1, %v6652_v26  ;;  %5796 = vmatprep.mubr.msk.bf16.mxu0 %vm309_vm1, %v6749_v11  ;;  %v2457_v26 = vpack.c.bf16 %v2441_v39, %v2440_v35 }
 0x135   : > { %v6935_v27 = vadd.f32 %v5624_v19, %v5590_v13  ;;  %v696_v30 = vpop.f32.mrf.mxu0  ;;  %5830 = vmatprep.mubr.msk.bf16.mxu1 %vm309_vm1, %v6816_v24 }
 0x136   : > { %v908_v49 = vpop.f32.mrf.mxu1 }
 0x137   : > { %v6939_v41 = vadd.f32 %v908_v49, %v696_v30  ;;  %v5591_v31 = vpop.f32.mrf.mxu0 }
 0x138   : > { %v5625_v52 = vpop.f32.mrf.mxu1 }
 0x139   : > { %v6941_v40 = vadd.f32 %v5625_v52, %v5591_v31  ;;  %v6943_v11 = vpop.f32.mrf.mxu0 }
 0x13a   : > { %7975 = vst [vmem:[#allocation11_spill] sm:$0xff] %v6943_v11  ;;  %v6945_v46 = vpop.f32.mrf.mxu1 }
 0x13b   : > { %7976 = vst [vmem:[#allocation12_spill] sm:$0xff] %v6945_v46  ;;  %v5594_v60 = vpop.f32.mrf.mxu0  ;;  %5797 = vmatmul.mubr.msk.bf16.gmra.mxu0 %vm309_vm1, %v2163_v43 }
 0x13c   : > { %v5628_v59 = vpop.f32.mrf.mxu1  ;;  %5831 = vmatmul.mubr.msk.bf16.gmra.mxu1 %vm309_vm1, %v2457_v26  ;;  %5836 = vmatprep.mubr.msk.bf16.mxu0 %vm309_vm1, %v6667_v48 }
 0x13d   : > { %v6951_v24 = vadd.f32 %v5628_v59, %v5594_v60  ;;  %v712_v3 = vpop.f32.mrf.mxu0 }
 0x13e   : > { %v924_v7 = vpop.f32.mrf.mxu1 }
 0x13f   : > { %v6953_v63 = vadd.f32 %v924_v7, %v712_v3  ;;  %v5595_v2 = vpop.f32.mrf.mxu0 }
 0x140   : > { %v5629_v10 = vpop.f32.mrf.mxu1 }
 0x141   : > { %v6955_v18 = vadd.f32 %v5629_v10, %v5595_v2  ;;  %v6957_v23 = vpop.f32.mrf.mxu0 }
 0x142   : > { %7977 = vst [vmem:[#allocation13_spill] sm:$0xff] %v6957_v23  ;;  %v6959_v38 = vpop.f32.mrf.mxu1 }
 0x143   : > { %7978 = vst [vmem:[#allocation14_spill] sm:$0xff] %v6959_v38  ;;  %v5634_v13 = vpop.f32.mrf.mxu0  ;;  %5837 = vmatmul.mubr.msk.bf16.vlgmr.msra.gmra.mxu0 %vm309_vm1, %v6690_v54 }
 0x144   : > { %v1203_v48 = vadd.f32 %v5634_v13, %v6833_v37  ;;  %v5668_v19 = vpop.f32.mrf.mxu1  ;;  %5840 = vmatprep.mubr.msk.bf16.mxu0 %vm309_vm1, %v6694_v55 }
 0x145   : > { %v1074_v17 = vpop.f32.mrf.mxu0 }
 0x146   : > { %v1201_v33 = vadd.f32 %v1074_v17, %v6839_v45  ;;  %v6967_v30 = vadd.f32 %v5668_v19, %v1203_v48  ;;  %v1368_v35 = vpop.f32.mrf.mxu1 }
 0x147   : > { %v5635_v39 = vpop.f32.mrf.mxu0 }
 0x148   : > { %v1204_v49 = vadd.f32 %v5635_v39, %v6841_v57  ;;  %v6970_v31 = vadd.f32 %v1368_v35, %v1201_v33  ;;  %v5669_v43 = vpop.f32.mrf.mxu1  ;;  %v2720_v33 = vld [vmem:[#allocation2 + $0x149] sm:$0xff]  ;;  %v2721_v35 = vld [vmem:[#allocation2 + $0x151] sm:$0xff] }
 0x149   : > { %v1077_v52 = vpop.f32.mrf.mxu0 }
 0x14a   : > { %v6973_v54 = vadd.f32 %v1077_v52, %v6843_v53  ;;  %v6975_v37 = vadd.f32 %v5669_v43, %v1204_v49  ;;  %v6977_v26 = vpop.f32.mrf.mxu1 }
 0x14b   : > { %v5638_v55 = vpop.f32.mrf.mxu0  ;;  %5841 = vmatmul.mubr.msk.bf16.gmra.mxu0 %vm309_vm1, %v6704_v4 }
 0x14c   : > { %v1207_v45 = vadd.f32 %v5638_v55, %v6851_v58  ;;  %v5672_v60 = vpop.f32.mrf.mxu1  ;;  %5844 = vmatprep.mubr.msk.bf16.mxu0 %vm309_vm1, %v6706_v6 }
 0x14d   : > { %v1090_v57 = vpop.f32.mrf.mxu0 }
 0x14e   : > { %v1205_v59 = vadd.f32 %v1090_v57, %v6855_v62  ;;  %v6985_v3 = vadd.f32 %v5672_v60, %v1207_v45  ;;  %v1384_v53 = vpop.f32.mrf.mxu1  ;;  %v2744_v45 = vpack.c.bf16 %v2721_v35, %v2720_v33 }
 0x14f   : > { %v5639_v7 = vpop.f32.mrf.mxu0 }
 0x150   : > { %v1208_v2 = vadd.f32 %v5639_v7, %v6857_v8  ;;  %v6988_v10 = vadd.f32 %v1384_v53, %v1205_v59  ;;  %v5673_v13 = vpop.f32.mrf.mxu1  ;;  %v2723_v7 = vld [vmem:[#allocation2 + $0x171] sm:$0xff] }
 0x151   : > { %v1093_v48 = vpop.f32.mrf.mxu0 }
 0x152   : > { %v6991_v4 = vadd.f32 %v1093_v48, %v6859_v21  ;;  %v6993_v58 = vadd.f32 %v5673_v13, %v1208_v2  ;;  %v6995_v19 = vpop.f32.mrf.mxu1  ;;  %v2724_v13 = vld [vmem:[#allocation2 + $0x189] sm:$0xff]  ;;  %v2725_v48 = vld [vmem:[#allocation2 + $0x191] sm:$0xff] }
 0x153   : > { %v5642_v6 = vpop.f32.mrf.mxu0  ;;  %5845 = vmatmul.mubr.msk.bf16.gmra.mxu0 %vm309_vm1, %v6716_v12  ;;  %v2746_v35 = vpack.c.bf16 %v2725_v48, %v2724_v13 }
 0x154   : > { %v1211_v62 = vadd.f32 %v5642_v6, %v6867_v15  ;;  %v5676_v17 = vpop.f32.mrf.mxu1  ;;  %5848 = vmatprep.mubr.msk.bf16.mxu0 %vm309_vm1, %v6718_v20 }
 0x155   : > { %v1106_v8 = vpop.f32.mrf.mxu0 }
 0x156   : > { %v1209_v21 = vadd.f32 %v1106_v8, %v6871_v36  ;;  %v7003_v39 = vadd.f32 %v5676_v17, %v1211_v62  ;;  %v1400_v49 = vpop.f32.mrf.mxu1 }
 0x157   : > { %v5643_v43 = vpop.f32.mrf.mxu0 }
 0x158   : > { %v1212_v52 = vadd.f32 %v5643_v43, %v6873_v47  ;;  %v7006_v55 = vadd.f32 %v1400_v49, %v1209_v21  ;;  %v5677_v12 = vpop.f32.mrf.mxu1  ;;  %v2722_v47 = vld [vmem:[#allocation2 + $0x169] sm:$0xff] }
 0x159   : > { %v1109_v15 = vpop.f32.mrf.mxu0  ;;  %v2745_v8 = vpack.c.bf16 %v2723_v7, %v2722_v47 }
 0x15a   : > { %v7009_v60 = vadd.f32 %v1109_v15, %v6875_v34  ;;  %v7011_v20 = vadd.f32 %v5677_v12, %v1212_v52  ;;  %v7013_v57 = vpop.f32.mrf.mxu1  ;;  %v2727_v15 = vld [vmem:[#allocation2 + $0x1b1] sm:$0xff] }
 0x15b   : > { %v5646_v59 = vpop.f32.mrf.mxu0  ;;  %5849 = vmatmul.mubr.msk.bf16.gmra.mxu0 %vm309_vm1, %v6728_v25 }
 0x15c   : > { %v1215_v36 = vadd.f32 %v5646_v59, %v6883_v29  ;;  %v5680_v53 = vpop.f32.mrf.mxu1  ;;  %5852 = vmatprep.mubr.msk.bf16.mxu0 %vm309_vm1, %v2744_v45 }
 0x15d   : > { %v1122_v2 = vpop.f32.mrf.mxu0 }
 0x15e   : > { %v1213_v34 = vadd.f32 %v1122_v2, %v6887_v42  ;;  %v7020_v6 = vadd.f32 %v5680_v53, %v1215_v36  ;;  %v1416_v62 = vpop.f32.mrf.mxu1  ;;  %v2728_v36 = vld [vmem:[#allocation2 + $0x1c9] sm:$0xff]  ;;  %v2729_v53 = vld [vmem:[#allocation2 + $0x1d1] sm:$0xff] }
 0x15f   : > { %v5647_v17 = vpop.f32.mrf.mxu0 }
 0x160   : > { %v1216_v33 = vadd.f32 %v5647_v17, %v6889_v51  ;;  %v7023_v25 = vadd.f32 %v1416_v62, %v1213_v34  ;;  %v5681_v29 = vpop.f32.mrf.mxu1  ;;  %v2726_v51 = vld [vmem:[#allocation2 + $0x1a9] sm:$0xff]  ;;  %v2748_v62 = vpack.c.bf16 %v2729_v53, %v2728_v36 }
 0x161   : > { %v1125_v21 = vpop.f32.mrf.mxu0  ;;  %v2747_v13 = vpack.c.bf16 %v2727_v15, %v2726_v51 }
 0x162   : > { %v7026_v49 = vadd.f32 %v1125_v21, %v6891_v56  ;;  %v7028_v43 = vadd.f32 %v5681_v29, %v1216_v33  ;;  %v7030_v52 = vpop.f32.mrf.mxu1  ;;  %v2730_v21 = vld [vmem:[#allocation2 + $0x1e9] sm:$0xff] }
 0x163   : > { %7979 = vst [vmem:[#allocation15_spill] sm:$0xff] %v7030_v52  ;;  %v5650_v42 = vpop.f32.mrf.mxu0  ;;  %5853 = vmatmul.mubr.msk.bf16.gmra.mxu0 %vm309_vm1, %v2745_v8 }
 0x164   : > { %v1219_v12 = vadd.f32 %v5650_v42, %v6899_v44  ;;  %v5684_v45 = vpop.f32.mrf.mxu1  ;;  %5856 = vmatprep.mubr.msk.bf16.mxu0 %vm309_vm1, %v2746_v35 }
 0x165   : > { %v1138_v59 = vpop.f32.mrf.mxu0 }
 0x166   : > { %v1217_v56 = vadd.f32 %v1138_v59, %v6903_v61  ;;  %v7036_v47 = vadd.f32 %v5684_v45, %v1219_v12  ;;  %v1432_v7 = vpop.f32.mrf.mxu1 }
 0x167   : > { %v5651_v2 = vpop.f32.mrf.mxu0 }
 0x168   : > { %v1220_v48 = vadd.f32 %v5651_v2, %v6905_v14  ;;  %v7039_v34 = vadd.f32 %v1432_v7, %v1217_v56  ;;  %v5685_v44 = vpop.f32.mrf.mxu1  ;;  %v2731_v14 = vld [vmem:[#allocation2 + $0x1f1] sm:$0xff] }
 0x169   : > { %v7041_v17 = vpop.f32.mrf.mxu0  ;;  %v2749_v59 = vpack.c.bf16 %v2731_v14, %v2730_v21 }
 0x16a   : > { %7980 = vst [vmem:[#allocation16_spill] sm:$0xff] %v7041_v17  ;;  %v7043_v8 = vadd.f32 %v5685_v44, %v1220_v48  ;;  %v7045_v33 = vpop.f32.mrf.mxu1  ;;  %v2734_v44 = vld [vmem:[#allocation2 + $0x229] sm:$0xff] }
 0x16b   : > { %7981 = vst [vmem:[#allocation17_spill] sm:$0xff] %v7045_v33  ;;  %v5654_v29 = vpop.f32.mrf.mxu0  ;;  %5857 = vmatmul.mubr.msk.bf16.gmra.mxu0 %vm309_vm1, %v2747_v13 }
 0x16c   : > { %v1223_v61 = vadd.f32 %v5654_v29, %v6917_v1  ;;  %v5688_v35 = vpop.f32.mrf.mxu1  ;;  %5860 = vmatprep.mubr.msk.bf16.mxu0 %vm309_vm1, %v2748_v62 }
 0x16d   : > { %v1154_v42 = vpop.f32.mrf.mxu0 }
 0x16e   : > { %v1221_v12 = vadd.f32 %v1154_v42, %v6921_v22  ;;  %v7051_v45 = vadd.f32 %v5688_v35, %v1223_v61  ;;  %v1448_v51 = vpop.f32.mrf.mxu1 }
 0x16f   : > { %v5655_v15 = vpop.f32.mrf.mxu0 }
 0x170   : > { %v1224_v36 = vadd.f32 %v5655_v15, %v6923_v50  ;;  %v7054_v53 = vadd.f32 %v1448_v51, %v1221_v12  ;;  %v5689_v56 = vpop.f32.mrf.mxu1  ;;  %v2735_v50 = vld [vmem:[#allocation2 + $0x231] sm:$0xff] }
 0x171   : > { %v7056_v7 = vpop.f32.mrf.mxu0  ;;  %v2751_v14 = vpack.c.bf16 %v2735_v50, %v2734_v44 }
 0x172   : > { %7982 = vst [vmem:[#allocation18_spill] sm:$0xff] %v7056_v7  ;;  %v7058_v1 = vadd.f32 %v5689_v56, %v1224_v36  ;;  %v7060_v2 = vpop.f32.mrf.mxu1 }
 0x173   : > { %7983 = vst [vmem:[#allocation19_spill] sm:$0xff] %v7060_v2  ;;  %v5658_v13 = vpop.f32.mrf.mxu0  ;;  %5861 = vmatmul.mubr.msk.bf16.gmra.mxu0 %vm309_vm1, %v2749_v59 }
 0x174   : > { %v1227_v22 = vadd.f32 %v5658_v13, %v6935_v27  ;;  %v5692_v48 = vpop.f32.mrf.mxu1  ;;  %5864 = vmatprep.mubr.msk.bf16.mxu0 %vm309_vm1, %v6818_v32 }
 0x175   : > { %v1170_v62 = vpop.f32.mrf.mxu0 }
 0x176   : > { %v1225_v29 = vadd.f32 %v1170_v62, %v6939_v41  ;;  %v7067_v61 = vadd.f32 %v5692_v48, %v1227_v22  ;;  %v1464_v35 = vpop.f32.mrf.mxu1 }
 0x177   : > { %v5659_v21 = vpop.f32.mrf.mxu0 }
 0x178   : > { %v1228_v42 = vadd.f32 %v5659_v21, %v6941_v40  ;;  %v7070_v12 = vadd.f32 %v1464_v35, %v1225_v29  ;;  %v5693_v51 = vpop.f32.mrf.mxu1 }
 0x179   : > { %v7072_v27 = vpop.f32.mrf.mxu0 }
 0x17a   : > { %7984 = vst [vmem:[#allocation20_spill] sm:$0xff] %v7072_v27  ;;  %v7074_v15 = vadd.f32 %v5693_v51, %v1228_v42  ;;  %v7076_v32 = vpop.f32.mrf.mxu1 }
 0x17b   : > { %7985 = vst [vmem:[#allocation21_spill] sm:$0xff] %v7076_v32  ;;  %v5662_v59 = vpop.f32.mrf.mxu0  ;;  %5865 = vmatmul.mubr.msk.bf16.gmra.mxu0 %vm309_vm1, %v2751_v14 }
 0x17c   : > { %v1231_v41 = vadd.f32 %v5662_v59, %v6951_v24  ;;  %v5696_v36 = vpop.f32.mrf.mxu1 }
 0x17d   : > { %v1186_v56 = vpop.f32.mrf.mxu0 }
 0x17e   : > { %v1229_v13 = vadd.f32 %v1186_v56, %v6953_v63  ;;  %v7081_v22 = vadd.f32 %v5696_v36, %v1231_v41  ;;  %v1480_v40 = vpop.f32.mrf.mxu1 }
 0x17f   : > { %v5663_v48 = vpop.f32.mrf.mxu0 }
 0x180   : > { %v1232_v44 = vadd.f32 %v5663_v48, %v6955_v18  ;;  %v7084_v50 = vadd.f32 %v1480_v40, %v1229_v13  ;;  %v5697_v62 = vpop.f32.mrf.mxu1 }
 0x181   : > { %v7086_v29 = vpop.f32.mrf.mxu0 }
 0x182   : > { %7986 = vst [vmem:[#allocation22_spill] sm:$0xff] %v7086_v29  ;;  %v7088_v35 = vadd.f32 %v5697_v62, %v1232_v44  ;;  %v7090_v21 = vpop.f32.mrf.mxu1 }
 0x183   : > { %7987 = vst [vmem:[#allocation23_spill] sm:$0xff] %v7090_v21  ;;  %v5702_v24 = vpop.f32.mrf.mxu0 }
 0x184   : > { %v7093_v14 = vadd.f32 %v5702_v24, %v6967_v30  ;;  %v7095_v63 = vpop.f32.mrf.mxu1 }
 0x185   : > { %v1662_v42 = vpop.f32.mrf.mxu0 }
 0x186   : > { %v7098_v51 = vadd.f32 %v1662_v42, %v6970_v31  ;;  %v7100_v18 = vpop.f32.mrf.mxu1 }
 0x187   : > { %v5703_v59 = vpop.f32.mrf.mxu0 }
 0x188   : > { %v7103_v41 = vadd.f32 %v5703_v59, %v6975_v37  ;;  %v7105_v36 = vpop.f32.mrf.mxu1 }
 0x189   : > { %v7107_v56 = vpop.f32.mrf.mxu0 }
 0x18a   : > { %v7109_v13 = vpop.f32.mrf.mxu1 }
 0x18b   : > { %v5706_v30 = vpop.f32.mrf.mxu0 }
 0x18c   : > { %v7112_v40 = vadd.f32 %v5706_v30, %v6985_v3  ;;  %v7114_v48 = vpop.f32.mrf.mxu1 }
 0x18d   : > { %v1678_v31 = vpop.f32.mrf.mxu0 }
 0x18e   : > { %v7177_v37 = vadd.f32 %v1678_v31, %v6988_v10  ;;  %v7179_v3 = vpop.f32.mrf.mxu1 }
 0x18f   : > { %v5707_v44 = vpop.f32.mrf.mxu0 }
 0x190   : > { %v7182_v62 = vadd.f32 %v5707_v44, %v6993_v58  ;;  %v7184_v24 = vpop.f32.mrf.mxu1 }
 0x191   : > { %v7186_v42 = vpop.f32.mrf.mxu0 }
 0x192   : > { %v7188_v59 = vpop.f32.mrf.mxu1 }
 0x193   : > { %v5710_v30 = vpop.f32.mrf.mxu0 }
 0x194   : > { %v7191_v21 = vadd.f32 %v5710_v30, %v7003_v39  ;;  %v7193_v5 = vpop.f32.mrf.mxu1 }
 0x195   : > { %v1694_v10 = vpop.f32.mrf.mxu0 }
 0x196   : > { %v7196_v31 = vadd.f32 %v1694_v10, %v7006_v55  ;;  %v7198_v29 = vpop.f32.mrf.mxu1  ;;  %v5221_v55 = vld [vmem:[%s7961_s3 + $0x4] sm:$0xf] }
 0x197   : > { %v5711_v58 = vpop.f32.mrf.mxu0  ;;  %6063 = vmatprep.subr.msk.bf16.mxu1 %vm3219_vm3, %v5221_v55 }
 0x198   : > { %v7201_v44 = vadd.f32 %v5711_v58, %v7011_v20  ;;  %v7203_v32 = vpop.f32.mrf.mxu1  ;;  %v3221_v20 = vsel %vm3219_vm3, %v5221_v55, 0 }
 0x199   : > { %v7205_v38 = vpop.f32.mrf.mxu0  ;;  %5869 = vmatpush3.bf16.msra.mxu1 %v3221_v20 }
 0x19a   : > { %v7207_v23 = vpop.f32.mrf.mxu1 }
 0x19b   : > { %v5714_v39 = vpop.f32.mrf.mxu0 }
 0x19c   : > { %v7210_v30 = vadd.f32 %v5714_v39, %v7020_v6  ;;  %v7212_v27 = vpop.f32.mrf.mxu1 }
 0x19d   : > { %7989 = vst [vmem:[#allocation25_spill] sm:$0xff] %v7212_v27  ;;  %v1710_v10 = vpop.f32.mrf.mxu0 }
 0x19e   : > { %7988 = vst [vmem:[#allocation24_spill] sm:$0xff] %v7210_v30  ;;  %v7220_v58 = vadd.f32 %v1710_v10, %v7023_v25  ;;  %v7222_v2 = vpop.f32.mrf.mxu1 }
 0x19f   : > { %7991 = vst [vmem:[#allocation27_spill] sm:$0xff] %v7222_v2  ;;  %v5715_v6 = vpop.f32.mrf.mxu0 }
 0x1a0   : > { %7990 = vst [vmem:[#allocation26_spill] sm:$0xff] %v7220_v58  ;;  %v7225_v39 = vadd.f32 %v5715_v6, %v7028_v43  ;;  %v7227_v46 = vpop.f32.mrf.mxu1 }
 0x1a1   : > { %7993 = vst [vmem:[#allocation29_spill] sm:$0xff] %v7227_v46  ;;  %v7229_v11 = vpop.f32.mrf.mxu0 }
 0x1a2   : > { %7992 = vst [vmem:[#allocation28_spill] sm:$0xff] %v7225_v39  ;;  %7994 = vst [vmem:[#allocation30_spill] sm:$0xff] %v7229_v11  ;;  %v7231_v7 = vpop.f32.mrf.mxu1 }
 0x1a3   : > { %7995 = vst [vmem:[#allocation31_spill] sm:$0xff] %v7231_v7  ;;  %v5718_v33 = vpop.f32.mrf.mxu0 }
 0x1a4   : > { %v7234_v17 = vadd.f32 %v5718_v33, %v7036_v47  ;;  %v7236_v55 = vpop.f32.mrf.mxu1 }
 0x1a5   : > { %7997 = vst [vmem:[#allocation33_spill] sm:$0xff] %v7236_v55  ;;  %v1726_v25 = vpop.f32.mrf.mxu0 }
 0x1a6   : > { %7996 = vst [vmem:[#allocation32_spill] sm:$0xff] %v7234_v17  ;;  %v7239_v10 = vadd.f32 %v1726_v25, %v7039_v34  ;;  %v7241_v20 = vpop.f32.mrf.mxu1 }
 0x1a7   : > { %7999 = vst [vmem:[#allocation35_spill] sm:$0xff] %v7241_v20  ;;  %v5719_v43 = vpop.f32.mrf.mxu0 }
 0x1a8   : > { %7998 = vst [vmem:[#allocation34_spill] sm:$0xff] %v7239_v10  ;;  %v7244_v6 = vadd.f32 %v5719_v43, %v7043_v8  ;;  %v7246_v46 = vpop.f32.mrf.mxu1 }
 0x1a9   : > { %8001 = vst [vmem:[#allocation37_spill] sm:$0xff] %v7246_v46  ;;  %v7248_v39 = vpop.f32.mrf.mxu0 }
 0x1aa   : > { %8000 = vst [vmem:[#allocation36_spill] sm:$0xff] %v7244_v6  ;;  %8002 = vst [vmem:[#allocation38_spill] sm:$0xff] %v7248_v39  ;;  %v7250_v7 = vpop.f32.mrf.mxu1 }
 0x1ab   : > { %8003 = vst [vmem:[#allocation39_spill] sm:$0xff] %v7250_v7  ;;  %v5722_v47 = vpop.f32.mrf.mxu0 }
 0x1ac   : > { %v7253_v33 = vadd.f32 %v5722_v47, %v7051_v45  ;;  %v7255_v55 = vpop.f32.mrf.mxu1 }
 0x1ad   : > { %8005 = vst [vmem:[#allocation41_spill] sm:$0xff] %v7255_v55  ;;  %v1742_v34 = vpop.f32.mrf.mxu0 }
 0x1ae   : > { %8004 = vst [vmem:[#allocation40_spill] sm:$0xff] %v7253_v33  ;;  %v7258_v25 = vadd.f32 %v1742_v34, %v7054_v53  ;;  %v7260_v20 = vpop.f32.mrf.mxu1 }
 0x1af   : > { %8007 = vst [vmem:[#allocation43_spill] sm:$0xff] %v7260_v20  ;;  %v5723_v8 = vpop.f32.mrf.mxu0 }
 0x1b0   : > { %8006 = vst [vmem:[#allocation42_spill] sm:$0xff] %v7258_v25  ;;  %v7263_v43 = vadd.f32 %v5723_v8, %v7058_v1  ;;  %v7265_v46 = vpop.f32.mrf.mxu1 }
 0x1b1   : > { %8009 = vst [vmem:[#allocation45_spill] sm:$0xff] %v7265_v46  ;;  %v7267_v6 = vpop.f32.mrf.mxu0 }
 0x1b2   : > { %8008 = vst [vmem:[#allocation44_spill] sm:$0xff] %v7263_v43  ;;  %8010 = vst [vmem:[#allocation46_spill] sm:$0xff] %v7267_v6  ;;  %v7269_v7 = vpop.f32.mrf.mxu1 }
 0x1b3   : > { %8011 = vst [vmem:[#allocation47_spill] sm:$0xff] %v7269_v7  ;;  %v5726_v45 = vpop.f32.mrf.mxu0 }
 0x1b4   : > { %v7272_v47 = vadd.f32 %v5726_v45, %v7067_v61  ;;  %v7274_v55 = vpop.f32.mrf.mxu1  ;;  %v5240_v61 = vld [vmem:[%s7961_s3 + $0x10] sm:$0xf] }
 0x1b5   : > { %8013 = vst [vmem:[#allocation49_spill] sm:$0xff] %v7274_v55  ;;  %v1758_v53 = vpop.f32.mrf.mxu0  ;;  %6067 = vmatprep.subr.msk.bf16.mxu0 %vm3219_vm3, %v5240_v61 }
 0x1b6   : > { %8012 = vst [vmem:[#allocation48_spill] sm:$0xff] %v7272_v47  ;;  %v7277_v34 = vadd.f32 %v1758_v53, %v7070_v12  ;;  %v7279_v20 = vpop.f32.mrf.mxu1  ;;  %v3599_v12 = vsel %vm3219_vm3, %v5240_v61, 0 }
 0x1b7   : > { %8015 = vst [vmem:[#allocation51_spill] sm:$0xff] %v7279_v20  ;;  %v5727_v1 = vpop.f32.mrf.mxu0  ;;  %5909 = vmatpush3.bf16.msra.mxu0 %v3599_v12 }
 0x1b8   : > { %8014 = vst [vmem:[#allocation50_spill] sm:$0xff] %v7277_v34  ;;  %v7282_v8 = vadd.f32 %v5727_v1, %v7074_v15  ;;  %v7284_v46 = vpop.f32.mrf.mxu1  ;;  %6069 = vmatprep.subr.msk.bf16.mxu0 %vm3219_vm3, %v7362_v16 }
 0x1b9   : > { %8017 = vst [vmem:[#allocation53_spill] sm:$0xff] %v7284_v46  ;;  %v7286_v43 = vpop.f32.mrf.mxu0 }
 0x1ba   : > { %8016 = vst [vmem:[#allocation52_spill] sm:$0xff] %v7282_v8  ;;  %8018 = vst [vmem:[#allocation54_spill] sm:$0xff] %v7286_v43  ;;  %v7288_v7 = vpop.f32.mrf.mxu1 }
 0x1bb   : > { %8019 = vst [vmem:[#allocation55_spill] sm:$0xff] %v7288_v7  ;;  %v5730_v45 = vpop.f32.mrf.mxu0 }
 0x1bc   : > { %v7296_v53 = vadd.f32 %v5730_v45, %v7081_v22  ;;  %v7298_v15 = vpop.f32.mrf.mxu1 }
 0x1bd   : > { %8021 = vst [vmem:[#allocation57_spill] sm:$0xff] %v7298_v15  ;;  %v1774_v1 = vpop.f32.mrf.mxu0 }
 0x1be   : > { %8020 = vst [vmem:[#allocation56_spill] sm:$0xff] %v7296_v53  ;;  %v7301_v46 = vadd.f32 %v1774_v1, %v7084_v50  ;;  %v7303_v7 = vpop.f32.mrf.mxu1 }
 0x1bf   : > { %8023 = vst [vmem:[#allocation59_spill] sm:$0xff] %v7303_v7  ;;  %v5731_v8 = vpop.f32.mrf.mxu0 }
 0x1c0   : > { %8022 = vst [vmem:[#allocation58_spill] sm:$0xff] %v7301_v46  ;;  %v7306_v43 = vadd.f32 %v5731_v8, %v7088_v35  ;;  %v7308_v20 = vpop.f32.mrf.mxu1  ;;  %v7337_v46 = vld [vmem:[%s7961_s3] sm:$0xf] }
 0x1c1   : > { %8025 = vst [vmem:[#allocation61_spill] sm:$0xff] %v7308_v20  ;;  %v7310_v34 = vpop.f32.mrf.mxu0  ;;  %8028 = vst [vmem:[#allocation64_spill] sm:$0xff] %v7337_v46  ;;  %6064 = vmatprep.subr.msk.bf16.mxu1 %vm3219_vm3, %v7337_v46 }
 0x1c2   : > { %8024 = vst [vmem:[#allocation60_spill] sm:$0xff] %v7306_v43  ;;  %8026 = vst [vmem:[#allocation62_spill] sm:$0xff] %v7310_v34  ;;  %v7312_v61 = vpop.f32.mrf.mxu1 }
 0x1c3   : > { %8027 = vst [vmem:[#allocation63_spill] sm:$0xff] %v7312_v61  ;;  %v5770_v22 = vpop.f32.mrf.mxu0 }
 0x1c4   : > { %v5804_v45 = vpop.f32.mrf.mxu1 }
 0x1c5   : > { %v2251_v15 = vpop.f32.mrf.mxu0 }
 0x1c6   : > { %v7314_v12 = vpop.f32.mrf.mxu1 }
 0x1c7   : > { %v5771_v53 = vpop.f32.mrf.mxu0 }
 0x1c8   : > { %v7318_v1 = vpop.f32.mrf.mxu1 }
 0x1c9   : > { %v7316_v50 = vpop.f32.mrf.mxu0 }
 0x1ca   : > { %v7322_v35 = vpop.f32.mrf.mxu1 }
 0x1cb   : > { %v7320_v7 = vpop.f32.mrf.mxu0 }
 0x1cc   : > { %v7328_v43 = vpop.f32.mrf.mxu1 }
 0x1cd   : > { %v7324_v8 = vpop.f32.mrf.mxu0 }
 0x1ce   : > { %v7339_v55 = vpop.f32.mrf.mxu1 }
 0x1cf   : > { %v7326_v20 = vpop.f32.mrf.mxu0 }
 0x1d0   : > { %v7347_v25 = vpop.f32.mrf.mxu1 }
 0x1d1   : > { %v7330_v61 = vpop.f32.mrf.mxu0 }
 0x1d2   : > { %v7353_v10 = vpop.f32.mrf.mxu1 }
 0x1d3   : > { %v7332_v34 = vpop.f32.mrf.mxu0 }
 0x1d4   : > { %v7364_v46 = vpop.f32.mrf.mxu1 }
 0x1d5   : > { %v7341_v47 = vpop.f32.mrf.mxu0 }
 0x1d7   : > { %v7345_v6 = vpop.f32.mrf.mxu0 }
 0x1d9   : > { %v7349_v33 = vpop.f32.mrf.mxu0 }
 0x1da   : > { %8029 = vst [vmem:[#allocation65_spill] sm:$0xff] %v7349_v33 }
 0x1db   : > { %v7351_v39 = vpop.f32.mrf.mxu0 }
 0x1dc   : > { %8030 = vst [vmem:[#allocation66_spill] sm:$0xff] %v7351_v39  ;;  %v7372_v39 = vpop.f32.mrf.mxu1 }
 0x1dd   : > { %v7355_v17 = vpop.f32.mrf.mxu0  ;;  %8036 = vst [vmem:[#allocation72_spill] sm:$0xff] %v7372_v39 }
 0x1de   : > { %8031 = vst [vmem:[#allocation67_spill] sm:$0xff] %v7355_v17 }
 0x1df   : > { %v7357_v28 = vpop.f32.mrf.mxu0 }
 0x1e0   : > { %8032 = vst [vmem:[#allocation68_spill] sm:$0xff] %v7357_v28  ;;  %v7378_v28 = vpop.f32.mrf.mxu1 }
 0x1e1   : > { %v7366_v11 = vpop.f32.mrf.mxu0  ;;  %8039 = vst [vmem:[#allocation75_spill] sm:$0xff] %v7378_v28 }
 0x1e2   : > { %8034 = vst [vmem:[#allocation70_spill] sm:$0xff] %v7366_v11  ;;  %v7384_v30 = vpop.f32.mrf.mxu1 }
 0x1e3   : > { %v7370_v2 = vpop.f32.mrf.mxu0  ;;  %8042 = vst [vmem:[#allocation78_spill] sm:$0xff] %v7384_v30 }
 0x1e4   : > { %8035 = vst [vmem:[#allocation71_spill] sm:$0xff] %v7370_v2  ;;  %v7390_v16 = vpop.f32.mrf.mxu1 }
 0x1e5   : > { %v7374_v58 = vpop.f32.mrf.mxu0 }
 0x1e6   : > { %8037 = vst [vmem:[#allocation73_spill] sm:$0xff] %v7374_v58  ;;  %v7396_v58 = vpop.f32.mrf.mxu1 }
 0x1e7   : > { %v7376_v17 = vpop.f32.mrf.mxu0  ;;  %8047 = vst [vmem:[#allocation83_spill] sm:$0xff] %v7396_v58 }
 0x1e8   : > { %8038 = vst [vmem:[#allocation74_spill] sm:$0xff] %v7376_v17 }
 0x1e9   : > { %v7380_v33 = vpop.f32.mrf.mxu0 }
 0x1ea   : > { %8040 = vst [vmem:[#allocation76_spill] sm:$0xff] %v7380_v33  ;;  %v7402_v33 = vpop.f32.mrf.mxu1 }
 0x1eb   : > { %v7382_v27 = vpop.f32.mrf.mxu0  ;;  %8050 = vst [vmem:[#allocation86_spill] sm:$0xff] %v7402_v33 }
 0x1ec   : > { %8041 = vst [vmem:[#allocation77_spill] sm:$0xff] %v7382_v27 }
 0x1ed   : > { %v7386_v11 = vpop.f32.mrf.mxu0 }
 0x1ee   : > { %8043 = vst [vmem:[#allocation79_spill] sm:$0xff] %v7386_v11  ;;  %v7412_v11 = vpop.f32.mrf.mxu1 }
 0x1ef   : > { %v7388_v52 = vpop.f32.mrf.mxu0 }
 0x1f0   : > { %8044 = vst [vmem:[#allocation80_spill] sm:$0xff] %v7388_v52  ;;  %v1496_v52 = vadd.f32 %v6977_v26, %v6973_v54  ;;  %v7423_v54 = vpop.f32.mrf.mxu1 }
 0x1f1   : > { %v7392_v2 = vpop.f32.mrf.mxu0 }
 0x1f2   : > { %8045 = vst [vmem:[#allocation81_spill] sm:$0xff] %v7392_v2  ;;  %v2085_v2 = vadd.f32 %v7095_v63, %v7093_v14 }
 0x1f3   : > { %v7394_v39 = vpop.f32.mrf.mxu0 }
 0x1f4   : > { %8046 = vst [vmem:[#allocation82_spill] sm:$0xff] %v7394_v39  ;;  %v2380_v33 = vadd.f32 %v5770_v22, %v2085_v2 }
 0x1f5   : > { %v7398_v17 = vpop.f32.mrf.mxu0 }
 0x1f6   : > { %8048 = vst [vmem:[#allocation84_spill] sm:$0xff] %v7398_v17  ;;  %v2083_v17 = vadd.f32 %v7100_v18, %v7098_v51  ;;  %v2674_v63 = vadd.f32 %v5804_v45, %v2380_v33  ;;  %v1500_v51 = vadd.f32 %v6995_v19, %v6991_v4  ;;  %v7435_v18 = vld [vmem:[%s7960_s2] ss:$0 sm:$0xff]  ;;  %v7443_v19 = vpop.f32.mrf.mxu1 }
 0x1f7   : > { %v7400_v28 = vpop.f32.mrf.mxu0 }
 0x1f8   : > { %8049 = vst [vmem:[#allocation85_spill] sm:$0xff] %v7400_v28  ;;  %v1790_v28 = vadd.f32 %v7107_v56, %v1496_v52  ;;  %v2089_v52 = vadd.f32 %v7114_v48, %v7112_v40  ;;  %v1794_v56 = vadd.f32 %v7186_v42, %v1500_v51  ;;  %v7455_v22 = vpop.f32.mrf.mxu1  ;;  %v2091_v51 = vadd.f32 %v7198_v29, %v7196_v31 }
 0x1f9   : > { %v7404_v27 = vpop.f32.mrf.mxu0 }
 0x1fa   : > { %8051 = vst [vmem:[#allocation87_spill] sm:$0xff] %v7404_v27  ;;  %v2378_v27 = vadd.f32 %v2251_v15, %v2083_v17  ;;  %v2084_v14 = vadd.f32 %v7109_v13, %v1790_v28  ;;  %v2087_v28 = vadd.f32 %v7179_v3, %v7177_v37  ;;  %v2384_v4 = vadd.f32 %v7320_v7, %v2089_v52 }
 0x1fb   : > { %v7406_v30 = vpop.f32.mrf.mxu0  ;;  %v2088_v7 = vadd.f32 %v7188_v59, %v1794_v56  ;;  %v2386_v29 = vadd.f32 %v7341_v47, %v2091_v51  ;;  %v8065_v51 = vld [vmem:[#allocation10_spill] sm:$0xff] }
 0x1fc   : > { %8052 = vst [vmem:[#allocation88_spill] sm:$0xff] %v7406_v30  ;;  %v2086_v30 = vadd.f32 %v7105_v36, %v7103_v41  ;;  %v2672_v17 = vadd.f32 %v7314_v12, %v2378_v27  ;;  %v2379_v41 = vadd.f32 %v7316_v50, %v2084_v14  ;;  %v2090_v27 = vadd.f32 %v7184_v24, %v7182_v62 }
 0x1fd   : > { %v7414_v39 = vpop.f32.mrf.mxu0  ;;  %v2382_v33 = vadd.f32 %v7324_v8, %v2087_v28  ;;  %v2678_v15 = vadd.f32 %v7328_v43, %v2384_v4  ;;  %v2383_v43 = vadd.f32 %v7330_v61, %v2088_v7 }
 0x1fe   : > { %8053 = vst [vmem:[#allocation89_spill] sm:$0xff] %v7414_v39  ;;  %v2381_v39 = vadd.f32 %v5771_v53, %v2086_v30  ;;  %v2673_v37 = vadd.f32 %v7322_v35, %v2379_v41  ;;  %v2093_v35 = vadd.f32 %v7193_v5, %v7191_v21  ;;  %v2094_v41 = vadd.f32 %v7203_v32, %v7201_v44 }
 0x1ff   : > { %v7419_v58 = vpop.f32.mrf.mxu0  ;;  %v2676_v59 = vadd.f32 %v7339_v55, %v2382_v33  ;;  %v2677_v31 = vadd.f32 %v7353_v10, %v2383_v43 }
 0x200   : > { %v2675_v40 = vadd.f32 %v7318_v1, %v2381_v39  ;;  %v2385_v39 = vadd.f32 %v7326_v20, %v2090_v27  ;;  %v1504_v1 = vadd.f32 %v7013_v57, %v7009_v60  ;;  %v2388_v60 = vadd.f32 %v7332_v34, %v2093_v35  ;;  %v7470_v57 = vpop.f32.mrf.mxu1  ;;  %v8055_v27 = vld [vmem:[#allocation24_spill] sm:$0xff] }
 0x201   : > { %v7425_v26 = vpop.f32.mrf.mxu0  ;;  %v2389_v4 = vadd.f32 %v7345_v6, %v2094_v41  ;;  %v8057_v6 = vld [vmem:[#allocation72_spill] sm:$0xff] }
 0x202   : > { %v1798_v52 = vadd.f32 %v7205_v38, %v1504_v1  ;;  %v2682_v56 = vadd.f32 %v7364_v46, %v2388_v60  ;;  %v8056_v46 = vld [vmem:[#allocation25_spill] sm:$0xff] }
 0x203   : > { %v5838_v2 = vpop.f32.mrf.mxu0  ;;  %v2097_v33 = vadd.f32 %v8056_v46, %v8055_v27 }
 0x204   : > { %v2968_v36 = vadd.f32 %v5838_v2, %v2674_v63  ;;  %v2679_v2 = vadd.f32 %v7347_v25, %v2385_v39  ;;  %v2092_v28 = vadd.f32 %v7207_v23, %v1798_v52 }
 0x205   : > { %v2839_v13 = vpop.f32.mrf.mxu0 }
 0x206   : > { %v3007_v48 = vadd.f32 %v7435_v18, %v2968_v36  ;;  %v2966_v30 = vadd.f32 %v2839_v13, %v2672_v17  ;;  %v7482_v13 = vpop.f32.mrf.mxu1 }
 0x207   : > { %v5839_v53 = vpop.f32.mrf.mxu0 }
 0x208   : > { %v3005_v3 = vadd.f32 %v7435_v18, %v2966_v30  ;;  %v2969_v42 = vadd.f32 %v5839_v53, %v2675_v40  ;;  %v3039_v12 = vmax.f32 %v3007_v48, 0.0  ;;  %v880_v48 = vadd.f32 %v6909_v9, %v6907_v0  ;;  %v8054_v30 = vld [vmem:[#allocation15_spill] sm:$0xff]  ;;  %v7500_v35 = vpop.f32.mrf.mxu1 }
 0x209   : > { %v2842_v45 = vpop.f32.mrf.mxu0  ;;  %v1508_v23 = vadd.f32 %v8054_v30, %v7026_v49  ;;  %v2680_v53 = vadd.f32 %v8057_v6, %v2386_v29  ;;  %v8062_v9 = vld [vmem:[#allocation75_spill] sm:$0xff]  ;;  %v8063_v49 = vld [vmem:[#allocation66_spill] sm:$0xff] }
 0x20a   : > { %v3037_v50 = vmax.f32 %v3005_v3, 0.0  ;;  %v3008_v62 = vadd.f32 %v7435_v18, %v2969_v42  ;;  %v2967_v24 = vadd.f32 %v2842_v45, %v2673_v37  ;;  %v8058_v3 = vld [vmem:[#allocation65_spill] sm:$0xff]  ;;  %v8059_v45 = vld [vmem:[#allocation26_spill] sm:$0xff]  ;;  %v2392_v1 = vadd.f32 %v8063_v49, %v2097_v33 }
 0x20b   : > { %v5842_v8 = vpop.f32.mrf.mxu0  ;;  %v2387_v42 = vadd.f32 %v8058_v3, %v2092_v28  ;;  %v8070_v29 = vld [vmem:[#allocation78_spill] sm:$0xff]  ;;  %v8073_v33 = vld [vmem:[#allocation17_spill] sm:$0xff] }
 0x20c   : > { %v3069_v20 = vmax.f32 %v3037_v50, %v3039_v12  ;;  %v3006_v14 = vadd.f32 %v7435_v18, %v2967_v24  ;;  %v2972_v63 = vadd.f32 %v5842_v8, %v2678_v15  ;;  %v3040_v21 = vmax.f32 %v3008_v62, 0.0  ;;  %v8060_v12 = vld [vmem:[#allocation27_spill] sm:$0xff]  ;;  %v8061_v62 = vld [vmem:[#allocation30_spill] sm:$0xff]  ;;  %v8076_v3 = vld [vmem:[#allocation33_spill] sm:$0xff] }
 0x20d   : > { %v2855_v5 = vpop.f32.mrf.mxu0  ;;  %v2095_v50 = vadd.f32 %v8060_v12, %v8059_v45  ;;  %v1802_v0 = vadd.f32 %v8061_v62, %v1508_v23  ;;  %v2683_v24 = vadd.f32 %v8062_v9, %v2389_v4  ;;  %v8072_v4 = vld [vmem:[#allocation68_spill] sm:$0xff]  ;;  %v8078_v45 = vld [vmem:[#allocation70_spill] sm:$0xff] }
 0x20e   : > { %3086 = vst.msk [vmem:[#allocation4] sm:$0xff] %vm3085_vm2, %v3069_v20  ;;  %v3038_v55 = vmax.f32 %v3006_v14, 0.0  ;;  %v3011_v61 = vadd.f32 %v7435_v18, %v2972_v63  ;;  %v2970_v17 = vadd.f32 %v2855_v5, %v2676_v59  ;;  %v8064_v63 = vld [vmem:[#allocation9_spill] sm:$0xff]  ;;  %v8067_v5 = vld [vmem:[#allocation28_spill] sm:$0xff]  ;;  %v8079_v9 = vld [vmem:[#allocation34_spill] sm:$0xff] }
 0x20f   : > { %v5843_v38 = vpop.f32.mrf.mxu0  ;;  %v896_v52 = vadd.f32 %v8065_v51, %v8064_v63 }
 0x210   : > { %v3070_v25 = vmax.f32 %v3038_v55, %v3040_v21  ;;  %v3009_v34 = vadd.f32 %v7435_v18, %v2970_v17  ;;  %v2973_v36 = vadd.f32 %v5843_v38, %v2679_v2  ;;  %v3043_v32 = vmax.f32 %v3011_v61, 0.0  ;;  %v8066_v2 = vld [vmem:[#allocation16_spill] sm:$0xff]  ;;  %v8068_v21 = vld [vmem:[#allocation29_spill] sm:$0xff]  ;;  %v8069_v61 = vld [vmem:[#allocation67_spill] sm:$0xff] }
 0x211   : > { %v2858_v40 = vpop.f32.mrf.mxu0  ;;  %v1218_v60 = vadd.f32 %v8066_v2, %v880_v48  ;;  %v2098_v55 = vadd.f32 %v8068_v21, %v8067_v5  ;;  %v2390_v17 = vadd.f32 %v8069_v61, %v2095_v50  ;;  %v2681_v38 = vadd.f32 %v8070_v29, %v2387_v42  ;;  %v8084_v21 = vld [vmem:[#allocation11_spill] sm:$0xff]  ;;  %v8087_v29 = vld [vmem:[#allocation36_spill] sm:$0xff] }
 0x212   : > { %3087 = vst.msk [vmem:[#allocation4 + $0x8] sm:$0xff] %vm3085_vm2, %v3070_v25  ;;  %v3041_v44 = vmax.f32 %v3009_v34, 0.0  ;;  %v3012_v47 = vadd.f32 %v7435_v18, %v2973_v36  ;;  %v2971_v10 = vadd.f32 %v2858_v40, %v2677_v31  ;;  %v8071_v36 = vld [vmem:[#allocation31_spill] sm:$0xff] }
 0x213   : > { %v5846_v37 = vpop.f32.mrf.mxu0  ;;  %v2096_v28 = vadd.f32 %v8071_v36, %v1802_v0  ;;  %v2393_v40 = vadd.f32 %v8072_v4, %v2098_v55  ;;  %v1512_v6 = vadd.f32 %v8073_v33, %v1218_v60  ;;  %v8085_v55 = vld [vmem:[#allocation12_spill] sm:$0xff] }
 0x214   : > { %v3071_v7 = vmax.f32 %v3041_v44, %v3043_v32  ;;  %v3010_v15 = vadd.f32 %v7435_v18, %v2971_v10  ;;  %v2976_v39 = vadd.f32 %v5846_v37, %v2682_v56  ;;  %v3044_v8 = vmax.f32 %v3012_v47, 0.0  ;;  %v7515_v32 = vpop.f32.mrf.mxu1 }
 0x215   : > { %v2871_v59 = vpop.f32.mrf.mxu0  ;;  %v2686_v56 = vadd.f32 %v7390_v16, %v2392_v1  ;;  %v8075_v16 = vld [vmem:[#allocation32_spill] sm:$0xff]  ;;  %v2391_v12 = vadd.f32 %v8078_v45, %v2096_v28  ;;  %v8081_v1 = vld [vmem:[#allocation38_spill] sm:$0xff]  ;;  %v912_v61 = vadd.f32 %v8085_v55, %v8084_v21 }
 0x216   : > { %3088 = vst.msk [vmem:[#allocation4 + $0x10] sm:$0xff] %vm3085_vm2, %v3071_v7  ;;  %v3042_v43 = vmax.f32 %v3010_v15, 0.0  ;;  %v3015_v20 = vadd.f32 %v7435_v18, %v2976_v39  ;;  %v2974_v14 = vadd.f32 %v2871_v59, %v2680_v53  ;;  %v8074_v53 = vld [vmem:[#allocation18_spill] sm:$0xff]  ;;  %v2101_v42 = vadd.f32 %v8076_v3, %v8075_v16  ;;  %v8077_v7 = vld [vmem:[#allocation83_spill] sm:$0xff]  ;;  %v7532_v63 = vpop.f32.mrf.mxu1 }
 0x217   : > { %v5847_v41 = vpop.f32.mrf.mxu0  ;;  %v1222_v37 = vadd.f32 %v8074_v53, %v896_v52  ;;  %v2684_v15 = vadd.f32 %v8077_v7, %v2390_v17  ;;  %v1806_v59 = vadd.f32 %v8081_v1, %v1512_v6  ;;  %v8086_v17 = vld [vmem:[#allocation19_spill] sm:$0xff]  ;;  %v2685_v28 = vadd.f32 %v7412_v11, %v2391_v12  ;;  %v8095_v45 = vld [vmem:[#allocation42_spill] sm:$0xff] }
 0x218   : > { %v3072_v31 = vmax.f32 %v3042_v43, %v3044_v8  ;;  %v3013_v25 = vadd.f32 %v7435_v18, %v2974_v14  ;;  %v2977_v34 = vadd.f32 %v5847_v41, %v2683_v24  ;;  %v3047_v10 = vmax.f32 %v3015_v20, 0.0  ;;  %v8080_v24 = vld [vmem:[#allocation35_spill] sm:$0xff]  ;;  %v8082_v8 = vld [vmem:[#allocation86_spill] sm:$0xff] }
 0x219   : > { %v3102_v44 = vld [vmem:[#allocation4] ss:$2 sm:$0xff]  ;;  %v3118_v47 = vld [vmem:[#allocation4 + $0x1] ss:$2 sm:$0xff]  ;;  %v2874_v48 = vpop.f32.mrf.mxu0  ;;  %v2099_v49 = vadd.f32 %v8080_v24, %v8079_v9  ;;  %v2687_v43 = vadd.f32 %v8082_v8, %v2393_v40  ;;  %v8083_v20 = vld [vmem:[#allocation71_spill] sm:$0xff]  ;;  %v1516_v41 = vadd.f32 %v8086_v17, %v1222_v37 }
 0x21a   : > { %v3133_v30 = vmax.f32 %v3102_v44, %v3118_v47  ;;  %3089 = vst.msk [vmem:[#allocation4 + $0x18] sm:$0xff] %vm3085_vm2, %v3072_v31  ;;  %v3045_v23 = vmax.f32 %v3013_v25, 0.0  ;;  %v3016_v27 = vadd.f32 %v7435_v18, %v2977_v34  ;;  %v2975_v46 = vadd.f32 %v2874_v48, %v2681_v38  ;;  %v8088_v38 = vld [vmem:[#allocation37_spill] sm:$0xff]  ;;  %v8090_v44 = vld [vmem:[#allocation39_spill] sm:$0xff]  ;;  %v8091_v48 = vld [vmem:[#allocation74_spill] sm:$0xff] }
 0x21b   : > { %v5850_v39 = vpop.f32.mrf.mxu0  ;;  %v2396_v14 = vadd.f32 %v8083_v20, %v2101_v42  ;;  %v2102_v31 = vadd.f32 %v8088_v38, %v8087_v29  ;;  %v8089_v25 = vld [vmem:[#allocation73_spill] sm:$0xff]  ;;  %v2100_v47 = vadd.f32 %v8090_v44, %v1806_v59  ;;  %v3193_v3 = vld [vmem:[#allocation3 + $0x8] sm:$0xff]  ;;  %v8101_v29 = vld [vmem:[#allocation14_spill] sm:$0xff] }
 0x21c   : > { %3172 = vst.msk [vmem:[#allocation3 + $0x20] sm:$0xff] %vm3085_vm2, %v3133_v30  ;;  %v3073_v50 = vmax.f32 %v3045_v23, %v3047_v10  ;;  %v3014_v62 = vadd.f32 %v7435_v18, %v2975_v46  ;;  %v2980_v0 = vadd.f32 %v5850_v39, %v2686_v56  ;;  %v3048_v52 = vmax.f32 %v3016_v27, 0.0  ;;  %v7547_v23 = vpop.f32.mrf.mxu1  ;;  %v8092_v42 = vld [vmem:[#allocation20_spill] sm:$0xff]  ;;  %v8096_v12 = vld [vmem:[#allocation43_spill] sm:$0xff]  ;;  %v8100_v17 = vld [vmem:[#allocation13_spill] sm:$0xff] }
 0x21d   : > { %v2887_v51 = vpop.f32.mrf.mxu0  ;;  %v2394_v34 = vadd.f32 %v8089_v25, %v2099_v49  ;;  %v2690_v10 = vadd.f32 %v7423_v54, %v2396_v14  ;;  %v2397_v30 = vadd.f32 %v8091_v48, %v2102_v31  ;;  %v1226_v7 = vadd.f32 %v8092_v42, %v912_v61  ;;  %v8094_v54 = vld [vmem:[#allocation41_spill] sm:$0xff]  ;;  %v8097_v24 = vld [vmem:[#allocation76_spill] sm:$0xff] }
 0x21e   : > { %3090 = vst.msk [vmem:[#allocation4 + $0x20] sm:$0xff] %vm3085_vm2, %v3073_v50  ;;  %v3046_v2 = vmax.f32 %v3014_v62, 0.0  ;;  %v3019_v60 = vadd.f32 %v7435_v18, %v2980_v0  ;;  %v2978_v5 = vadd.f32 %v2887_v51, %v2684_v15  ;;  %v8093_v15 = vld [vmem:[#allocation40_spill] sm:$0xff]  ;;  %v2103_v50 = vadd.f32 %v8096_v12, %v8095_v45  ;;  %v8099_v51 = vld [vmem:[#allocation77_spill] sm:$0xff]  ;;  %v8111_v45 = vld [vmem:[#allocation50_spill] sm:$0xff] }
 0x21f   : > { %v5851_v36 = vpop.f32.mrf.mxu0  ;;  %v2105_v39 = vadd.f32 %v8094_v54, %v8093_v15  ;;  %v2688_v62 = vadd.f32 %v7443_v19, %v2394_v34  ;;  %v2395_v49 = vadd.f32 %v8097_v24, %v2100_v47  ;;  %v2691_v14 = vadd.f32 %v7455_v22, %v2397_v30  ;;  %v8103_v22 = vld [vmem:[#allocation44_spill] sm:$0xff]  ;;  %v8104_v25 = vld [vmem:[#allocation45_spill] sm:$0xff]  ;;  %v8112_v12 = vld [vmem:[#allocation51_spill] sm:$0xff] }
 0x220   : > { %v3074_v56 = vmax.f32 %v3046_v2, %v3048_v52  ;;  %v3017_v4 = vadd.f32 %v7435_v18, %v2978_v5  ;;  %v2981_v40 = vadd.f32 %v5851_v36, %v2687_v43  ;;  %v3051_v33 = vmax.f32 %v3019_v60, 0.0  ;;  %v8098_v43 = vld [vmem:[#allocation46_spill] sm:$0xff]  ;;  %v7565_v2 = vpop.f32.mrf.mxu1  ;;  %v8105_v36 = vld [vmem:[#allocation79_spill] sm:$0xff]  ;;  %v8109_v54 = vld [vmem:[#allocation48_spill] sm:$0xff] }
 0x221   : > { %v3104_v27 = vld [vmem:[#allocation4 + $0x10] ss:$2 sm:$0xff]  ;;  %v3120_v46 = vld [vmem:[#allocation4 + $0x11] ss:$2 sm:$0xff]  ;;  %v2890_v6 = vpop.f32.mrf.mxu0  ;;  %v1810_v20 = vadd.f32 %v8098_v43, %v1516_v41  ;;  %v2400_v52 = vadd.f32 %v8099_v51, %v2105_v39  ;;  %v928_v38 = vadd.f32 %v8101_v29, %v8100_v17  ;;  %v8102_v41 = vld [vmem:[#allocation21_spill] sm:$0xff]  ;;  %v2106_v34 = vadd.f32 %v8104_v25, %v8103_v22 }
 0x222   : > { %v3134_v53 = vmax.f32 %v3104_v27, %v3120_v46  ;;  %3091 = vst.msk [vmem:[#allocation4 + $0x28] sm:$0xff] %vm3085_vm2, %v3074_v56  ;;  %v3049_v11 = vmax.f32 %v3017_v4, 0.0  ;;  %v3020_v37 = vadd.f32 %v7435_v18, %v2981_v40  ;;  %v2979_v16 = vadd.f32 %v2890_v6, %v2685_v28  ;;  %v8107_v27 = vld [vmem:[#allocation80_spill] sm:$0xff]  ;;  %v8110_v39 = vld [vmem:[#allocation49_spill] sm:$0xff]  ;;  %v8116_v29 = vld [vmem:[#allocation23_spill] sm:$0xff] }
 0x223   : > { %v5854_v0 = vpop.f32.mrf.mxu0  ;;  %v7557_v9 = vld [vmem:[#allocation3 + $0x20] sm:$0xff]  ;;  %v1520_v31 = vadd.f32 %v8102_v41, %v1226_v7  ;;  %v2398_v28 = vadd.f32 %v8105_v36, %v2103_v50  ;;  %v2689_v4 = vadd.f32 %v7470_v57, %v2395_v49  ;;  %v2694_v30 = vadd.f32 %v7482_v13, %v2400_v52  ;;  %v8113_v49 = vld [vmem:[#allocation81_spill] sm:$0xff]  ;;  %v8117_v41 = vld [vmem:[#allocation52_spill] sm:$0xff] }
 0x224   : > { %3173 = vst.msk [vmem:[#allocation3 + $0x38] sm:$0xff] %vm3085_vm2, %v3134_v53  ;;  %v3075_v1 = vmax.f32 %v3049_v11, %v3051_v33  ;;  %v3018_v59 = vadd.f32 %v7435_v18, %v2979_v16  ;;  %v2984_v8 = vadd.f32 %v5854_v0, %v2690_v10  ;;  %v3201_v60 = vpack.c.bf16 %v7557_v9, %v3193_v3  ;;  %v8106_v10 = vld [vmem:[#allocation47_spill] sm:$0xff]  ;;  %v7582_v33 = vpop.f32.mrf.mxu1  ;;  %v8108_v7 = vld [vmem:[#allocation22_spill] sm:$0xff]  ;;  %v8118_v22 = vld [vmem:[#allocation53_spill] sm:$0xff] }
 0x225   : > { %v2903_v19 = vpop.f32.mrf.mxu0  ;;  %v3052_v5 = vmax.f32 %v3020_v37, 0.0  ;;  %v2104_v48 = vadd.f32 %v8106_v10, %v1810_v20  ;;  %v2401_v46 = vadd.f32 %v8107_v27, %v2106_v34  ;;  %v1230_v15 = vadd.f32 %v8108_v7, %v928_v38  ;;  %v8114_v20 = vld [vmem:[#allocation54_spill] sm:$0xff]  ;;  %v8119_v25 = vld [vmem:[#allocation84_spill] sm:$0xff]  ;;  %v8125_v7 = vld [vmem:[#allocation59_spill] sm:$0xff] }
 0x226   : > { %3092 = vst.msk [vmem:[#allocation4 + $0x30] sm:$0xff] %vm3085_vm2, %v3075_v1  ;;  %v3050_v21 = vmax.f32 %v3018_v59, 0.0  ;;  %v3023_v55 = vadd.f32 %v7435_v18, %v2984_v8  ;;  %v2982_v61 = vadd.f32 %v2903_v19, %v2688_v62  ;;  %5870 = vmatprep.mubr.msk.bf16.mxu1 %vm3085_vm2, %v3201_v60  ;;  %v2109_v13 = vadd.f32 %v8110_v39, %v8109_v54  ;;  %v8115_v52 = vld [vmem:[#allocation82_spill] sm:$0xff]  ;;  %v2644_v60 = vpop.f32.mrf.mxu1 }
 0x227   : > { %v5855_v56 = vpop.f32.mrf.mxu0  ;;  %v2107_v50 = vadd.f32 %v8112_v12, %v8111_v45  ;;  %v2692_v62 = vadd.f32 %v7500_v35, %v2398_v28  ;;  %v2399_v1 = vadd.f32 %v8113_v49, %v2104_v48  ;;  %v2695_v51 = vadd.f32 %v7515_v32, %v2401_v46  ;;  %v8127_v12 = vld [vmem:[#allocation87_spill] sm:$0xff] }
 0x228   : > { %v3076_v40 = vmax.f32 %v3050_v21, %v3052_v5  ;;  %v3021_v44 = vadd.f32 %v7435_v18, %v2982_v61  ;;  %v2985_v47 = vadd.f32 %v5855_v56, %v2691_v14  ;;  %v3055_v11 = vmax.f32 %v3023_v55, 0.0  ;;  %v5832_v48 = vpop.f32.mrf.mxu1 }
 0x229   : > { %v3106_v6 = vld [vmem:[#allocation4 + $0x20] ss:$2 sm:$0xff]  ;;  %v3122_v53 = vld [vmem:[#allocation4 + $0x21] ss:$2 sm:$0xff]  ;;  %v2906_v37 = vpop.f32.mrf.mxu0  ;;  %v1814_v14 = vadd.f32 %v8114_v20, %v1520_v31  ;;  %v2404_v19 = vadd.f32 %v8115_v52, %v2109_v13  ;;  %v1524_v38 = vadd.f32 %v8116_v29, %v1230_v15  ;;  %v2110_v31 = vadd.f32 %v8118_v22, %v8117_v41 }
 0x22a   : > { %v3135_v16 = vmax.f32 %v3106_v6, %v3122_v53  ;;  %3093 = vst.msk [vmem:[#allocation4 + $0x38] sm:$0xff] %vm3085_vm2, %v3076_v40  ;;  %v3053_v57 = vmax.f32 %v3021_v44, 0.0  ;;  %v3024_v3 = vadd.f32 %v7435_v18, %v2985_v47  ;;  %v2983_v42 = vadd.f32 %v2906_v37, %v2689_v4  ;;  %v8120_v4 = vld [vmem:[#allocation55_spill] sm:$0xff]  ;;  %v8121_v47 = vld [vmem:[#allocation85_spill] sm:$0xff]  ;;  %v8126_v15 = vld [vmem:[#allocation62_spill] sm:$0xff] }
 0x22b   : > { %v5858_v0 = vpop.f32.mrf.mxu0  ;;  %v3573_v24 = vld [vmem:[#allocation3 + $0x38] sm:$0xff]  ;;  %v2402_v32 = vadd.f32 %v8119_v25, %v2107_v50  ;;  %v2693_v36 = vadd.f32 %v7532_v63, %v2399_v1  ;;  %v2108_v40 = vadd.f32 %v8120_v4, %v1814_v14  ;;  %v2698_v44 = vadd.f32 %v7547_v23, %v2404_v19  ;;  %v8133_v25 = vld [vmem:[#allocation63_spill] sm:$0xff] }
 0x22c   : > { %3174 = vst.msk [vmem:[#allocation3 + $0x50] sm:$0xff] %vm3085_vm2, %v3135_v16  ;;  %v3077_v59 = vmax.f32 %v3053_v57, %v3055_v11  ;;  %v3022_v8 = vadd.f32 %v7435_v18, %v2983_v42  ;;  %v2988_v43 = vadd.f32 %v5858_v0, %v2694_v30  ;;  %v3580_v35 = vpack.c.bf16 %v3573_v24, %v7557_v9  ;;  %v8122_v16 = vld [vmem:[#allocation56_spill] sm:$0xff]  ;;  %v8123_v57 = vld [vmem:[#allocation57_spill] sm:$0xff]  ;;  %v8124_v42 = vld [vmem:[#allocation58_spill] sm:$0xff] }
 0x22d   : > { %v2919_v5 = vpop.f32.mrf.mxu0  ;;  %v3056_v21 = vmax.f32 %v3024_v3, 0.0  ;;  %v2405_v10 = vadd.f32 %v8121_v47, %v2110_v31  ;;  %v2113_v3 = vadd.f32 %v8123_v57, %v8122_v16  ;;  %v2111_v23 = vadd.f32 %v8125_v7, %v8124_v42  ;;  %v8134_v57 = vld [vmem:[#allocation69_spill] sm:$0xff] }
 0x22e   : > { %3094 = vst.msk [vmem:[#allocation4 + $0x40] sm:$0xff] %vm3085_vm2, %v3077_v59  ;;  %v3054_v55 = vmax.f32 %v3022_v8, 0.0  ;;  %v3027_v61 = vadd.f32 %v7435_v18, %v2988_v43  ;;  %v2986_v17 = vadd.f32 %v2919_v5, %v2692_v62  ;;  %5910 = vmatprep.mubr.msk.bf16.mxu0 %vm3085_vm2, %v3580_v35  ;;  %v1818_v54 = vadd.f32 %v8126_v15, %v1524_v38  ;;  %v8128_v59 = vld [vmem:[#allocation88_spill] sm:$0xff]  ;;  %v2657_v43 = vpop.f32.mrf.mxu1  ;;  %v7657_v15 = vld [vmem:[%s7961_s3 + $0x20] sm:$0xf] }
 0x22f   : > { %v5859_v34 = vpop.f32.mrf.mxu0  ;;  %v2696_v39 = vadd.f32 %v7565_v2, %v2402_v32  ;;  %v2403_v50 = vadd.f32 %v8127_v12, %v2108_v40  ;;  %v2699_v1 = vadd.f32 %v7582_v33, %v2405_v10  ;;  %v2408_v8 = vadd.f32 %v8128_v59, %v2113_v3  ;;  %v7633_v33 = vld [vmem:[%s7961_s3 + $0x8] sm:$0xf] }
 0x230   : > { %v3078_v9 = vmax.f32 %v3054_v55, %v3056_v21  ;;  %v3025_v28 = vadd.f32 %v7435_v18, %v2986_v17  ;;  %v2989_v56 = vadd.f32 %v5859_v34, %v2695_v51  ;;  %v3059_v46 = vmax.f32 %v3027_v61, 0.0  ;;  %v8129_v51 = vld [vmem:[#allocation64_spill] sm:$0xff]  ;;  %v8131_v55 = vld [vmem:[#allocation61_spill] sm:$0xff] }
 0x231   : > { %v3108_v30 = vld [vmem:[#allocation4 + $0x30] ss:$2 sm:$0xff]  ;;  %v3124_v27 = vld [vmem:[#allocation4 + $0x31] ss:$2 sm:$0xff]  ;;  %v2922_v6 = vpop.f32.mrf.mxu0  ;;  %v3301_v2 = vsel %vm3219_vm3, %v8129_v51, 0  ;;  %v2697_v38 = vadd.f32 %v2644_v60, %v2403_v50  ;;  %v2112_v32 = vadd.f32 %v8133_v25, %v1818_v54  ;;  %v2702_v34 = vadd.f32 %v5832_v48, %v2408_v8 }
 0x232   : > { %v3136_v53 = vmax.f32 %v3108_v30, %v3124_v27  ;;  %3095 = vst.msk [vmem:[#allocation4 + $0x48] sm:$0xff] %vm3085_vm2, %v3078_v9  ;;  %v3057_v11 = vmax.f32 %v3025_v28, 0.0  ;;  %v3028_v63 = vadd.f32 %v7435_v18, %v2989_v56  ;;  %v2987_v37 = vadd.f32 %v2922_v6, %v2693_v36  ;;  %v8130_v21 = vld [vmem:[#allocation60_spill] sm:$0xff]  ;;  %v5833_v9 = vpop.f32.mrf.mxu1 }
 0x233   : > { %v5862_v13 = vpop.f32.mrf.mxu0  ;;  %v3196_v45 = vld [vmem:[#allocation3 + $0x50] sm:$0xff]  ;;  %v2114_v61 = vadd.f32 %v8131_v55, %v8130_v21  ;;  %v3804_v3 = vsel %vm3219_vm3, %v8134_v57, 0 }
 0x234   : > { %3175 = vst.msk [vmem:[#allocation3 + $0x68] sm:$0xff] %vm3085_vm2, %v3136_v53  ;;  %v3079_v62 = vmax.f32 %v3057_v11, %v3059_v46  ;;  %v3026_v0 = vadd.f32 %v7435_v18, %v2987_v37  ;;  %v2992_v49 = vadd.f32 %v5862_v13, %v2698_v44  ;;  %v7624_v14 = vpack.c.bf16 %v3196_v45, %v3573_v24  ;;  %v8132_v24 = vld [vmem:[#allocation89_spill] sm:$0xff] }
 0x235   : > { %v2935_v20 = vpop.f32.mrf.mxu0  ;;  %v3060_v52 = vmax.f32 %v3028_v63, 0.0  ;;  %v2406_v17 = vadd.f32 %v8132_v24, %v2111_v23  ;;  %v2409_v36 = vadd.f32 %v7419_v58, %v2114_v61  ;;  %v2407_v58 = vadd.f32 %v7425_v26, %v2112_v32  ;;  %v2660_v63 = vpop.f32.mrf.mxu1 }
 0x236   : > { %3096 = vst.msk [vmem:[#allocation4 + $0x50] sm:$0xff] %vm3085_vm2, %v3079_v62  ;;  %v3058_v19 = vmax.f32 %v3026_v0, 0.0  ;;  %v3031_v5 = vadd.f32 %v7435_v18, %v2992_v49  ;;  %v2990_v35 = vadd.f32 %v2935_v20, %v2696_v39  ;;  %5871 = vmatmul.mubr.msk.bf16.vlgmr.msra.gmra.mxu1 %vm3085_vm2, %v7624_v14 }
 0x237   : > { %v5863_v29 = vpop.f32.mrf.mxu0  ;;  %5879 = vmatpush3.bf16.msra.mxu1 %v3301_v2  ;;  %v2700_v30 = vadd.f32 %v2657_v43, %v2406_v17  ;;  %v2703_v11 = vadd.f32 %v5833_v9, %v2409_v36  ;;  %v2701_v39 = vadd.f32 %v2660_v63, %v2407_v58  ;;  %v3182_v9 = vld [vmem:[#allocation3 + $0x37] sm:$0xff]  ;;  %v8135_v63 = vmov 0.0  }
 0x238   : > { %v3080_v41 = vmax.f32 %v3058_v19, %v3060_v52  ;;  %v3029_v22 = vadd.f32 %v7435_v18, %v2990_v35  ;;  %v2993_v31 = vadd.f32 %v5863_v29, %v2699_v1  ;;  %v3063_v4 = vmax.f32 %v3031_v5, 0.0  ;;  %6065 = vmatprep.subr.msk.bf16.mxu1 %vm3219_vm3, %v7633_v33 }
 0x239   : > { %v3110_v28 = vld [vmem:[#allocation4 + $0x40] ss:$2 sm:$0xff]  ;;  %v3126_v56 = vld [vmem:[#allocation4 + $0x41] ss:$2 sm:$0xff]  ;;  %v2938_v40 = vpop.f32.mrf.mxu0 }
 0x23a   : > { %v3137_v44 = vmax.f32 %v3110_v28, %v3126_v56  ;;  %3097 = vst.msk [vmem:[#allocation4 + $0x58] sm:$0xff] %vm3085_vm2, %v3080_v41  ;;  %v3061_v60 = vmax.f32 %v3029_v22, 0.0  ;;  %v3032_v47 = vadd.f32 %v7435_v18, %v2993_v31  ;;  %v2991_v10 = vadd.f32 %v2938_v40, %v2697_v38  ;;  %v3180_v41 = vld [vmem:[#allocation3 + $0x7] sm:$0xff]  ;;  %v3181_v22 = vld [vmem:[#allocation3 + $0x1f] sm:$0xff] }
 0x23b   : > { %v5866_v27 = vpop.f32.mrf.mxu0  ;;  %v3575_v48 = vld [vmem:[#allocation3 + $0x68] sm:$0xff]  ;;  %v3188_v32 = vpack.c.bf16 %v3181_v22, %v3180_v41 }
 0x23c   : > { %3176 = vst.msk [vmem:[#allocation3 + $0x80] sm:$0xff] %vm3085_vm2, %v3137_v44  ;;  %v3081_v46 = vmax.f32 %v3061_v60, %v3063_v4  ;;  %v3030_v6 = vadd.f32 %v7435_v18, %v2991_v10  ;;  %v2996_v53 = vadd.f32 %v5866_v27, %v2702_v34  ;;  %v3581_v16 = vpack.c.bf16 %v3575_v48, %v3196_v45  ;;  %v3183_v34 = vld [vmem:[#allocation3 + $0x4f] sm:$0xff]  ;;  %v3184_v44 = vld [vmem:[#allocation3 + $0x67] sm:$0xff] }
 0x23d   : > { %v2951_v37 = vpop.f32.mrf.mxu0  ;;  %v3064_v42 = vmax.f32 %v3032_v47, 0.0  ;;  %v3189_v56 = vpack.c.bf16 %v3183_v34, %v3182_v9  ;;  %v3395_v4 = vsel %vm3219_vm3, %v7633_v33, 0  ;;  %v5235_v47 = vld [vmem:[%s7961_s3 + $0xc] sm:$0xf] }
 0x23e   : > { %3098 = vst.msk [vmem:[#allocation4 + $0x60] sm:$0xff] %vm3085_vm2, %v3081_v46  ;;  %v3062_v7 = vmax.f32 %v3030_v6, 0.0  ;;  %v3035_v23 = vadd.f32 %v7435_v18, %v2996_v53  ;;  %v2994_v26 = vadd.f32 %v2951_v37, %v2700_v30  ;;  %5911 = vmatmul.mubr.msk.bf16.vlgmr.msra.gmra.mxu0 %vm3085_vm2, %v3581_v16  ;;  %v3368_v10 = vld [vmem:[#allocation3 + $0x9] sm:$0xff]  ;;  %v3369_v30 = vld [vmem:[#allocation3 + $0x21] sm:$0xff]  ;;  %v4008_v46 = vsel %vm3219_vm3, %v7657_v15, 0  ;;  %v3371_v6 = vld [vmem:[#allocation3 + $0x51] sm:$0xff] }
 0x23f   : > { %v5867_v54 = vpop.f32.mrf.mxu0  ;;  %5929 = vmatpush3.bf16.msra.mxu0 %v3804_v3  ;;  %v3376_v58 = vpack.c.bf16 %v3369_v30, %v3368_v10  ;;  %v3370_v16 = vld [vmem:[#allocation3 + $0x39] sm:$0xff]  ;;  %v3497_v3 = vsel %vm3219_vm3, %v5235_v47, 0 }
 0x240   : > { %v3082_v13 = vmax.f32 %v3062_v7, %v3064_v42  ;;  %v3033_v45 = vadd.f32 %v7435_v18, %v2994_v26  ;;  %v2997_v12 = vadd.f32 %v5867_v54, %v2703_v11  ;;  %v3067_v0 = vmax.f32 %v3035_v23, 0.0  ;;  %6071 = vmatprep.subr.msk.bf16.mxu0 %vm3219_vm3, %v7657_v15  ;;  %v3784_v11 = vld [vmem:[#allocation3 + $0xdf] sm:$0xff]  ;;  %v3372_v7 = vld [vmem:[#allocation3 + $0x69] sm:$0xff]  ;;  %v5245_v26 = vld [vmem:[%s7961_s3 + $0x14] sm:$0xf] }
 0x241   : > { %v3112_v50 = vld [vmem:[#allocation4 + $0x50] ss:$2 sm:$0xff]  ;;  %v3128_v62 = vld [vmem:[#allocation4 + $0x51] ss:$2 sm:$0xff]  ;;  %v2954_v49 = vpop.f32.mrf.mxu0  ;;  %v3377_v57 = vpack.c.bf16 %v3371_v6, %v3370_v16 }
 0x242   : > { %v3138_v1 = vmax.f32 %v3112_v50, %v3128_v62  ;;  %3099 = vst.msk [vmem:[#allocation4 + $0x68] sm:$0xff] %vm3085_vm2, %v3082_v13  ;;  %v3065_v59 = vmax.f32 %v3033_v45, 0.0  ;;  %v3036_v8 = vadd.f32 %v7435_v18, %v2997_v12  ;;  %v2995_v43 = vadd.f32 %v2954_v49, %v2701_v39  ;;  %v3988_v12 = vld [vmem:[#allocation3 + $0xe1] sm:$0xff] }
 0x243   : > { %v3198_v20 = vld [vmem:[#allocation3 + $0x80] sm:$0xff]  ;;  %v3478_v13 = vpack.c.bf16 %v3182_v9, %v3181_v22  ;;  %v3479_v50 = vpack.c.bf16 %v3184_v44, %v3183_v34  ;;  %v3701_v62 = vsel %vm3219_vm3, %v5245_v26, 0 }
 0x244   : > { %3177 = vst.msk [vmem:[#allocation3 + $0x98] sm:$0xff] %vm3085_vm2, %v3138_v1  ;;  %v3083_v51 = vmax.f32 %v3065_v59, %v3067_v0  ;;  %v3034_v2 = vadd.f32 %v7435_v18, %v2995_v43  ;;  %v7667_v52 = vpack.c.bf16 %v3198_v20, %v3575_v48  ;;  %v3068_v19 = vmax.f32 %v3036_v8, 0.0  ;;  %v7681_v36 = vld [vmem:[#allocation3 + $0x7f] sm:$0xff] }
 0x245   : > { %v3190_v60 = vpack.c.bf16 %v7681_v36, %v3184_v44  ;;  %v3373_v37 = vld [vmem:[#allocation3 + $0x81] sm:$0xff]  ;;  %v5255_v1 = vld [vmem:[%s7961_s3 + $0x1c] sm:$0xf]  ;;  %v3682_v8 = vpack.c.bf16 %v3370_v16, %v3369_v30  ;;  %v3683_v43 = vpack.c.bf16 %v3372_v7, %v3371_v6 }
 0x246   : > { %3100 = vst.msk [vmem:[#allocation4 + $0x70] sm:$0xff] %vm3085_vm2, %v3083_v51  ;;  %v3066_v5 = vmax.f32 %v3034_v2, 0.0  ;;  %5874 = vmatprep.mubr.msk.bf16.mxu1 %vm3085_vm2, %v7667_v52  ;;  %v3378_v23 = vpack.c.bf16 %v3373_v37, %v3372_v7 }
 0x248   : > { %v3084_v35 = vmax.f32 %v3066_v5, %v3068_v19  ;;  %v3886_v19 = vld [vmem:[#allocation3 + $0xe0] sm:$0xff] }
 0x249   : > { %v3114_v21 = vld [vmem:[#allocation4 + $0x60] ss:$2 sm:$0xff]  ;;  %v3130_v55 = vld [vmem:[#allocation4 + $0x61] ss:$2 sm:$0xff] }
 0x24a   : > { %v3139_v61 = vmax.f32 %v3114_v21, %v3130_v55  ;;  %3101 = vst.msk [vmem:[#allocation4 + $0x78] sm:$0xff] %vm3085_vm2, %v3084_v35  ;;  %v6113_v35 = vld [vmem:[%s7963_s5] sm:$0xff]   ;;  %v6114_v21 = vld [vmem:[%s7963_s5 + $0x10] sm:$0xff]  }
 0x24b   : > { %v3577_v24 = vld [vmem:[#allocation3 + $0x98] sm:$0xff] }
 0x24c   : > { %3178 = vst.msk [vmem:[#allocation3 + $0xb0] sm:$0xff] %vm3085_vm2, %v3139_v61  ;;  %v3582_v17 = vpack.c.bf16 %v3577_v24, %v3198_v20  ;;  %v3186_v27 = vld [vmem:[#allocation3 + $0x97] sm:$0xff]  ;;  %v3906_v20 = vsel %vm3219_vm3, %v5255_v1, 0 }
 0x24d   : > { %v3374_v54 = vld [vmem:[#allocation3 + $0x99] sm:$0xff]  ;;  %v3480_v49 = vpack.c.bf16 %v3186_v27, %v7681_v36 }
 0x24e   : > { %5914 = vmatprep.mubr.msk.bf16.mxu0 %vm3085_vm2, %v3582_v17  ;;  %v3684_v51 = vpack.c.bf16 %v3374_v54, %v3373_v37 }
 0x251   : > { %v3116_v18 = vld [vmem:[#allocation4 + $0x70] ss:$2 sm:$0xff]  ;;  %v3132_v29 = vld [vmem:[#allocation4 + $0x71] ss:$2 sm:$0xff] }
 0x252   : > { %v3140_v38 = vmax.f32 %v3116_v18, %v3132_v29 }
 0x253   : > { %v3200_v31 = vld [vmem:[#allocation3 + $0xb0] sm:$0xff] }
 0x254   : > { %3179 = vst.msk [vmem:[#allocation3 + $0xc8] sm:$0xff] %vm3085_vm2, %v3140_v38  ;;  %v7676_v25 = vpack.c.bf16 %v3200_v31, %v3577_v24  ;;  %v3187_v33 = vld [vmem:[#allocation3 + $0xaf] sm:$0xff] }
 0x255   : > { %v3191_v48 = vpack.c.bf16 %v3187_v33, %v3186_v27  ;;  %v3375_v15 = vld [vmem:[#allocation3 + $0xb1] sm:$0xff] }
 0x256   : > { %5875 = vmatmul.mubr.msk.bf16.gmra.mxu1 %vm3085_vm2, %v7676_v25  ;;  %v3379_v39 = vpack.c.bf16 %v3375_v15, %v3374_v54 }
 0x257   : > { %5880 = vmatprep.mubr.msk.bf16.mxu1 %vm3085_vm2, %v3188_v32 }
 0x25b   : > { %v7683_v28 = vld [vmem:[#allocation3 + $0xc8] sm:$0xff] }
 0x25c   : > { %v3583_v40 = vpack.c.bf16 %v7683_v28, %v3200_v31  ;;  %v3783_v53 = vld [vmem:[#allocation3 + $0xc7] sm:$0xff]  ;;  %v3890_v5 = vpack.c.bf16 %v3886_v19, %v7683_v28 }
 0x25d   : > { %v3788_v42 = vpack.c.bf16 %v3784_v11, %v3783_v53  ;;  %v3987_v45 = vld [vmem:[#allocation3 + $0xc9] sm:$0xff]  ;;  %v3481_v59 = vpack.c.bf16 %v3783_v53, %v3187_v33 }
 0x25e   : > { %5881 = vmatmul.mubr.msk.bf16.vlgmr.msra.gmra.mxu1 %vm3085_vm2, %v3189_v56  ;;  %5915 = vmatmul.mubr.msk.bf16.gmra.mxu0 %vm3085_vm2, %v3583_v40  ;;  %v3992_v0 = vpack.c.bf16 %v3988_v12, %v3987_v45  ;;  %v3685_v2 = vpack.c.bf16 %v3987_v45, %v3375_v15 }
 0x25f   : > { %5889 = vmatpush3.bf16.msra.mxu1 %v3395_v4  ;;  %5884 = vmatprep.mubr.msk.bf16.mxu1 %vm3085_vm2, %v3190_v60 }
 0x260   : > { %5930 = vmatprep.mubr.msk.bf16.mxu0 %vm3085_vm2, %v3189_v56  ;;  %6066 = vmatprep.subr.msk.bf16.mxu1 %vm3219_vm3, %v5235_v47 }
 0x266   : > { %5885 = vmatmul.mubr.msk.bf16.gmra.mxu1 %vm3085_vm2, %v3191_v48  ;;  %5931 = vmatmul.mubr.msk.bf16.vlgmr.msra.gmra.mxu0 %vm3085_vm2, %v3190_v60 }
 0x267   : > { %5890 = vmatprep.mubr.msk.bf16.mxu1 %vm3085_vm2, %v3376_v58  ;;  %5934 = vmatprep.mubr.msk.bf16.mxu0 %vm3085_vm2, %v3191_v48 }
 0x268   : > { %5949 = vmatpush3.bf16.msra.mxu0 %v4008_v46 }
 0x269   : > { %5970 = vmatprep.subr.bf16.mxu0 %v8135_v63 }
 0x26e   : > { %5891 = vmatmul.mubr.msk.bf16.vlgmr.msra.gmra.mxu1 %vm3085_vm2, %v3377_v57  ;;  %5935 = vmatmul.mubr.msk.bf16.gmra.mxu0 %vm3085_vm2, %v3788_v42 }
 0x26f   : > { %5899 = vmatpush3.bf16.msra.mxu1 %v3497_v3  ;;  %5894 = vmatprep.mubr.msk.bf16.mxu1 %vm3085_vm2, %v3378_v23 }
 0x270   : > { %5950 = vmatprep.mubr.msk.bf16.mxu0 %vm3085_vm2, %v3377_v57  ;;  %6068 = vmatprep.subr.msk.bf16.mxu1 %vm3219_vm3, %v5245_v26 }
 0x276   : > { %5895 = vmatmul.mubr.msk.bf16.gmra.mxu1 %vm3085_vm2, %v3379_v39  ;;  %5951 = vmatmul.mubr.msk.bf16.vlgmr.msra.gmra.mxu0 %vm3085_vm2, %v3378_v23 }
 0x277   : > { %5900 = vmatprep.mubr.msk.bf16.mxu1 %vm3085_vm2, %v3478_v13  ;;  %5954 = vmatprep.mubr.msk.bf16.mxu0 %vm3085_vm2, %v3379_v39 }
 0x278   : > { %5971 = vmatpush3.bf16.msra.mxu0 %v6114_v21 }
 0x279   : > { %5982 = vmatprep.subr.bf16.mxu0 %v8135_v63 }
 0x27e   : > { %5901 = vmatmul.mubr.msk.bf16.vlgmr.msra.gmra.mxu1 %vm3085_vm2, %v3479_v50  ;;  %5955 = vmatmul.mubr.msk.bf16.gmra.mxu0 %vm3085_vm2, %v3992_v0 }
 0x27f   : > { %5919 = vmatpush3.bf16.msra.mxu1 %v3701_v62  ;;  %5904 = vmatprep.mubr.msk.bf16.mxu1 %vm3085_vm2, %v3480_v49 }
 0x280   : > { %6070 = vmatprep.subr.msk.bf16.mxu1 %vm3219_vm3, %v5255_v1  ;;  %5972 = vmatprep.mubr.msk.bf16.mxu0 %vm6192_vm4, %v8135_v63 }
 0x286   : > { %5905 = vmatmul.mubr.msk.bf16.gmra.mxu1 %vm3085_vm2, %v3481_v59 }
 0x287   : > { %5920 = vmatprep.mubr.msk.bf16.mxu1 %vm3085_vm2, %v3682_v8 }
 0x28e   : > { %5921 = vmatmul.mubr.msk.bf16.vlgmr.msra.gmra.mxu1 %vm3085_vm2, %v3683_v43 }
 0x28f   : > { %5939 = vmatpush3.bf16.msra.mxu1 %v3906_v20  ;;  %5924 = vmatprep.mubr.msk.bf16.mxu1 %vm3085_vm2, %v3684_v51 }
 0x290   : > { %5958 = vmatprep.subr.bf16.mxu1 %v8135_v63 }
 0x296   : > { %5925 = vmatmul.mubr.msk.bf16.gmra.mxu1 %vm3085_vm2, %v3685_v2 }
 0x297   : > { %5940 = vmatprep.mubr.msk.bf16.mxu1 %vm3085_vm2, %v7624_v14 }
 0x29e   : > { %5941 = vmatmul.mubr.msk.bf16.vlgmr.msra.gmra.mxu1 %vm3085_vm2, %v7667_v52 }
 0x29f   : > { %5944 = vmatprep.mubr.msk.bf16.mxu1 %vm3085_vm2, %v7676_v25  ;;  %5959 = vmatpush3.bf16.msra.mxu1 %v6113_v35 }
 0x2a0   : > { %5964 = vmatprep.subr.bf16.mxu1 %v8135_v63 }
 0x2a6   : > { %5945 = vmatmul.mubr.msk.bf16.gmra.mxu1 %vm3085_vm2, %v3890_v5 }
 0x2a7   : > { %5960 = vmatprep.mubr.msk.bf16.mxu1 %vm6192_vm4, %v8135_v63 }
 0x2f6   : > { %v5872_v14 = vpop.f32.mrf.mxu1 }
 0x2f8   : > { %v3257_v52 = vpop.f32.mrf.mxu1 }
 0x2fa   : > { %v5873_v55 = vpop.f32.mrf.mxu1 }
 0x2fc   : > { %v3260_v61 = vpop.f32.mrf.mxu1 }
 0x2fe   : > { %v7753_v24 = vpop.f32.mrf.mxu0 }
 0x300   : > { %v7755_v18 = vpop.f32.mrf.mxu0 }
 0x302   : > { %v7759_v41 = vpop.f32.mrf.mxu0 }
 0x304   : > { %v7763_v25 = vpop.f32.mrf.mxu0 }
 0x316   : > { %v5876_v17 = vpop.f32.mrf.mxu1 }
 0x318   : > { %v3273_v29 = vpop.f32.mrf.mxu1 }
 0x31a   : > { %v7757_v38 = vpop.f32.mrf.mxu1 }
 0x31c   : > { %v7761_v22 = vpop.f32.mrf.mxu1 }
 0x31e   : > { %v5882_v31 = vpop.f32.mrf.mxu1  ;;  %v7765_v34 = vpop.f32.mrf.mxu0 }
 0x31f   : > { %v3346_v62 = vadd.f32 %v5882_v31, %v5872_v14 }
 0x320   : > { %v3337_v32 = vpop.f32.mrf.mxu1  ;;  %v7767_v28 = vpop.f32.mrf.mxu0 }
 0x321   : > { %v3338_v49 = vadd.f32 %v3337_v32, %v3257_v52 }
 0x322   : > { %v5883_v36 = vpop.f32.mrf.mxu1  ;;  %v7769_v40 = vpop.f32.mrf.mxu0 }
 0x323   : > { %v3349_v43 = vadd.f32 %v5883_v36, %v5873_v55 }
 0x324   : > { %v3340_v9 = vpop.f32.mrf.mxu1  ;;  %v7771_v47 = vpop.f32.mrf.mxu0 }
 0x325   : > { %v3341_v19 = vadd.f32 %v3340_v9, %v3260_v61 }
 0x326   : > { %v5886_v56 = vpop.f32.mrf.mxu1  ;;  %v5932_v30 = vpop.f32.mrf.mxu0 }
 0x328   : > { %v3353_v4 = vpop.f32.mrf.mxu1  ;;  %v7773_v58 = vpop.f32.mrf.mxu0 }
 0x329   : > { %v3354_v14 = vadd.f32 %v3353_v4, %v3273_v29 }
 0x32a   : > { %v5887_v44 = vpop.f32.mrf.mxu1  ;;  %v7775_v53 = vpop.f32.mrf.mxu0 }
 0x32c   : > { %v3356_v60 = vpop.f32.mrf.mxu1  ;;  %v7777_v16 = vpop.f32.mrf.mxu0 }
 0x32e   : > { %v5892_v33 = vpop.f32.mrf.mxu1  ;;  %v7779_v42 = vpop.f32.mrf.mxu0 }
 0x32f   : > { %8136 = vst [vmem:[#allocation15_spill] sm:$0xff] %v7779_v42  ;;  %v3464_v1 = vadd.f32 %v5892_v33, %v3346_v62 }
 0x330   : > { %v3431_v10 = vpop.f32.mrf.mxu1  ;;  %v7781_v26 = vpop.f32.mrf.mxu0 }
 0x331   : > { %8137 = vst [vmem:[#allocation24_spill] sm:$0xff] %v7781_v26  ;;  %v3462_v20 = vadd.f32 %v3431_v10, %v3338_v49 }
 0x332   : > { %v5893_v27 = vpop.f32.mrf.mxu1  ;;  %v7783_v39 = vpop.f32.mrf.mxu0 }
 0x333   : > { %8138 = vst [vmem:[#allocation25_spill] sm:$0xff] %v7783_v39  ;;  %v3465_v5 = vadd.f32 %v5893_v27, %v3349_v43  ;;  %v3362_v39 = vadd.f32 %v5886_v56, %v5876_v17  ;;  %v3365_v17 = vadd.f32 %v5887_v44, %v7757_v38  ;;  %v3357_v56 = vadd.f32 %v3356_v60, %v7761_v22 }
 0x334   : > { %v3434_v48 = vpop.f32.mrf.mxu1  ;;  %v7785_v12 = vpop.f32.mrf.mxu0 }
 0x335   : > { %8139 = vst [vmem:[#allocation72_spill] sm:$0xff] %v7785_v12  ;;  %v3463_v26 = vadd.f32 %v3434_v48, %v3341_v19 }
 0x336   : > { %v5896_v46 = vpop.f32.mrf.mxu1  ;;  %v5952_v59 = vpop.f32.mrf.mxu0 }
 0x337   : > { %v3468_v52 = vadd.f32 %v5896_v46, %v3362_v39 }
 0x338   : > { %v3447_v6 = vpop.f32.mrf.mxu1  ;;  %v4044_v21 = vpop.f32.mrf.mxu0 }
 0x339   : > { %v3466_v36 = vadd.f32 %v3447_v6, %v3354_v14 }
 0x33a   : > { %v5897_v11 = vpop.f32.mrf.mxu1  ;;  %v5953_v10 = vpop.f32.mrf.mxu0 }
 0x33c   : > { %v3450_v37 = vpop.f32.mrf.mxu1 }
 0x33e   : > { %v5902_v57 = vpop.f32.mrf.mxu1 }
 0x33f   : > { %v3566_v51 = vadd.f32 %v5902_v57, %v3464_v1 }
 0x340   : > { %v3533_v3 = vpop.f32.mrf.mxu1 }
 0x341   : > { %v3564_v35 = vadd.f32 %v3533_v3, %v3462_v20  ;;  %v3668_v12 = vadd.f32 %v7753_v24, %v3566_v51  ;;  %v3469_v3 = vadd.f32 %v5897_v11, %v3365_v17  ;;  %v8141_v20 = vld [vmem:[#allocation24_spill] sm:$0xff] }
 0x342   : > { %v5903_v7 = vpop.f32.mrf.mxu1 }
 0x343   : > { %v3567_v42 = vadd.f32 %v5903_v7, %v3465_v5  ;;  %v3666_v55 = vadd.f32 %v7755_v18, %v3564_v35  ;;  %v3467_v7 = vadd.f32 %v3450_v37, %v3357_v56  ;;  %v4047_v18 = vpop.f32.mrf.mxu0  ;;  %v5265_v37 = vld [vmem:[%s7962_s4] ss:$0 sm:$0xff] }
 0x344   : > { %v3536_v23 = vpop.f32.mrf.mxu1 }
 0x345   : > { %v3565_v32 = vadd.f32 %v3536_v23, %v3463_v26  ;;  %v3669_v27 = vadd.f32 %v7759_v41, %v3567_v42 }
 0x346   : > { %v5906_v15 = vpop.f32.mrf.mxu1 }
 0x347   : > { %v3570_v61 = vadd.f32 %v5906_v15, %v3468_v52  ;;  %v3667_v4 = vadd.f32 %v7763_v25, %v3565_v32  ;;  %v8142_v32 = vld [vmem:[#allocation25_spill] sm:$0xff] }
 0x348   : > { %v3549_v54 = vpop.f32.mrf.mxu1 }
 0x349   : > { %v3568_v48 = vadd.f32 %v3549_v54, %v3466_v36  ;;  %v3672_v26 = vadd.f32 %v7765_v34, %v3570_v61  ;;  %v8143_v36 = vld [vmem:[#allocation72_spill] sm:$0xff] }
 0x34a   : > { %v5907_v13 = vpop.f32.mrf.mxu1 }
 0x34b   : > { %v3571_v42 = vadd.f32 %v5907_v13, %v3469_v3  ;;  %v3670_v22 = vadd.f32 %v7767_v28, %v3568_v48 }
 0x34c   : > { %v3552_v45 = vpop.f32.mrf.mxu1 }
 0x34d   : > { %v3569_v38 = vadd.f32 %v3552_v45, %v3467_v7  ;;  %v3673_v13 = vadd.f32 %v7769_v40, %v3571_v42 }
 0x34e   : > { %v5922_v50 = vpop.f32.mrf.mxu1 }
 0x34f   : > { %v3770_v33 = vadd.f32 %v5922_v50, %v3668_v12  ;;  %v3671_v28 = vadd.f32 %v7771_v47, %v3569_v38 }
 0x350   : > { %v3737_v0 = vpop.f32.mrf.mxu1 }
 0x351   : > { %v3768_v9 = vadd.f32 %v3737_v0, %v3666_v55  ;;  %v3873_v46 = vadd.f32 %v5932_v30, %v3770_v33  ;;  %v5956_v30 = vpop.f32.mrf.mxu0 }
 0x352   : > { %v5923_v8 = vpop.f32.mrf.mxu1 }
 0x353   : > { %v3771_v29 = vadd.f32 %v5923_v8, %v3669_v27  ;;  %v3871_v41 = vadd.f32 %v7773_v58, %v3768_v9  ;;  %v4060_v1 = vpop.f32.mrf.mxu0 }
 0x354   : > { %v3740_v2 = vpop.f32.mrf.mxu1 }
 0x355   : > { %v3769_v23 = vadd.f32 %v3740_v2, %v3667_v4  ;;  %v3874_v25 = vadd.f32 %v7775_v53, %v3771_v29  ;;  %v8140_v53 = vld [vmem:[#allocation15_spill] sm:$0xff] }
 0x356   : > { %v5926_v63 = vpop.f32.mrf.mxu1 }
 0x357   : > { %v3774_v60 = vadd.f32 %v5926_v63, %v3672_v26  ;;  %v3872_v58 = vadd.f32 %v7777_v16, %v3769_v23 }
 0x358   : > { %v3753_v31 = vpop.f32.mrf.mxu1 }
 0x359   : > { %v3772_v11 = vadd.f32 %v3753_v31, %v3670_v22  ;;  %v3877_v49 = vadd.f32 %v8140_v53, %v3774_v60  ;;  %v5957_v31 = vpop.f32.mrf.mxu0  ;;  %v6121_v53 = vld [vmem:[%s7963_s5 + $0x38] sm:$0xff]  }
 0x35a   : > { %v5927_v57 = vpop.f32.mrf.mxu1 }
 0x35b   : > { %v3875_v51 = vadd.f32 %v8141_v20, %v3772_v11  ;;  %v4063_v29 = vpop.f32.mrf.mxu0  ;;  %v8144_v11 = vmov 0.0   ;;  %v6124_v20 = vld [vmem:[%s7963_s5 + $0x60] sm:$0xff]  }
 0x35c   : > { %v3756_v24 = vpop.f32.mrf.mxu1 }
 0x35d   : > { %v3773_v8 = vadd.f32 %v3756_v24, %v3671_v28  ;;  %v6120_v28 = vld [vmem:[%s7963_s5 + $0x40] sm:$0xff]  }
 0x35e   : > { %v5942_v6 = vpop.f32.mrf.mxu1 }
 0x35f   : > { %v3975_v15 = vadd.f32 %v5942_v6, %v3873_v46 }
 0x360   : > { %v3942_v44 = vpop.f32.mrf.mxu1 }
 0x361   : > { %v4077_v54 = vadd.f32 %v5952_v59, %v3975_v15  ;;  %v3973_v39 = vadd.f32 %v3942_v44, %v3871_v41  ;;  %v3775_v59 = vadd.f32 %v5927_v57, %v3673_v13 }
 0x362   : > { %v5943_v34 = vpop.f32.mrf.mxu1 }
 0x363   : > { %v4075_v12 = vadd.f32 %v4044_v21, %v3973_v39  ;;  %v3976_v50 = vadd.f32 %v5943_v34, %v3874_v25  ;;  %v4092_v45 = vadd.f32 %v5265_v37, %v4077_v54  ;;  %v3878_v33 = vadd.f32 %v8142_v32, %v3775_v59  ;;  %v6115_v54 = vld [vmem:[%s7963_s5 + $0x8] sm:$0xff]   ;;  %v6116_v25 = vld [vmem:[%s7963_s5 + $0x20] sm:$0xff]  }
 0x364   : > { %v3945_v63 = vpop.f32.mrf.mxu1 }
 0x365   : > { %v4078_v62 = vadd.f32 %v5953_v10, %v3976_v50  ;;  %v3974_v0 = vadd.f32 %v3945_v63, %v3872_v58  ;;  %v4090_v2 = vadd.f32 %v5265_v37, %v4075_v12  ;;  %v4100_v40 = vmax.f32 %v4092_v45, 0.0  ;;  %v6118_v12 = vld [vmem:[%s7963_s5 + $0x30] sm:$0xff]   ;;  %v6119_v58 = vld [vmem:[%s7963_s5 + $0x28] sm:$0xff]  }
 0x366   : > { %v5946_v43 = vpop.f32.mrf.mxu1  ;;  %v3876_v10 = vadd.f32 %v8143_v36, %v3773_v8  ;;  %v6123_v8 = vld [vmem:[%s7963_s5 + $0x48] sm:$0xff]  }
 0x367   : > { %v4093_v19 = vadd.f32 %v5265_v37, %v4078_v62  ;;  %v4076_v5 = vadd.f32 %v4047_v18, %v3974_v0  ;;  %v3979_v16 = vadd.f32 %v5946_v43, %v3877_v49  ;;  %v4098_v57 = vmax.f32 %v4090_v2, 0.0  ;;  %v6125_v2 = vld [vmem:[%s7963_s5 + $0x58] sm:$0xff]  }
 0x368   : > { %v3958_v35 = vpop.f32.mrf.mxu1 }
 0x369   : > { %v4101_v21 = vmax.f32 %v4093_v19, 0.0  ;;  %v4091_v47 = vadd.f32 %v5265_v37, %v4076_v5  ;;  %v3977_v14 = vadd.f32 %v3958_v35, %v3875_v51  ;;  %v4081_v52 = vadd.f32 %v5956_v30, %v3979_v16  ;;  %v6126_v5 = vld [vmem:[%s7963_s5 + $0x70] sm:$0xff]   ;;  %v6127_v35 = vld [vmem:[%s7963_s5 + $0x68] sm:$0xff]  }
 0x36a   : > { %v5947_v55 = vpop.f32.mrf.mxu1 }
 0x36b   : > { %v4107_v61 = vmax.f32 %v4100_v40, %v4101_v21  ;;  %v4099_v9 = vmax.f32 %v4091_v47, 0.0  ;;  %v4079_v27 = vadd.f32 %v4060_v1, %v3977_v14  ;;  %v3980_v17 = vadd.f32 %v5947_v55, %v3878_v33  ;;  %v6122_v1 = vld [vmem:[%s7963_s5 + $0x50] sm:$0xff]   ;;  %v6128_v47 = vld [vmem:[%s7963_s5 + $0x78] sm:$0xff]  }
 0x36c   : > { %v3961_v56 = vpop.f32.mrf.mxu1  ;;  %v4096_v4 = vadd.f32 %v5265_v37, %v4081_v52 }
 0x36d   : > { %4112 = vst.msk [vmem:[#allocation5 + $0x8] sm:$0xff] %vm4110_vm5, %v4107_v61  ;;  %v4106_v48 = vmax.f32 %v4098_v57, %v4099_v9  ;;  %v3978_v24 = vadd.f32 %v3961_v56, %v3876_v10  ;;  %v4082_v46 = vadd.f32 %v5957_v31, %v3980_v17  ;;  %v4094_v3 = vadd.f32 %v5265_v37, %v4079_v27 }
 0x36e   : > { %v4104_v23 = vmax.f32 %v4096_v4, 0.0 }
 0x36f   : > { %4111 = vst.msk [vmem:[#allocation5] sm:$0xff] %vm4110_vm5, %v4106_v48  ;;  %v4080_v7 = vadd.f32 %v4063_v29, %v3978_v24  ;;  %v4097_v18 = vadd.f32 %v5265_v37, %v4082_v46  ;;  %v4102_v15 = vmax.f32 %v4094_v3, 0.0  ;;  %v4124_v3 = vld [vmem:[%s7964_s6] sm:$0x1] }
 0x371   : > { %v4095_v6 = vadd.f32 %v5265_v37, %v4080_v7  ;;  %v4105_v26 = vmax.f32 %v4097_v18, 0.0  ;;  %v6117_v37 = vld [vmem:[%s7963_s5 + $0x18] sm:$0xff]  }
 0x373   : > { %v4103_v41 = vmax.f32 %v4095_v6, 0.0  ;;  %v4109_v42 = vmax.f32 %v4104_v23, %v4105_v26 }
 0x375   : > { %v4108_v38 = vmax.f32 %v4102_v15, %v4103_v41  ;;  %4114 = vst.msk [vmem:[#allocation5 + $0x18] sm:$0xff] %vm4110_vm5, %v4109_v42 }
 0x376   : > { %v4115_v22 = vld [vmem:[#allocation5] ss:$2 sm:$0xff]  ;;  %v4119_v44 = vld [vmem:[#allocation5 + $0x1] ss:$2 sm:$0xff] }
 0x377   : > { %4113 = vst.msk [vmem:[#allocation5 + $0x10] sm:$0xff] %vm4110_vm5, %v4108_v38  ;;  %v4122_v60 = vmax.f32 %v4115_v22, %v4119_v44 }
 0x379   : > { %v4125_v39 = vpack.c.bf16 %v4122_v60, %v4122_v60 }
 0x37b   : > { %5961 = vmatmul.mubr.msk.bf16.vlgmr.msra.gmra.mxu1 %vm4110_vm5, %v4125_v39  ;;  %v4237_v30 = vrot.slane %v4125_v39, 1  ;;  %v4181_v34 = vshrl.u32 %v4125_v39, 16  ;;  %v4345_v50 = vrot.slane %v4125_v39, 2  ;;  %v4453_v63 = vrot.slane %v4125_v39, 3 }
 0x37c   : > { %5965 = vmatpush3.bf16.msra.mxu1 %v6115_v54  ;;  %5966 = vmatprep.mubr.msk.bf16.mxu1 %vm6192_vm4, %v8144_v11 }
 0x37d   : > { %5973 = vmatmul.mubr.msk.bf16.vlgmr.msra.gmra.mxu0 %vm4110_vm5, %v4237_v30  ;;  %5976 = vmatprep.subr.bf16.mxu1 %v8144_v11  ;;  %v4291_v13 = vrot.slane %v4181_v34, 1  ;;  %v4399_v49 = vrot.slane %v4181_v34, 2  ;;  %v4507_v43 = vrot.slane %v4181_v34, 3 }
 0x37e   : > { %5983 = vmatpush3.bf16.msra.mxu0 %v6116_v25  ;;  %5984 = vmatprep.mubr.msk.bf16.mxu0 %vm6192_vm4, %v8144_v11  ;;  %v4117_v45 = vld [vmem:[#allocation5 + $0x10] ss:$2 sm:$0xff]  ;;  %v4121_v62 = vld [vmem:[#allocation5 + $0x11] ss:$2 sm:$0xff] }
 0x37f   : > { %5994 = vmatprep.subr.bf16.mxu0 %v8144_v11  ;;  %v4123_v0 = vmax.f32 %v4117_v45, %v4121_v62 }
 0x381   : > { %v4558_v59 = vpack.c.bf16 %v4123_v0, %v4123_v0 }
 0x383   : > { %5967 = vmatmul.mubr.msk.bf16.vlgmr.msra.gmra.mxu1 %vm4110_vm5, %v4181_v34  ;;  %v4671_v51 = vrot.slane %v4558_v59, 1  ;;  %v4615_v19 = vshrl.u32 %v4558_v59, 16  ;;  %v4779_v16 = vrot.slane %v4558_v59, 2  ;;  %v4887_v21 = vrot.slane %v4558_v59, 3 }
 0x384   : > { %5977 = vmatpush3.bf16.msra.mxu1 %v6117_v37  ;;  %5978 = vmatprep.mubr.msk.bf16.mxu1 %vm6192_vm4, %v8144_v11 }
 0x385   : > { %5985 = vmatmul.mubr.msk.bf16.vlgmr.msra.gmra.mxu0 %vm4110_vm5, %v4345_v50  ;;  %5988 = vmatprep.subr.bf16.mxu1 %v8144_v11  ;;  %v4725_v40 = vrot.slane %v4615_v19, 1  ;;  %v4833_v14 = vrot.slane %v4615_v19, 2  ;;  %v4941_v31 = vrot.slane %v4615_v19, 3 }
 0x386   : > { %5995 = vmatpush3.bf16.msra.mxu0 %v6118_v12  ;;  %5996 = vmatprep.mubr.msk.bf16.mxu0 %vm6192_vm4, %v8144_v11 }
 0x387   : > { %6006 = vmatprep.subr.bf16.mxu0 %v8144_v11 }
 0x38b   : > { %5979 = vmatmul.mubr.msk.bf16.vlgmr.msra.gmra.mxu1 %vm4110_vm5, %v4291_v13 }
 0x38c   : > { %5989 = vmatpush3.bf16.msra.mxu1 %v6119_v58  ;;  %5990 = vmatprep.mubr.msk.bf16.mxu1 %vm6192_vm4, %v8144_v11 }
 0x38d   : > { %5997 = vmatmul.mubr.msk.bf16.vlgmr.msra.gmra.mxu0 %vm4110_vm5, %v4453_v63  ;;  %6000 = vmatprep.subr.bf16.mxu1 %v8144_v11 }
 0x38e   : > { %6007 = vmatpush3.bf16.msra.mxu0 %v6120_v28  ;;  %6008 = vmatprep.mubr.msk.bf16.mxu0 %vm6192_vm4, %v8144_v11 }
 0x38f   : > { %6018 = vmatprep.subr.bf16.mxu0 %v8144_v11 }
 0x393   : > { %5991 = vmatmul.mubr.msk.bf16.vlgmr.msra.gmra.mxu1 %vm4110_vm5, %v4399_v49 }
 0x394   : > { %6001 = vmatpush3.bf16.msra.mxu1 %v6121_v53  ;;  %6002 = vmatprep.mubr.msk.bf16.mxu1 %vm6192_vm4, %v8144_v11 }
 0x395   : > { %6009 = vmatmul.mubr.msk.bf16.vlgmr.msra.gmra.mxu0 %vm4110_vm5, %v4558_v59  ;;  %6012 = vmatprep.subr.bf16.mxu1 %v8144_v11 }
 0x396   : > { %6019 = vmatpush3.bf16.msra.mxu0 %v6122_v1  ;;  %6020 = vmatprep.mubr.msk.bf16.mxu0 %vm6192_vm4, %v8144_v11 }
 0x397   : > { %6030 = vmatprep.subr.bf16.mxu0 %v8144_v11 }
 0x39b   : > { %6003 = vmatmul.mubr.msk.bf16.vlgmr.msra.gmra.mxu1 %vm4110_vm5, %v4507_v43 }
 0x39c   : > { %6013 = vmatpush3.bf16.msra.mxu1 %v6123_v8  ;;  %6014 = vmatprep.mubr.msk.bf16.mxu1 %vm6192_vm4, %v8144_v11 }
 0x39d   : > { %6021 = vmatmul.mubr.msk.bf16.vlgmr.msra.gmra.mxu0 %vm4110_vm5, %v4671_v51  ;;  %6024 = vmatprep.subr.bf16.mxu1 %v8144_v11 }
 0x39e   : > { %6031 = vmatpush3.bf16.msra.mxu0 %v6124_v20  ;;  %6032 = vmatprep.mubr.msk.bf16.mxu0 %vm6192_vm4, %v8144_v11 }
 0x39f   : > { %6042 = vmatprep.subr.bf16.mxu0 %v8144_v11 }
 0x3a3   : > { %6015 = vmatmul.mubr.msk.bf16.vlgmr.msra.gmra.mxu1 %vm4110_vm5, %v4615_v19 }
 0x3a4   : > { %6025 = vmatpush3.bf16.msra.mxu1 %v6125_v2  ;;  %6026 = vmatprep.mubr.msk.bf16.mxu1 %vm6192_vm4, %v8144_v11 }
 0x3a5   : > { %6033 = vmatmul.mubr.msk.bf16.vlgmr.msra.gmra.mxu0 %vm4110_vm5, %v4779_v16  ;;  %6036 = vmatprep.subr.bf16.mxu1 %v8144_v11 }
 0x3a6   : > { %6043 = vmatpush3.bf16.msra.mxu0 %v6126_v5  ;;  %6044 = vmatprep.mubr.msk.bf16.mxu0 %vm6192_vm4, %v8144_v11 }
 0x3ab   : > { %6027 = vmatmul.mubr.msk.bf16.vlgmr.msra.gmra.mxu1 %vm4110_vm5, %v4725_v40 }
 0x3ac   : > { %6037 = vmatpush3.bf16.msra.mxu1 %v6127_v35  ;;  %6038 = vmatprep.mubr.msk.bf16.mxu1 %vm6192_vm4, %v8144_v11 }
 0x3ad   : > { %6045 = vmatmul.mubr.msk.bf16.vlgmr.msra.gmra.mxu0 %vm4110_vm5, %v4887_v21  ;;  %6048 = vmatprep.subr.bf16.mxu1 %v8144_v11 }
 0x3b3   : > { %6039 = vmatmul.mubr.msk.bf16.vlgmr.msra.gmra.mxu1 %vm4110_vm5, %v4833_v14 }
 0x3b4   : > { %6049 = vmatpush3.bf16.msra.mxu1 %v6128_v47  ;;  %6050 = vmatprep.mubr.msk.bf16.mxu1 %vm6192_vm4, %v8144_v11 }
 0x3bb   : > { %6051 = vmatmul.mubr.msk.bf16.vlgmr.msra.gmra.mxu1 %vm4110_vm5, %v4941_v31 }
 0x43b   : > { %v4171_v52 = vpop.f32.mrf.mxu1 }
 0x43c   : > { %v4177_v26 = vadd.f32 %v4171_v52, %v4124_v3 }
 0x43d   : > { %v5962_v32 = vpop.f32.mrf.mxu1  ;;  %v4281_v33 = vpop.f32.mrf.mxu0 }
 0x43f   : > { %v4174_v55 = vpop.f32.mrf.mxu1  ;;  %v5974_v36 = vpop.f32.mrf.mxu0 }
 0x441   : > { %v5963_v10 = vpop.f32.mrf.mxu1  ;;  %v4284_v57 = vpop.f32.mrf.mxu0 }
 0x443   : > { %v4226_v61 = vpop.f32.mrf.mxu1  ;;  %v5975_v9 = vpop.f32.mrf.mxu0 }
 0x444   : > { %v4232_v42 = vadd.f32 %v4226_v61, %v4177_v26 }
 0x445   : > { %v5968_v27 = vpop.f32.mrf.mxu1  ;;  %v4389_v17 = vpop.f32.mrf.mxu0 }
 0x446   : > { %v4287_v54 = vadd.f32 %v4281_v33, %v4232_v42 }
 0x447   : > { %v4229_v56 = vpop.f32.mrf.mxu1  ;;  %v5986_v48 = vpop.f32.mrf.mxu0 }
 0x449   : > { %v5969_v24 = vpop.f32.mrf.mxu1  ;;  %v4392_v29 = vpop.f32.mrf.mxu0 }
 0x44b   : > { %v4335_v4 = vpop.f32.mrf.mxu1  ;;  %v5987_v46 = vpop.f32.mrf.mxu0 }
 0x44c   : > { %v4341_v30 = vadd.f32 %v4335_v4, %v4287_v54 }
 0x44d   : > { %v5980_v7 = vpop.f32.mrf.mxu1  ;;  %v4497_v18 = vpop.f32.mrf.mxu0 }
 0x44e   : > { %v4395_v50 = vadd.f32 %v4389_v17, %v4341_v30 }
 0x44f   : > { %v4338_v6 = vpop.f32.mrf.mxu1  ;;  %v5998_v23 = vpop.f32.mrf.mxu0 }
 0x451   : > { %v5981_v15 = vpop.f32.mrf.mxu1  ;;  %v4500_v41 = vpop.f32.mrf.mxu0 }
 0x453   : > { %v4443_v38 = vpop.f32.mrf.mxu1  ;;  %v5999_v22 = vpop.f32.mrf.mxu0 }
 0x454   : > { %v4449_v28 = vadd.f32 %v4443_v38, %v4395_v50 }
 0x455   : > { %v5992_v44 = vpop.f32.mrf.mxu1  ;;  %v4605_v60 = vpop.f32.mrf.mxu0 }
 0x456   : > { %v4503_v53 = vadd.f32 %v4497_v18, %v4449_v28 }
 0x457   : > { %v4446_v39 = vpop.f32.mrf.mxu1  ;;  %v6010_v25 = vpop.f32.mrf.mxu0 }
 0x459   : > { %v5993_v11 = vpop.f32.mrf.mxu1  ;;  %v4608_v37 = vpop.f32.mrf.mxu0 }
 0x45b   : > { %v4551_v34 = vpop.f32.mrf.mxu1  ;;  %v6011_v12 = vpop.f32.mrf.mxu0 }
 0x45c   : > { %v4557_v59 = vadd.f32 %v4551_v34, %v4503_v53 }
 0x45d   : > { %v6004_v58 = vpop.f32.mrf.mxu1  ;;  %v4715_v13 = vpop.f32.mrf.mxu0 }
 0x45e   : > { %v4611_v2 = vadd.f32 %v4605_v60, %v4557_v59 }
 0x45f   : > { %v4554_v63 = vpop.f32.mrf.mxu1  ;;  %v6022_v45 = vpop.f32.mrf.mxu0 }
 0x461   : > { %v6005_v62 = vpop.f32.mrf.mxu1  ;;  %v4718_v0 = vpop.f32.mrf.mxu0 }
 0x463   : > { %v4660_v49 = vpop.f32.mrf.mxu1  ;;  %v6023_v1 = vpop.f32.mrf.mxu0 }
 0x464   : > { %v4666_v16 = vadd.f32 %v4660_v49, %v4611_v2 }
 0x465   : > { %v6016_v8 = vpop.f32.mrf.mxu1  ;;  %v4823_v43 = vpop.f32.mrf.mxu0 }
 0x466   : > { %v4721_v14 = vadd.f32 %v4715_v13, %v4666_v16 }
 0x467   : > { %v4663_v20 = vpop.f32.mrf.mxu1  ;;  %v6034_v51 = vpop.f32.mrf.mxu0 }
 0x469   : > { %v6017_v19 = vpop.f32.mrf.mxu1  ;;  %v4826_v5 = vpop.f32.mrf.mxu0 }
 0x46b   : > { %v4769_v35 = vpop.f32.mrf.mxu1  ;;  %v6035_v40 = vpop.f32.mrf.mxu0 }
 0x46c   : > { %v4775_v32 = vadd.f32 %v4769_v35, %v4721_v14 }
 0x46d   : > { %v6028_v21 = vpop.f32.mrf.mxu1  ;;  %v4931_v47 = vpop.f32.mrf.mxu0 }
 0x46e   : > { %v4829_v57 = vadd.f32 %v4823_v43, %v4775_v32 }
 0x46f   : > { %v4772_v31 = vpop.f32.mrf.mxu1  ;;  %v6046_v52 = vpop.f32.mrf.mxu0 }
 0x471   : > { %v6029_v33 = vpop.f32.mrf.mxu1  ;;  %v4934_v55 = vpop.f32.mrf.mxu0 }
 0x473   : > { %v4877_v36 = vpop.f32.mrf.mxu1  ;;  %v6047_v10 = vpop.f32.mrf.mxu0 }
 0x474   : > { %v4883_v9 = vadd.f32 %v4877_v36, %v4829_v57 }
 0x475   : > { %v6040_v61 = vpop.f32.mrf.mxu1 }
 0x476   : > { %v4937_v56 = vadd.f32 %v4931_v47, %v4883_v9 }
 0x477   : > { %v4880_v27 = vpop.f32.mrf.mxu1 }
 0x479   : > { %v6041_v17 = vpop.f32.mrf.mxu1 }
 0x47b   : > { %v4985_v48 = vpop.f32.mrf.mxu1 }
 0x47c   : > { %v4991_v24 = vadd.f32 %v4985_v48, %v4937_v56 }
 0x47d   : > { %v6052_v29 = vpop.f32.mrf.mxu1 }
 0x47e   : > { %4993 = vst.msk [vmem:[%s270_s29] sm:$0x1] %vm4992_vm6, %v4991_v24 }
 0x47f   : > { %v4988_v4 = vpop.f32.mrf.mxu1 }
 0x480   : > { %6142 = shalt.err (!%p6139_p3)
}
 0x481   : > { %s6143_s19 = scalar_lea.hbm %s7917_s14, 16  ;;  %s6147_s22 = scalar_lea.hbm %s7965_s7, 32 }
 0x482   : > { %p6144_p4 = scmp.ne.s32.totalorder %s7917_s14, %s6143_s19  ;;  %p6148_p9 = scmp.lt.s32.totalorder %s7917_s14, %s7965_s7 }
 0x483   : > { %p6149_p10 = scmp.lt.s32.totalorder %s6147_s22, %s6143_s19 }
 0x484   : > { %p6145_p7 = pnand %p6144_p4, %p6272_p5 }
 0x485   : > { %p6150_p11 = por %p6149_p10, %p6148_p9 }
 0x486   : > { %p6146_p8 = pneg %p6145_p7 }
 0x488   : > { %p6151_p12 = pnand %p6150_p11, %p6146_p8 }
 0x48a   : > { %6154 = shalt.err (!%p6151_p12)
}
 0x48b   : > { %6072 = dma.vmem_to_hbm [thread:$0]  (%p6272_p5), %s7919_s8, 16, %s7917_s14, %s4995_s28   ;;  %v6053_v46 = vpop.f32.mrf.mxu1 }
 0x48c PF: > { %p6078_p13 = scmp.ge.s32.totalorder %s6189_s27, 2  ;;  %s5019_s9 = sand.u32 1, %s6177_s24  }
 0x48d   : > { %s5020_s13 = scalar_lea.sflag [#allocation7], %s5019_s9 }
 0x48e   : > { %p6075_p0 = pnand %p6078_p13, %p6276_p6 }
 0x490   : > { %p6076_p1 = pneg %p6075_p0 }
 0x492   : > { %6172 = dma.done.wait (%p6076_p1), %s5020_s13, 16  }
 0x493   : > { %6174 = vsyncadd (%p6076_p1), %s5020_s13, 4294967280  ;;  %p17_p2 = scmp.ge.s32.totalorder %s6259_s30, 4   ;;  %s8145_s24 = smov %s6181_s25 }
 0x494   : > { %s8146_s25 = smov %s6185_s26  ;;  %s8147_s26 = smov %s6270_s10 }
 0x495   : > { %s8148_s27 = smov %s6259_s30  ;;  %19 = sbr.rel (!%p17_p2) target bundleno = 3 (0x3), region = 136 }
 0x49a   :  { %5024 = vsyncpa [#allocation7], 1 }
 0x49b   :  { %5026 = vsyncpa [#allocation7 + $0x1], 1 }

</bundles_post_ra>
